<compile_context>
chip_gen: v5e
topology: v5e:2x2
jax: 0.10.0
libtpu: 0.0.40
codegen_flags: <defaults>
</compile_context>

<pallas_src>
import numpy as np

import jax
import jax.numpy as jnp
from jax.experimental import pallas as pl
from jax.experimental.pallas import tpu as pltpu


# Full-array block resident in VMEM (no grid -> block == whole array).
_VMEM_SPEC = pl.BlockSpec(memory_space=pltpu.MemorySpace.VMEM)


# ---------------------------------------------------------------------------
# Layer-1 im2col (pure JAX, runs once inside jit on the tiny raw input).
# Flattened patch column ordering is (Cin, kh, kw) to match
# w.reshape(Cout, Cin*k*k).
# ---------------------------------------------------------------------------
def im2col(x_nhwc, k=4, s=2, p=1):
    B, H, W, C = x_nhwc.shape
    xp = jnp.pad(x_nhwc, ((0, 0), (p, p), (p, p), (0, 0)))
    Ho = (H + 2 * p - k) // s + 1
    Wo = (W + 2 * p - k) // s + 1
    rows = []
    for kh in range(k):
        cols = []
        for kw in range(k):
            cols.append(xp[:, kh: kh + s * Ho: s, kw: kw + s * Wo: s, :])
        rows.append(jnp.stack(cols, axis=3))              # (B, Ho, Wo, kw, C)
    patches = jnp.stack(rows, axis=3)                     # (B, Ho, Wo, kh, kw, C)
    patches = jnp.transpose(patches, (0, 1, 2, 5, 3, 4))  # (B, Ho, Wo, C, kh, kw)
    return patches.reshape(B * Ho * Wo, C * k * k), Ho, Wo


# ---------------------------------------------------------------------------
# Constant helpers built once at parameter-prep time (outside the hot path).
# ---------------------------------------------------------------------------
def _selection_matrices(B, H_in, W_in, k=4, s=2, p=1):
    """(k*k, M_out, M_in) 0/1 matrices: S[i] @ A == im2col patch for offset i."""
    H_out = (H_in + 2 * p - k) // s + 1
    W_out = (W_in + 2 * p - k) // s + 1
    M_in = B * H_in * W_in
    M_out = B * H_out * W_out
    S = np.zeros((k * k, M_out, M_in), dtype=np.float32)
    for kh in range(k):
        for kw in range(k):
            i = kh * k + kw
            for b in range(B):
                for oh in range(H_out):
                    ih = s * oh + kh - p
                    if not (0 <= ih < H_in):
                        continue
                    for ow in range(W_out):
                        iw = s * ow + kw - p
                        if not (0 <= iw < W_in):
                            continue
                        S[i,
                          b * H_out * W_out + oh * W_out + ow,
                          b * H_in * W_in + ih * W_in + iw] = 1.0
    return S, H_out, W_out


def _vmem_padded_bytes(arr):
    """Tile-padded VMEM footprint of one full-array operand."""
    it = np.dtype(arr.dtype).itemsize
    sub = {4: 8, 2: 16, 1: 32}.get(it, 8)
    shape = tuple(arr.shape)
    if len(shape) == 0:
        return it
    lane = -(-shape[-1] // 128) * 128
    subl = -(-shape[-2] // sub) * sub if len(shape) >= 2 else 1
    lead = 1
    for d in shape[:-2]:
        lead *= d
    return lead * subl * lane * it


def _vmem_budget_bytes():
    try:
        cap = int(pltpu.get_tpu_info().vmem_capacity_bytes)
    except Exception:
        cap = 16 * 1024 * 1024   # conservative scoped-VMEM fallback
    return min(cap, 32 * 1024 * 1024)


# ---------------------------------------------------------------------------
# In-kernel building blocks
# ---------------------------------------------------------------------------
def _bn_lrelu(y, gamma, beta):
    """Train-mode BatchNorm2d over axis 0 (= (N,H,W)) folded to scale/shift,
    then LeakyReLU(0.2) as a single max.  Exact only because the whole M axis
    lives in this one block (grid-less kernel)."""
    mean = jnp.mean(y, axis=0, keepdims=True)
    var = jnp.mean(jnp.square(y - mean), axis=0, keepdims=True)   # two-pass, biased
    scale = gamma * jax.lax.rsqrt(var + 1e-5)
    shift = beta - mean * scale
    y = y * scale + shift
    return jnp.maximum(y, 0.2 * y)                                # LeakyReLU(0.2)


def _gathered_conv(a_bf16, s_ref, w_ref):
    """Conv2d(k=4,s=2,p=1,bias=False) on a VMEM-resident activation as 16
    statically-unrolled (kh,kw) contributions:  sum_i (S_i @ A) @ W_i."""
    acc = None
    for i in range(s_ref.shape[0]):
        patch = jnp.dot(s_ref[i], a_bf16, preferred_element_type=jnp.float32)
        contrib = jnp.dot(patch.astype(jnp.bfloat16), w_ref[i],
                          preferred_element_type=jnp.float32)
        acc = contrib if acc is None else acc + contrib
    return acc


# ---------------------------------------------------------------------------
# The single fused kernel: conv1..conv4 (+BN+LeakyReLU), spatial sum,
# fused go_embedding o embedding1, final dot-reduction.
# ---------------------------------------------------------------------------
def _linnet_fused_kernel(cols1_ref, go_ref, w1_ref,
                         s2_ref, w2_ref, s3_ref, w3_ref, s4_ref, w4_ref,
                         wf_ref, pp_ref, summ_ref, o_ref):
    pp = pp_ref[...]                                  # (9, 128) f32 packed params

    # Layer 1: im2col GEMM (patches of the raw input built outside the kernel).
    c1 = w1_ref.shape[1]
    y = jnp.dot(cols1_ref[...], w1_ref[...], preferred_element_type=jnp.float32)
    y = _bn_lrelu(y, pp[0:1, :c1], pp[1:2, :c1])

    # Layers 2..4: in-kernel window gathering + BN + LeakyReLU, all in VMEM.
    for s_ref, w_ref, row in ((s2_ref, w2_ref, 2),
                              (s3_ref, w3_ref, 4),
                              (s4_ref, w4_ref, 6)):
        cout = w_ref.shape[2]
        y = _gathered_conv(y.astype(jnp.bfloat16), s_ref, w_ref)
        y = _bn_lrelu(y, pp[row:row + 1, :cout], pp[row + 1:row + 2, :cout])

    # h[b, :] = sum over spatial positions of the layer-4 output.
    hsum = jnp.dot(summ_ref[...], y, preferred_element_type=jnp.float32)  # (B, C4)

    # Fused go_embedding o embedding1 (bias folded):  w_y = go @ W_fused + b_fused
    c4 = wf_ref.shape[1]
    wy = jnp.dot(go_ref[...], wf_ref[...],
                 preferred_element_type=jnp.float32) + pp[8:9, :c4]       # (B, C4)

    o_ref[...] = jnp.sum(wy * hsum, axis=1, keepdims=True)                # (B, 1)


# ---------------------------------------------------------------------------
# Parameters (deterministic init following weights_init semantics)
# ---------------------------------------------------------------------------
def init_params(key, nc=1, ndf=16, n_gens=41):
    keys = jax.random.split(key, 12)
    p = {}
    chans = [nc, ndf, ndf * 2, ndf * 4, ndf * 8]
    for l in range(4):
        p[f"conv{l+1}_w"] = 0.02 * jax.random.normal(
            keys[l], (chans[l + 1], chans[l], 4, 4), jnp.float32)        # N(0, 0.02)
        p[f"bn{l+1}_gamma"] = 1.0 + 0.02 * jax.random.normal(
            keys[4 + l], (chans[l + 1],), jnp.float32)                   # N(1, 0.02)
        p[f"bn{l+1}_beta"] = jnp.zeros((chans[l + 1],), jnp.float32)     # fill_(0)
    bound = 1.0 / jnp.sqrt(295.0)                                        # torch Linear default
    p["go_w"] = jax.random.uniform(keys[8], (n_gens, 295), jnp.float32, -bound, bound)
    p["go_b"] = jax.random.uniform(keys[9], (n_gens,), jnp.float32, -bound, bound)
    p["emb1_w"] = jax.random.normal(keys[10], (ndf * 8, n_gens), jnp.float32)  # N(0, 1)
    return p


def prepare_params(p, batch_size, image_hw, nc=1, ndf=16):
    """One-time rearrangement into kernel-ready constants."""
    q = {}
    # Layer-1 weight in im2col-GEMM layout (K = nc*16, Cout1).
    w1 = np.asarray(p["conv1_w"])
    q["w1"] = jnp.asarray(w1.reshape(w1.shape[0], -1).T, jnp.bfloat16)

    # Layers 2-4: per-(kh,kw) weight stacks + constant 0/1 selection matrices.
    h_in = w_in = image_hw // 2            # spatial size of layer-1 output
    for l in range(2, 5):
        w = np.asarray(p[f"conv{l}_w"])    # (Cout, Cin, 4, 4)
        q[f"w{l}"] = jnp.asarray(
            np.transpose(w, (2, 3, 1, 0)).reshape(16, w.shape[1], w.shape[0]),
            jnp.bfloat16)                  # (16, Cin, Cout), i = kh*4 + kw
        S, h_out, w_out = _selection_matrices(batch_size, h_in, w_in)
        q[f"s{l}"] = jnp.asarray(S, jnp.bfloat16)   # 0/1 -> exact in bf16
        h_in, w_in = h_out, w_out

    # Packed f32 params: rows 0..7 = gamma/beta per layer, row 8 = fused bias.
    c4 = ndf * 8
    pw = max(128, c4)
    pp = np.zeros((9, pw), np.float32)
    for l in range(1, 5):
        g = np.asarray(p[f"bn{l}_gamma"]); b = np.asarray(p[f"bn{l}_beta"])
        pp[2 * (l - 1), :g.shape[0]] = g
        pp[2 * (l - 1) + 1, :b.shape[0]] = b
    go_w = np.asarray(p["go_w"]); go_b = np.asarray(p["go_b"])
    emb1_w = np.asarray(p["emb1_w"])
    pp[8, :c4] = go_b @ emb1_w.T                                   # fused bias
    q["pp"] = jnp.asarray(pp)
    q["w_fused"] = jnp.asarray(go_w.T @ emb1_w.T, jnp.bfloat16)    # (295, C4)

    # Constant spatial-summation matrix for sum over (Ho4, Wo4).
    sp = h_in * w_in
    summ = np.zeros((batch_size, batch_size * sp), np.float32)
    for b in range(batch_size):
        summ[b, b * sp:(b + 1) * sp] = 1.0
    q["summ"] = jnp.asarray(summ)
    return q


# ---------------------------------------------------------------------------
# LINnet_D forward: ONE pallas_call (jit this).
# ---------------------------------------------------------------------------
def linnet_d_forward(q, x_nchw, go):
    # TODO(synk): the data.go_dict[data.id2prt[y1]] dataset lookup has no Pallas
    # equivalent; the 295-d GO vector `go` is taken directly as a model input.
    B = x_nchw.shape[0]
    x_nhwc = jnp.transpose(x_nchw.astype(jnp.bfloat16), (0, 2, 3, 1))  # bf16 before im2col
    cols1, _, _ = im2col(x_nhwc)                                       # (B*Ho1*Wo1, nc*16)

    operands = (cols1, go.astype(jnp.bfloat16), q["w1"],
                q["s2"], q["w2"], q["s3"], q["w3"], q["s4"], q["w4"],
                q["w_fused"], q["pp"], q["summ"])

    # Sanity: prepared selection matrices must match this input's geometry.
    if q["s2"].shape[2] != cols1.shape[0]:
        raise ValueError("prepare_params() geometry does not match the input shape")

    # Single-block VMEM guard (tile-padded bytes, x2 for input double-buffering).
    total = sum(_vmem_padded_bytes(a) for a in operands) + 8 * 128 * 4
    if 2 * total > _vmem_budget_bytes():
        raise ValueError(f"fused LINnet_D kernel needs ~{2 * total} B of VMEM; "
                         "tile along Cout with a parallel grid axis instead")

    out = pl.pallas_call(
        _linnet_fused_kernel,
        out_shape=jax.ShapeDtypeStruct((B, 1), jnp.float32),
        in_specs=[_VMEM_SPEC] * len(operands),
        out_specs=_VMEM_SPEC,
    )(*operands)
    return out[:, 0]


if __name__ == "__main__":
    key = jax.random.PRNGKey(0)
    kp, kx, kg = jax.random.split(key, 3)
    B, H = 2, 16
    raw_params = init_params(kp, nc=1, ndf=16, n_gens=41)
    params = prepare_params(raw_params, batch_size=B, image_hw=H, nc=1, ndf=16)
    x = jax.random.normal(kx, (B, 1, H, H), jnp.float32)              # NCHW like PyTorch
    go = (jax.random.uniform(kg, (B, 295)) > 0.5).astype(jnp.float32)
    fwd = jax.jit(linnet_d_forward)
    out = fwd(params, x, go)
    jax.block_until_ready(out)
    assert out.shape == (B,)
    print("KERNEL_OK")
</pallas_src>

<mosaic_0001>
module attributes {stable_mosaic.version = 11 : i64} {
  func.func @_linnet_fused_kernel(%arg0: memref<128x16xbf16, #tpu.memory_space<vmem>>, %arg1: memref<2x295xbf16, #tpu.memory_space<vmem>>, %arg2: memref<16x16xbf16, #tpu.memory_space<vmem>>, %arg3: memref<16x32x128xbf16, #tpu.memory_space<vmem>>, %arg4: memref<16x16x32xbf16, #tpu.memory_space<vmem>>, %arg5: memref<16x8x32xbf16, #tpu.memory_space<vmem>>, %arg6: memref<16x32x64xbf16, #tpu.memory_space<vmem>>, %arg7: memref<16x2x8xbf16, #tpu.memory_space<vmem>>, %arg8: memref<16x64x128xbf16, #tpu.memory_space<vmem>>, %arg9: memref<295x128xbf16, #tpu.memory_space<vmem>>, %arg10: memref<9x128xf32, #tpu.memory_space<vmem>>, %arg11: memref<2x2xf32, #tpu.memory_space<vmem>>, %arg12: memref<2x1xf32, #tpu.memory_space<vmem>>) attributes {dimension_semantics = [], scalar_prefetch = 0 : i64, scratch_operands = 0 : i64, tpu.core_type = #tpu.core_type<tc>} {
    %c0 = arith.constant 0 : index
    %c0_0 = arith.constant 0 : index
    %0 = vector.load %arg10[%c0, %c0_0] : memref<9x128xf32, #tpu.memory_space<vmem>>, vector<9x128xf32>
    %c0_1 = arith.constant 0 : index
    %c0_2 = arith.constant 0 : index
    %1 = vector.load %arg0[%c0_1, %c0_2] : memref<128x16xbf16, #tpu.memory_space<vmem>>, vector<128x16xbf16>
    %c0_3 = arith.constant 0 : index
    %c0_4 = arith.constant 0 : index
    %2 = vector.load %arg2[%c0_3, %c0_4] : memref<16x16xbf16, #tpu.memory_space<vmem>>, vector<16x16xbf16>
    %cst = arith.constant dense<0.000000e+00> : vector<128x16xf32>
    %3 = tpu.matmul %1, %2, %cst {dimension_numbers = #tpu.dot_dimension_numbers<[1], [0], [0], [1], [0, 0, 1, 1], [], []>} : vector<128x16xbf16>, vector<16x16xbf16>, vector<128x16xf32> -> vector<128x16xf32>
    %4 = vector.extract_strided_slice %0 {offsets = [0, 0], sizes = [1, 16], strides = [1, 1]} : vector<9x128xf32> to vector<1x16xf32>
    %5 = vector.extract_strided_slice %0 {offsets = [1, 0], sizes = [1, 16], strides = [1, 1]} : vector<9x128xf32> to vector<1x16xf32>
    %cst_5 = arith.constant dense<0.000000e+00> : vector<16xf32>
    %6 = vector.multi_reduction <add>, %3, %cst_5 [0] : vector<128x16xf32> to vector<16xf32>
    %7 = vector.shape_cast %6 : vector<16xf32> to vector<1x16xf32>
    %cst_6 = arith.constant 1.280000e+02 : f32
    %8 = vector.broadcast %cst_6 : f32 to vector<1x16xf32>
    %9 = arith.divf %7, %8 : vector<1x16xf32>
    %10 = vector.broadcast %9 : vector<1x16xf32> to vector<128x16xf32>
    %11 = arith.subf %3, %10 : vector<128x16xf32>
    %12 = arith.mulf %11, %11 : vector<128x16xf32>
    %cst_7 = arith.constant dense<0.000000e+00> : vector<16xf32>
    %13 = vector.multi_reduction <add>, %12, %cst_7 [0] : vector<128x16xf32> to vector<16xf32>
    %14 = vector.shape_cast %13 : vector<16xf32> to vector<1x16xf32>
    %cst_8 = arith.constant 1.280000e+02 : f32
    %15 = vector.broadcast %cst_8 : f32 to vector<1x16xf32>
    %16 = arith.divf %14, %15 : vector<1x16xf32>
    %cst_9 = arith.constant 9.99999974E-6 : f32
    %17 = vector.broadcast %cst_9 : f32 to vector<1x16xf32>
    %18 = arith.addf %16, %17 : vector<1x16xf32>
    %19 = math.rsqrt %18 : vector<1x16xf32>
    %20 = arith.mulf %4, %19 : vector<1x16xf32>
    %21 = arith.mulf %9, %20 : vector<1x16xf32>
    %22 = arith.subf %5, %21 : vector<1x16xf32>
    %23 = vector.broadcast %20 : vector<1x16xf32> to vector<128x16xf32>
    %24 = arith.mulf %3, %23 : vector<128x16xf32>
    %25 = vector.broadcast %22 : vector<1x16xf32> to vector<128x16xf32>
    %26 = arith.addf %24, %25 : vector<128x16xf32>
    %cst_10 = arith.constant 2.000000e-01 : f32
    %27 = vector.broadcast %cst_10 : f32 to vector<128x16xf32>
    %28 = arith.mulf %27, %26 : vector<128x16xf32>
    %29 = arith.maximumf %26, %28 : vector<128x16xf32>
    %30 = arith.truncf %29 : vector<128x16xf32> to vector<128x16xbf16>
    %c0_11 = arith.constant 0 : index
    %c0_12 = arith.constant 0 : index
    %c0_13 = arith.constant 0 : index
    %31 = vector.load %arg3[%c0_11, %c0_12, %c0_13] : memref<16x32x128xbf16, #tpu.memory_space<vmem>>, vector<1x32x128xbf16>
    %32 = vector.shape_cast %31 : vector<1x32x128xbf16> to vector<32x128xbf16>
    %cst_14 = arith.constant dense<0.000000e+00> : vector<32x16xf32>
    %33 = tpu.matmul %32, %30, %cst_14 {dimension_numbers = #tpu.dot_dimension_numbers<[1], [0], [0], [1], [0, 0, 1, 1], [], []>} : vector<32x128xbf16>, vector<128x16xbf16>, vector<32x16xf32> -> vector<32x16xf32>
    %34 = arith.truncf %33 : vector<32x16xf32> to vector<32x16xbf16>
    %c0_15 = arith.constant 0 : index
    %c0_16 = arith.constant 0 : index
    %c0_17 = arith.constant 0 : index
    %35 = vector.load %arg4[%c0_15, %c0_16, %c0_17] : memref<16x16x32xbf16, #tpu.memory_space<vmem>>, vector<1x16x32xbf16>
    %36 = vector.shape_cast %35 : vector<1x16x32xbf16> to vector<16x32xbf16>
    %cst_18 = arith.constant dense<0.000000e+00> : vector<32x32xf32>
    %37 = tpu.matmul %34, %36, %cst_18 {dimension_numbers = #tpu.dot_dimension_numbers<[1], [0], [0], [1], [0, 0, 1, 1], [], []>} : vector<32x16xbf16>, vector<16x32xbf16>, vector<32x32xf32> -> vector<32x32xf32>
    %c1 = arith.constant 1 : index
    %c0_19 = arith.constant 0 : index
    %c0_20 = arith.constant 0 : index
    %38 = vector.load %arg3[%c1, %c0_19, %c0_20] : memref<16x32x128xbf16, #tpu.memory_space<vmem>>, vector<1x32x128xbf16>
    %39 = vector.shape_cast %38 : vector<1x32x128xbf16> to vector<32x128xbf16>
    %cst_21 = arith.constant dense<0.000000e+00> : vector<32x16xf32>
    %40 = tpu.matmul %39, %30, %cst_21 {dimension_numbers = #tpu.dot_dimension_numbers<[1], [0], [0], [1], [0, 0, 1, 1], [], []>} : vector<32x128xbf16>, vector<128x16xbf16>, vector<32x16xf32> -> vector<32x16xf32>
    %41 = arith.truncf %40 : vector<32x16xf32> to vector<32x16xbf16>
    %c1_22 = arith.constant 1 : index
    %c0_23 = arith.constant 0 : index
    %c0_24 = arith.constant 0 : index
    %42 = vector.load %arg4[%c1_22, %c0_23, %c0_24] : memref<16x16x32xbf16, #tpu.memory_space<vmem>>, vector<1x16x32xbf16>
    %43 = vector.shape_cast %42 : vector<1x16x32xbf16> to vector<16x32xbf16>
    %cst_25 = arith.constant dense<0.000000e+00> : vector<32x32xf32>
    %44 = tpu.matmul %41, %43, %cst_25 {dimension_numbers = #tpu.dot_dimension_numbers<[1], [0], [0], [1], [0, 0, 1, 1], [], []>} : vector<32x16xbf16>, vector<16x32xbf16>, vector<32x32xf32> -> vector<32x32xf32>
    %45 = arith.addf %37, %44 : vector<32x32xf32>
    %c2 = arith.constant 2 : index
    %c0_26 = arith.constant 0 : index
    %c0_27 = arith.constant 0 : index
    %46 = vector.load %arg3[%c2, %c0_26, %c0_27] : memref<16x32x128xbf16, #tpu.memory_space<vmem>>, vector<1x32x128xbf16>
    %47 = vector.shape_cast %46 : vector<1x32x128xbf16> to vector<32x128xbf16>
    %cst_28 = arith.constant dense<0.000000e+00> : vector<32x16xf32>
    %48 = tpu.matmul %47, %30, %cst_28 {dimension_numbers = #tpu.dot_dimension_numbers<[1], [0], [0], [1], [0, 0, 1, 1], [], []>} : vector<32x128xbf16>, vector<128x16xbf16>, vector<32x16xf32> -> vector<32x16xf32>
    %49 = arith.truncf %48 : vector<32x16xf32> to vector<32x16xbf16>
    %c2_29 = arith.constant 2 : index
    %c0_30 = arith.constant 0 : index
    %c0_31 = arith.constant 0 : index
    %50 = vector.load %arg4[%c2_29, %c0_30, %c0_31] : memref<16x16x32xbf16, #tpu.memory_space<vmem>>, vector<1x16x32xbf16>
    %51 = vector.shape_cast %50 : vector<1x16x32xbf16> to vector<16x32xbf16>
    %cst_32 = arith.constant dense<0.000000e+00> : vector<32x32xf32>
    %52 = tpu.matmul %49, %51, %cst_32 {dimension_numbers = #tpu.dot_dimension_numbers<[1], [0], [0], [1], [0, 0, 1, 1], [], []>} : vector<32x16xbf16>, vector<16x32xbf16>, vector<32x32xf32> -> vector<32x32xf32>
    %53 = arith.addf %45, %52 : vector<32x32xf32>
    %c3 = arith.constant 3 : index
    %c0_33 = arith.constant 0 : index
    %c0_34 = arith.constant 0 : index
    %54 = vector.load %arg3[%c3, %c0_33, %c0_34] : memref<16x32x128xbf16, #tpu.memory_space<vmem>>, vector<1x32x128xbf16>
    %55 = vector.shape_cast %54 : vector<1x32x128xbf16> to vector<32x128xbf16>
    %cst_35 = arith.constant dense<0.000000e+00> : vector<32x16xf32>
    %56 = tpu.matmul %55, %30, %cst_35 {dimension_numbers = #tpu.dot_dimension_numbers<[1], [0], [0], [1], [0, 0, 1, 1], [], []>} : vector<32x128xbf16>, vector<128x16xbf16>, vector<32x16xf32> -> vector<32x16xf32>
    %57 = arith.truncf %56 : vector<32x16xf32> to vector<32x16xbf16>
    %c3_36 = arith.constant 3 : index
    %c0_37 = arith.constant 0 : index
    %c0_38 = arith.constant 0 : index
    %58 = vector.load %arg4[%c3_36, %c0_37, %c0_38] : memref<16x16x32xbf16, #tpu.memory_space<vmem>>, vector<1x16x32xbf16>
    %59 = vector.shape_cast %58 : vector<1x16x32xbf16> to vector<16x32xbf16>
    %cst_39 = arith.constant dense<0.000000e+00> : vector<32x32xf32>
    %60 = tpu.matmul %57, %59, %cst_39 {dimension_numbers = #tpu.dot_dimension_numbers<[1], [0], [0], [1], [0, 0, 1, 1], [], []>} : vector<32x16xbf16>, vector<16x32xbf16>, vector<32x32xf32> -> vector<32x32xf32>
    %61 = arith.addf %53, %60 : vector<32x32xf32>
    %c4 = arith.constant 4 : index
    %c0_40 = arith.constant 0 : index
    %c0_41 = arith.constant 0 : index
    %62 = vector.load %arg3[%c4, %c0_40, %c0_41] : memref<16x32x128xbf16, #tpu.memory_space<vmem>>, vector<1x32x128xbf16>
    %63 = vector.shape_cast %62 : vector<1x32x128xbf16> to vector<32x128xbf16>
    %cst_42 = arith.constant dense<0.000000e+00> : vector<32x16xf32>
    %64 = tpu.matmul %63, %30, %cst_42 {dimension_numbers = #tpu.dot_dimension_numbers<[1], [0], [0], [1], [0, 0, 1, 1], [], []>} : vector<32x128xbf16>, vector<128x16xbf16>, vector<32x16xf32> -> vector<32x16xf32>
    %65 = arith.truncf %64 : vector<32x16xf32> to vector<32x16xbf16>
    %c4_43 = arith.constant 4 : index
    %c0_44 = arith.constant 0 : index
    %c0_45 = arith.constant 0 : index
    %66 = vector.load %arg4[%c4_43, %c0_44, %c0_45] : memref<16x16x32xbf16, #tpu.memory_space<vmem>>, vector<1x16x32xbf16>
    %67 = vector.shape_cast %66 : vector<1x16x32xbf16> to vector<16x32xbf16>
    %cst_46 = arith.constant dense<0.000000e+00> : vector<32x32xf32>
    %68 = tpu.matmul %65, %67, %cst_46 {dimension_numbers = #tpu.dot_dimension_numbers<[1], [0], [0], [1], [0, 0, 1, 1], [], []>} : vector<32x16xbf16>, vector<16x32xbf16>, vector<32x32xf32> -> vector<32x32xf32>
    %69 = arith.addf %61, %68 : vector<32x32xf32>
    %c5 = arith.constant 5 : index
    %c0_47 = arith.constant 0 : index
    %c0_48 = arith.constant 0 : index
    %70 = vector.load %arg3[%c5, %c0_47, %c0_48] : memref<16x32x128xbf16, #tpu.memory_space<vmem>>, vector<1x32x128xbf16>
    %71 = vector.shape_cast %70 : vector<1x32x128xbf16> to vector<32x128xbf16>
    %cst_49 = arith.constant dense<0.000000e+00> : vector<32x16xf32>
    %72 = tpu.matmul %71, %30, %cst_49 {dimension_numbers = #tpu.dot_dimension_numbers<[1], [0], [0], [1], [0, 0, 1, 1], [], []>} : vector<32x128xbf16>, vector<128x16xbf16>, vector<32x16xf32> -> vector<32x16xf32>
    %73 = arith.truncf %72 : vector<32x16xf32> to vector<32x16xbf16>
    %c5_50 = arith.constant 5 : index
    %c0_51 = arith.constant 0 : index
    %c0_52 = arith.constant 0 : index
    %74 = vector.load %arg4[%c5_50, %c0_51, %c0_52] : memref<16x16x32xbf16, #tpu.memory_space<vmem>>, vector<1x16x32xbf16>
    %75 = vector.shape_cast %74 : vector<1x16x32xbf16> to vector<16x32xbf16>
    %cst_53 = arith.constant dense<0.000000e+00> : vector<32x32xf32>
    %76 = tpu.matmul %73, %75, %cst_53 {dimension_numbers = #tpu.dot_dimension_numbers<[1], [0], [0], [1], [0, 0, 1, 1], [], []>} : vector<32x16xbf16>, vector<16x32xbf16>, vector<32x32xf32> -> vector<32x32xf32>
    %77 = arith.addf %69, %76 : vector<32x32xf32>
    %c6 = arith.constant 6 : index
    %c0_54 = arith.constant 0 : index
    %c0_55 = arith.constant 0 : index
    %78 = vector.load %arg3[%c6, %c0_54, %c0_55] : memref<16x32x128xbf16, #tpu.memory_space<vmem>>, vector<1x32x128xbf16>
    %79 = vector.shape_cast %78 : vector<1x32x128xbf16> to vector<32x128xbf16>
    %cst_56 = arith.constant dense<0.000000e+00> : vector<32x16xf32>
    %80 = tpu.matmul %79, %30, %cst_56 {dimension_numbers = #tpu.dot_dimension_numbers<[1], [0], [0], [1], [0, 0, 1, 1], [], []>} : vector<32x128xbf16>, vector<128x16xbf16>, vector<32x16xf32> -> vector<32x16xf32>
    %81 = arith.truncf %80 : vector<32x16xf32> to vector<32x16xbf16>
    %c6_57 = arith.constant 6 : index
    %c0_58 = arith.constant 0 : index
    %c0_59 = arith.constant 0 : index
    %82 = vector.load %arg4[%c6_57, %c0_58, %c0_59] : memref<16x16x32xbf16, #tpu.memory_space<vmem>>, vector<1x16x32xbf16>
    %83 = vector.shape_cast %82 : vector<1x16x32xbf16> to vector<16x32xbf16>
    %cst_60 = arith.constant dense<0.000000e+00> : vector<32x32xf32>
    %84 = tpu.matmul %81, %83, %cst_60 {dimension_numbers = #tpu.dot_dimension_numbers<[1], [0], [0], [1], [0, 0, 1, 1], [], []>} : vector<32x16xbf16>, vector<16x32xbf16>, vector<32x32xf32> -> vector<32x32xf32>
    %85 = arith.addf %77, %84 : vector<32x32xf32>
    %c7 = arith.constant 7 : index
    %c0_61 = arith.constant 0 : index
    %c0_62 = arith.constant 0 : index
    %86 = vector.load %arg3[%c7, %c0_61, %c0_62] : memref<16x32x128xbf16, #tpu.memory_space<vmem>>, vector<1x32x128xbf16>
    %87 = vector.shape_cast %86 : vector<1x32x128xbf16> to vector<32x128xbf16>
    %cst_63 = arith.constant dense<0.000000e+00> : vector<32x16xf32>
    %88 = tpu.matmul %87, %30, %cst_63 {dimension_numbers = #tpu.dot_dimension_numbers<[1], [0], [0], [1], [0, 0, 1, 1], [], []>} : vector<32x128xbf16>, vector<128x16xbf16>, vector<32x16xf32> -> vector<32x16xf32>
    %89 = arith.truncf %88 : vector<32x16xf32> to vector<32x16xbf16>
    %c7_64 = arith.constant 7 : index
    %c0_65 = arith.constant 0 : index
    %c0_66 = arith.constant 0 : index
    %90 = vector.load %arg4[%c7_64, %c0_65, %c0_66] : memref<16x16x32xbf16, #tpu.memory_space<vmem>>, vector<1x16x32xbf16>
    %91 = vector.shape_cast %90 : vector<1x16x32xbf16> to vector<16x32xbf16>
    %cst_67 = arith.constant dense<0.000000e+00> : vector<32x32xf32>
    %92 = tpu.matmul %89, %91, %cst_67 {dimension_numbers = #tpu.dot_dimension_numbers<[1], [0], [0], [1], [0, 0, 1, 1], [], []>} : vector<32x16xbf16>, vector<16x32xbf16>, vector<32x32xf32> -> vector<32x32xf32>
    %93 = arith.addf %85, %92 : vector<32x32xf32>
    %c8 = arith.constant 8 : index
    %c0_68 = arith.constant 0 : index
    %c0_69 = arith.constant 0 : index
    %94 = vector.load %arg3[%c8, %c0_68, %c0_69] : memref<16x32x128xbf16, #tpu.memory_space<vmem>>, vector<1x32x128xbf16>
    %95 = vector.shape_cast %94 : vector<1x32x128xbf16> to vector<32x128xbf16>
    %cst_70 = arith.constant dense<0.000000e+00> : vector<32x16xf32>
    %96 = tpu.matmul %95, %30, %cst_70 {dimension_numbers = #tpu.dot_dimension_numbers<[1], [0], [0], [1], [0, 0, 1, 1], [], []>} : vector<32x128xbf16>, vector<128x16xbf16>, vector<32x16xf32> -> vector<32x16xf32>
    %97 = arith.truncf %96 : vector<32x16xf32> to vector<32x16xbf16>
    %c8_71 = arith.constant 8 : index
    %c0_72 = arith.constant 0 : index
    %c0_73 = arith.constant 0 : index
    %98 = vector.load %arg4[%c8_71, %c0_72, %c0_73] : memref<16x16x32xbf16, #tpu.memory_space<vmem>>, vector<1x16x32xbf16>
    %99 = vector.shape_cast %98 : vector<1x16x32xbf16> to vector<16x32xbf16>
    %cst_74 = arith.constant dense<0.000000e+00> : vector<32x32xf32>
    %100 = tpu.matmul %97, %99, %cst_74 {dimension_numbers = #tpu.dot_dimension_numbers<[1], [0], [0], [1], [0, 0, 1, 1], [], []>} : vector<32x16xbf16>, vector<16x32xbf16>, vector<32x32xf32> -> vector<32x32xf32>
    %101 = arith.addf %93, %100 : vector<32x32xf32>
    %c9 = arith.constant 9 : index
    %c0_75 = arith.constant 0 : index
    %c0_76 = arith.constant 0 : index
    %102 = vector.load %arg3[%c9, %c0_75, %c0_76] : memref<16x32x128xbf16, #tpu.memory_space<vmem>>, vector<1x32x128xbf16>
    %103 = vector.shape_cast %102 : vector<1x32x128xbf16> to vector<32x128xbf16>
    %cst_77 = arith.constant dense<0.000000e+00> : vector<32x16xf32>
    %104 = tpu.matmul %103, %30, %cst_77 {dimension_numbers = #tpu.dot_dimension_numbers<[1], [0], [0], [1], [0, 0, 1, 1], [], []>} : vector<32x128xbf16>, vector<128x16xbf16>, vector<32x16xf32> -> vector<32x16xf32>
    %105 = arith.truncf %104 : vector<32x16xf32> to vector<32x16xbf16>
    %c9_78 = arith.constant 9 : index
    %c0_79 = arith.constant 0 : index
    %c0_80 = arith.constant 0 : index
    %106 = vector.load %arg4[%c9_78, %c0_79, %c0_80] : memref<16x16x32xbf16, #tpu.memory_space<vmem>>, vector<1x16x32xbf16>
    %107 = vector.shape_cast %106 : vector<1x16x32xbf16> to vector<16x32xbf16>
    %cst_81 = arith.constant dense<0.000000e+00> : vector<32x32xf32>
    %108 = tpu.matmul %105, %107, %cst_81 {dimension_numbers = #tpu.dot_dimension_numbers<[1], [0], [0], [1], [0, 0, 1, 1], [], []>} : vector<32x16xbf16>, vector<16x32xbf16>, vector<32x32xf32> -> vector<32x32xf32>
    %109 = arith.addf %101, %108 : vector<32x32xf32>
    %c10 = arith.constant 10 : index
    %c0_82 = arith.constant 0 : index
    %c0_83 = arith.constant 0 : index
    %110 = vector.load %arg3[%c10, %c0_82, %c0_83] : memref<16x32x128xbf16, #tpu.memory_space<vmem>>, vector<1x32x128xbf16>
    %111 = vector.shape_cast %110 : vector<1x32x128xbf16> to vector<32x128xbf16>
    %cst_84 = arith.constant dense<0.000000e+00> : vector<32x16xf32>
    %112 = tpu.matmul %111, %30, %cst_84 {dimension_numbers = #tpu.dot_dimension_numbers<[1], [0], [0], [1], [0, 0, 1, 1], [], []>} : vector<32x128xbf16>, vector<128x16xbf16>, vector<32x16xf32> -> vector<32x16xf32>
    %113 = arith.truncf %112 : vector<32x16xf32> to vector<32x16xbf16>
    %c10_85 = arith.constant 10 : index
    %c0_86 = arith.constant 0 : index
    %c0_87 = arith.constant 0 : index
    %114 = vector.load %arg4[%c10_85, %c0_86, %c0_87] : memref<16x16x32xbf16, #tpu.memory_space<vmem>>, vector<1x16x32xbf16>
    %115 = vector.shape_cast %114 : vector<1x16x32xbf16> to vector<16x32xbf16>
    %cst_88 = arith.constant dense<0.000000e+00> : vector<32x32xf32>
    %116 = tpu.matmul %113, %115, %cst_88 {dimension_numbers = #tpu.dot_dimension_numbers<[1], [0], [0], [1], [0, 0, 1, 1], [], []>} : vector<32x16xbf16>, vector<16x32xbf16>, vector<32x32xf32> -> vector<32x32xf32>
    %117 = arith.addf %109, %116 : vector<32x32xf32>
    %c11 = arith.constant 11 : index
    %c0_89 = arith.constant 0 : index
    %c0_90 = arith.constant 0 : index
    %118 = vector.load %arg3[%c11, %c0_89, %c0_90] : memref<16x32x128xbf16, #tpu.memory_space<vmem>>, vector<1x32x128xbf16>
    %119 = vector.shape_cast %118 : vector<1x32x128xbf16> to vector<32x128xbf16>
    %cst_91 = arith.constant dense<0.000000e+00> : vector<32x16xf32>
    %120 = tpu.matmul %119, %30, %cst_91 {dimension_numbers = #tpu.dot_dimension_numbers<[1], [0], [0], [1], [0, 0, 1, 1], [], []>} : vector<32x128xbf16>, vector<128x16xbf16>, vector<32x16xf32> -> vector<32x16xf32>
    %121 = arith.truncf %120 : vector<32x16xf32> to vector<32x16xbf16>
    %c11_92 = arith.constant 11 : index
    %c0_93 = arith.constant 0 : index
    %c0_94 = arith.constant 0 : index
    %122 = vector.load %arg4[%c11_92, %c0_93, %c0_94] : memref<16x16x32xbf16, #tpu.memory_space<vmem>>, vector<1x16x32xbf16>
    %123 = vector.shape_cast %122 : vector<1x16x32xbf16> to vector<16x32xbf16>
    %cst_95 = arith.constant dense<0.000000e+00> : vector<32x32xf32>
    %124 = tpu.matmul %121, %123, %cst_95 {dimension_numbers = #tpu.dot_dimension_numbers<[1], [0], [0], [1], [0, 0, 1, 1], [], []>} : vector<32x16xbf16>, vector<16x32xbf16>, vector<32x32xf32> -> vector<32x32xf32>
    %125 = arith.addf %117, %124 : vector<32x32xf32>
    %c12 = arith.constant 12 : index
    %c0_96 = arith.constant 0 : index
    %c0_97 = arith.constant 0 : index
    %126 = vector.load %arg3[%c12, %c0_96, %c0_97] : memref<16x32x128xbf16, #tpu.memory_space<vmem>>, vector<1x32x128xbf16>
    %127 = vector.shape_cast %126 : vector<1x32x128xbf16> to vector<32x128xbf16>
    %cst_98 = arith.constant dense<0.000000e+00> : vector<32x16xf32>
    %128 = tpu.matmul %127, %30, %cst_98 {dimension_numbers = #tpu.dot_dimension_numbers<[1], [0], [0], [1], [0, 0, 1, 1], [], []>} : vector<32x128xbf16>, vector<128x16xbf16>, vector<32x16xf32> -> vector<32x16xf32>
    %129 = arith.truncf %128 : vector<32x16xf32> to vector<32x16xbf16>
    %c12_99 = arith.constant 12 : index
    %c0_100 = arith.constant 0 : index
    %c0_101 = arith.constant 0 : index
    %130 = vector.load %arg4[%c12_99, %c0_100, %c0_101] : memref<16x16x32xbf16, #tpu.memory_space<vmem>>, vector<1x16x32xbf16>
    %131 = vector.shape_cast %130 : vector<1x16x32xbf16> to vector<16x32xbf16>
    %cst_102 = arith.constant dense<0.000000e+00> : vector<32x32xf32>
    %132 = tpu.matmul %129, %131, %cst_102 {dimension_numbers = #tpu.dot_dimension_numbers<[1], [0], [0], [1], [0, 0, 1, 1], [], []>} : vector<32x16xbf16>, vector<16x32xbf16>, vector<32x32xf32> -> vector<32x32xf32>
    %133 = arith.addf %125, %132 : vector<32x32xf32>
    %c13 = arith.constant 13 : index
    %c0_103 = arith.constant 0 : index
    %c0_104 = arith.constant 0 : index
    %134 = vector.load %arg3[%c13, %c0_103, %c0_104] : memref<16x32x128xbf16, #tpu.memory_space<vmem>>, vector<1x32x128xbf16>
    %135 = vector.shape_cast %134 : vector<1x32x128xbf16> to vector<32x128xbf16>
    %cst_105 = arith.constant dense<0.000000e+00> : vector<32x16xf32>
    %136 = tpu.matmul %135, %30, %cst_105 {dimension_numbers = #tpu.dot_dimension_numbers<[1], [0], [0], [1], [0, 0, 1, 1], [], []>} : vector<32x128xbf16>, vector<128x16xbf16>, vector<32x16xf32> -> vector<32x16xf32>
    %137 = arith.truncf %136 : vector<32x16xf32> to vector<32x16xbf16>
    %c13_106 = arith.constant 13 : index
    %c0_107 = arith.constant 0 : index
    %c0_108 = arith.constant 0 : index
    %138 = vector.load %arg4[%c13_106, %c0_107, %c0_108] : memref<16x16x32xbf16, #tpu.memory_space<vmem>>, vector<1x16x32xbf16>
    %139 = vector.shape_cast %138 : vector<1x16x32xbf16> to vector<16x32xbf16>
    %cst_109 = arith.constant dense<0.000000e+00> : vector<32x32xf32>
    %140 = tpu.matmul %137, %139, %cst_109 {dimension_numbers = #tpu.dot_dimension_numbers<[1], [0], [0], [1], [0, 0, 1, 1], [], []>} : vector<32x16xbf16>, vector<16x32xbf16>, vector<32x32xf32> -> vector<32x32xf32>
    %141 = arith.addf %133, %140 : vector<32x32xf32>
    %c14 = arith.constant 14 : index
    %c0_110 = arith.constant 0 : index
    %c0_111 = arith.constant 0 : index
    %142 = vector.load %arg3[%c14, %c0_110, %c0_111] : memref<16x32x128xbf16, #tpu.memory_space<vmem>>, vector<1x32x128xbf16>
    %143 = vector.shape_cast %142 : vector<1x32x128xbf16> to vector<32x128xbf16>
    %cst_112 = arith.constant dense<0.000000e+00> : vector<32x16xf32>
    %144 = tpu.matmul %143, %30, %cst_112 {dimension_numbers = #tpu.dot_dimension_numbers<[1], [0], [0], [1], [0, 0, 1, 1], [], []>} : vector<32x128xbf16>, vector<128x16xbf16>, vector<32x16xf32> -> vector<32x16xf32>
    %145 = arith.truncf %144 : vector<32x16xf32> to vector<32x16xbf16>
    %c14_113 = arith.constant 14 : index
    %c0_114 = arith.constant 0 : index
    %c0_115 = arith.constant 0 : index
    %146 = vector.load %arg4[%c14_113, %c0_114, %c0_115] : memref<16x16x32xbf16, #tpu.memory_space<vmem>>, vector<1x16x32xbf16>
    %147 = vector.shape_cast %146 : vector<1x16x32xbf16> to vector<16x32xbf16>
    %cst_116 = arith.constant dense<0.000000e+00> : vector<32x32xf32>
    %148 = tpu.matmul %145, %147, %cst_116 {dimension_numbers = #tpu.dot_dimension_numbers<[1], [0], [0], [1], [0, 0, 1, 1], [], []>} : vector<32x16xbf16>, vector<16x32xbf16>, vector<32x32xf32> -> vector<32x32xf32>
    %149 = arith.addf %141, %148 : vector<32x32xf32>
    %c15 = arith.constant 15 : index
    %c0_117 = arith.constant 0 : index
    %c0_118 = arith.constant 0 : index
    %150 = vector.load %arg3[%c15, %c0_117, %c0_118] : memref<16x32x128xbf16, #tpu.memory_space<vmem>>, vector<1x32x128xbf16>
    %151 = vector.shape_cast %150 : vector<1x32x128xbf16> to vector<32x128xbf16>
    %cst_119 = arith.constant dense<0.000000e+00> : vector<32x16xf32>
    %152 = tpu.matmul %151, %30, %cst_119 {dimension_numbers = #tpu.dot_dimension_numbers<[1], [0], [0], [1], [0, 0, 1, 1], [], []>} : vector<32x128xbf16>, vector<128x16xbf16>, vector<32x16xf32> -> vector<32x16xf32>
    %153 = arith.truncf %152 : vector<32x16xf32> to vector<32x16xbf16>
    %c15_120 = arith.constant 15 : index
    %c0_121 = arith.constant 0 : index
    %c0_122 = arith.constant 0 : index
    %154 = vector.load %arg4[%c15_120, %c0_121, %c0_122] : memref<16x16x32xbf16, #tpu.memory_space<vmem>>, vector<1x16x32xbf16>
    %155 = vector.shape_cast %154 : vector<1x16x32xbf16> to vector<16x32xbf16>
    %cst_123 = arith.constant dense<0.000000e+00> : vector<32x32xf32>
    %156 = tpu.matmul %153, %155, %cst_123 {dimension_numbers = #tpu.dot_dimension_numbers<[1], [0], [0], [1], [0, 0, 1, 1], [], []>} : vector<32x16xbf16>, vector<16x32xbf16>, vector<32x32xf32> -> vector<32x32xf32>
    %157 = arith.addf %149, %156 : vector<32x32xf32>
    %158 = vector.extract_strided_slice %0 {offsets = [2, 0], sizes = [1, 32], strides = [1, 1]} : vector<9x128xf32> to vector<1x32xf32>
    %159 = vector.extract_strided_slice %0 {offsets = [3, 0], sizes = [1, 32], strides = [1, 1]} : vector<9x128xf32> to vector<1x32xf32>
    %cst_124 = arith.constant dense<0.000000e+00> : vector<32xf32>
    %160 = vector.multi_reduction <add>, %157, %cst_124 [0] : vector<32x32xf32> to vector<32xf32>
    %161 = vector.shape_cast %160 : vector<32xf32> to vector<1x32xf32>
    %cst_125 = arith.constant 3.200000e+01 : f32
    %162 = vector.broadcast %cst_125 : f32 to vector<1x32xf32>
    %163 = arith.divf %161, %162 : vector<1x32xf32>
    %164 = vector.broadcast %163 : vector<1x32xf32> to vector<32x32xf32>
    %165 = arith.subf %157, %164 : vector<32x32xf32>
    %166 = arith.mulf %165, %165 : vector<32x32xf32>
    %cst_126 = arith.constant dense<0.000000e+00> : vector<32xf32>
    %167 = vector.multi_reduction <add>, %166, %cst_126 [0] : vector<32x32xf32> to vector<32xf32>
    %168 = vector.shape_cast %167 : vector<32xf32> to vector<1x32xf32>
    %cst_127 = arith.constant 3.200000e+01 : f32
    %169 = vector.broadcast %cst_127 : f32 to vector<1x32xf32>
    %170 = arith.divf %168, %169 : vector<1x32xf32>
    %cst_128 = arith.constant 9.99999974E-6 : f32
    %171 = vector.broadcast %cst_128 : f32 to vector<1x32xf32>
    %172 = arith.addf %170, %171 : vector<1x32xf32>
    %173 = math.rsqrt %172 : vector<1x32xf32>
    %174 = arith.mulf %158, %173 : vector<1x32xf32>
    %175 = arith.mulf %163, %174 : vector<1x32xf32>
    %176 = arith.subf %159, %175 : vector<1x32xf32>
    %177 = vector.broadcast %174 : vector<1x32xf32> to vector<32x32xf32>
    %178 = arith.mulf %157, %177 : vector<32x32xf32>
    %179 = vector.broadcast %176 : vector<1x32xf32> to vector<32x32xf32>
    %180 = arith.addf %178, %179 : vector<32x32xf32>
    %cst_129 = arith.constant 2.000000e-01 : f32
    %181 = vector.broadcast %cst_129 : f32 to vector<32x32xf32>
    %182 = arith.mulf %181, %180 : vector<32x32xf32>
    %183 = arith.maximumf %180, %182 : vector<32x32xf32>
    %184 = arith.truncf %183 : vector<32x32xf32> to vector<32x32xbf16>
    %c0_130 = arith.constant 0 : index
    %c0_131 = arith.constant 0 : index
    %c0_132 = arith.constant 0 : index
    %185 = vector.load %arg5[%c0_130, %c0_131, %c0_132] : memref<16x8x32xbf16, #tpu.memory_space<vmem>>, vector<1x8x32xbf16>
    %186 = vector.shape_cast %185 : vector<1x8x32xbf16> to vector<8x32xbf16>
    %cst_133 = arith.constant dense<0.000000e+00> : vector<8x32xf32>
    %187 = tpu.matmul %186, %184, %cst_133 {dimension_numbers = #tpu.dot_dimension_numbers<[1], [0], [0], [1], [0, 0, 1, 1], [], []>} : vector<8x32xbf16>, vector<32x32xbf16>, vector<8x32xf32> -> vector<8x32xf32>
    %188 = arith.truncf %187 : vector<8x32xf32> to vector<8x32xbf16>
    %c0_134 = arith.constant 0 : index
    %c0_135 = arith.constant 0 : index
    %c0_136 = arith.constant 0 : index
    %189 = vector.load %arg6[%c0_134, %c0_135, %c0_136] : memref<16x32x64xbf16, #tpu.memory_space<vmem>>, vector<1x32x64xbf16>
    %190 = vector.shape_cast %189 : vector<1x32x64xbf16> to vector<32x64xbf16>
    %cst_137 = arith.constant dense<0.000000e+00> : vector<8x64xf32>
    %191 = tpu.matmul %188, %190, %cst_137 {dimension_numbers = #tpu.dot_dimension_numbers<[1], [0], [0], [1], [0, 0, 1, 1], [], []>} : vector<8x32xbf16>, vector<32x64xbf16>, vector<8x64xf32> -> vector<8x64xf32>
    %c1_138 = arith.constant 1 : index
    %c0_139 = arith.constant 0 : index
    %c0_140 = arith.constant 0 : index
    %192 = vector.load %arg5[%c1_138, %c0_139, %c0_140] : memref<16x8x32xbf16, #tpu.memory_space<vmem>>, vector<1x8x32xbf16>
    %193 = vector.shape_cast %192 : vector<1x8x32xbf16> to vector<8x32xbf16>
    %cst_141 = arith.constant dense<0.000000e+00> : vector<8x32xf32>
    %194 = tpu.matmul %193, %184, %cst_141 {dimension_numbers = #tpu.dot_dimension_numbers<[1], [0], [0], [1], [0, 0, 1, 1], [], []>} : vector<8x32xbf16>, vector<32x32xbf16>, vector<8x32xf32> -> vector<8x32xf32>
    %195 = arith.truncf %194 : vector<8x32xf32> to vector<8x32xbf16>
    %c1_142 = arith.constant 1 : index
    %c0_143 = arith.constant 0 : index
    %c0_144 = arith.constant 0 : index
    %196 = vector.load %arg6[%c1_142, %c0_143, %c0_144] : memref<16x32x64xbf16, #tpu.memory_space<vmem>>, vector<1x32x64xbf16>
    %197 = vector.shape_cast %196 : vector<1x32x64xbf16> to vector<32x64xbf16>
    %cst_145 = arith.constant dense<0.000000e+00> : vector<8x64xf32>
    %198 = tpu.matmul %195, %197, %cst_145 {dimension_numbers = #tpu.dot_dimension_numbers<[1], [0], [0], [1], [0, 0, 1, 1], [], []>} : vector<8x32xbf16>, vector<32x64xbf16>, vector<8x64xf32> -> vector<8x64xf32>
    %199 = arith.addf %191, %198 : vector<8x64xf32>
    %c2_146 = arith.constant 2 : index
    %c0_147 = arith.constant 0 : index
    %c0_148 = arith.constant 0 : index
    %200 = vector.load %arg5[%c2_146, %c0_147, %c0_148] : memref<16x8x32xbf16, #tpu.memory_space<vmem>>, vector<1x8x32xbf16>
    %201 = vector.shape_cast %200 : vector<1x8x32xbf16> to vector<8x32xbf16>
    %cst_149 = arith.constant dense<0.000000e+00> : vector<8x32xf32>
    %202 = tpu.matmul %201, %184, %cst_149 {dimension_numbers = #tpu.dot_dimension_numbers<[1], [0], [0], [1], [0, 0, 1, 1], [], []>} : vector<8x32xbf16>, vector<32x32xbf16>, vector<8x32xf32> -> vector<8x32xf32>
    %203 = arith.truncf %202 : vector<8x32xf32> to vector<8x32xbf16>
    %c2_150 = arith.constant 2 : index
    %c0_151 = arith.constant 0 : index
    %c0_152 = arith.constant 0 : index
    %204 = vector.load %arg6[%c2_150, %c0_151, %c0_152] : memref<16x32x64xbf16, #tpu.memory_space<vmem>>, vector<1x32x64xbf16>
    %205 = vector.shape_cast %204 : vector<1x32x64xbf16> to vector<32x64xbf16>
    %cst_153 = arith.constant dense<0.000000e+00> : vector<8x64xf32>
    %206 = tpu.matmul %203, %205, %cst_153 {dimension_numbers = #tpu.dot_dimension_numbers<[1], [0], [0], [1], [0, 0, 1, 1], [], []>} : vector<8x32xbf16>, vector<32x64xbf16>, vector<8x64xf32> -> vector<8x64xf32>
    %207 = arith.addf %199, %206 : vector<8x64xf32>
    %c3_154 = arith.constant 3 : index
    %c0_155 = arith.constant 0 : index
    %c0_156 = arith.constant 0 : index
    %208 = vector.load %arg5[%c3_154, %c0_155, %c0_156] : memref<16x8x32xbf16, #tpu.memory_space<vmem>>, vector<1x8x32xbf16>
    %209 = vector.shape_cast %208 : vector<1x8x32xbf16> to vector<8x32xbf16>
    %cst_157 = arith.constant dense<0.000000e+00> : vector<8x32xf32>
    %210 = tpu.matmul %209, %184, %cst_157 {dimension_numbers = #tpu.dot_dimension_numbers<[1], [0], [0], [1], [0, 0, 1, 1], [], []>} : vector<8x32xbf16>, vector<32x32xbf16>, vector<8x32xf32> -> vector<8x32xf32>
    %211 = arith.truncf %210 : vector<8x32xf32> to vector<8x32xbf16>
    %c3_158 = arith.constant 3 : index
    %c0_159 = arith.constant 0 : index
    %c0_160 = arith.constant 0 : index
    %212 = vector.load %arg6[%c3_158, %c0_159, %c0_160] : memref<16x32x64xbf16, #tpu.memory_space<vmem>>, vector<1x32x64xbf16>
    %213 = vector.shape_cast %212 : vector<1x32x64xbf16> to vector<32x64xbf16>
    %cst_161 = arith.constant dense<0.000000e+00> : vector<8x64xf32>
    %214 = tpu.matmul %211, %213, %cst_161 {dimension_numbers = #tpu.dot_dimension_numbers<[1], [0], [0], [1], [0, 0, 1, 1], [], []>} : vector<8x32xbf16>, vector<32x64xbf16>, vector<8x64xf32> -> vector<8x64xf32>
    %215 = arith.addf %207, %214 : vector<8x64xf32>
    %c4_162 = arith.constant 4 : index
    %c0_163 = arith.constant 0 : index
    %c0_164 = arith.constant 0 : index
    %216 = vector.load %arg5[%c4_162, %c0_163, %c0_164] : memref<16x8x32xbf16, #tpu.memory_space<vmem>>, vector<1x8x32xbf16>
    %217 = vector.shape_cast %216 : vector<1x8x32xbf16> to vector<8x32xbf16>
    %cst_165 = arith.constant dense<0.000000e+00> : vector<8x32xf32>
    %218 = tpu.matmul %217, %184, %cst_165 {dimension_numbers = #tpu.dot_dimension_numbers<[1], [0], [0], [1], [0, 0, 1, 1], [], []>} : vector<8x32xbf16>, vector<32x32xbf16>, vector<8x32xf32> -> vector<8x32xf32>
    %219 = arith.truncf %218 : vector<8x32xf32> to vector<8x32xbf16>
    %c4_166 = arith.constant 4 : index
    %c0_167 = arith.constant 0 : index
    %c0_168 = arith.constant 0 : index
    %220 = vector.load %arg6[%c4_166, %c0_167, %c0_168] : memref<16x32x64xbf16, #tpu.memory_space<vmem>>, vector<1x32x64xbf16>
    %221 = vector.shape_cast %220 : vector<1x32x64xbf16> to vector<32x64xbf16>
    %cst_169 = arith.constant dense<0.000000e+00> : vector<8x64xf32>
    %222 = tpu.matmul %219, %221, %cst_169 {dimension_numbers = #tpu.dot_dimension_numbers<[1], [0], [0], [1], [0, 0, 1, 1], [], []>} : vector<8x32xbf16>, vector<32x64xbf16>, vector<8x64xf32> -> vector<8x64xf32>
    %223 = arith.addf %215, %222 : vector<8x64xf32>
    %c5_170 = arith.constant 5 : index
    %c0_171 = arith.constant 0 : index
    %c0_172 = arith.constant 0 : index
    %224 = vector.load %arg5[%c5_170, %c0_171, %c0_172] : memref<16x8x32xbf16, #tpu.memory_space<vmem>>, vector<1x8x32xbf16>
    %225 = vector.shape_cast %224 : vector<1x8x32xbf16> to vector<8x32xbf16>
    %cst_173 = arith.constant dense<0.000000e+00> : vector<8x32xf32>
    %226 = tpu.matmul %225, %184, %cst_173 {dimension_numbers = #tpu.dot_dimension_numbers<[1], [0], [0], [1], [0, 0, 1, 1], [], []>} : vector<8x32xbf16>, vector<32x32xbf16>, vector<8x32xf32> -> vector<8x32xf32>
    %227 = arith.truncf %226 : vector<8x32xf32> to vector<8x32xbf16>
    %c5_174 = arith.constant 5 : index
    %c0_175 = arith.constant 0 : index
    %c0_176 = arith.constant 0 : index
    %228 = vector.load %arg6[%c5_174, %c0_175, %c0_176] : memref<16x32x64xbf16, #tpu.memory_space<vmem>>, vector<1x32x64xbf16>
    %229 = vector.shape_cast %228 : vector<1x32x64xbf16> to vector<32x64xbf16>
    %cst_177 = arith.constant dense<0.000000e+00> : vector<8x64xf32>
    %230 = tpu.matmul %227, %229, %cst_177 {dimension_numbers = #tpu.dot_dimension_numbers<[1], [0], [0], [1], [0, 0, 1, 1], [], []>} : vector<8x32xbf16>, vector<32x64xbf16>, vector<8x64xf32> -> vector<8x64xf32>
    %231 = arith.addf %223, %230 : vector<8x64xf32>
    %c6_178 = arith.constant 6 : index
    %c0_179 = arith.constant 0 : index
    %c0_180 = arith.constant 0 : index
    %232 = vector.load %arg5[%c6_178, %c0_179, %c0_180] : memref<16x8x32xbf16, #tpu.memory_space<vmem>>, vector<1x8x32xbf16>
    %233 = vector.shape_cast %232 : vector<1x8x32xbf16> to vector<8x32xbf16>
    %cst_181 = arith.constant dense<0.000000e+00> : vector<8x32xf32>
    %234 = tpu.matmul %233, %184, %cst_181 {dimension_numbers = #tpu.dot_dimension_numbers<[1], [0], [0], [1], [0, 0, 1, 1], [], []>} : vector<8x32xbf16>, vector<32x32xbf16>, vector<8x32xf32> -> vector<8x32xf32>
    %235 = arith.truncf %234 : vector<8x32xf32> to vector<8x32xbf16>
    %c6_182 = arith.constant 6 : index
    %c0_183 = arith.constant 0 : index
    %c0_184 = arith.constant 0 : index
    %236 = vector.load %arg6[%c6_182, %c0_183, %c0_184] : memref<16x32x64xbf16, #tpu.memory_space<vmem>>, vector<1x32x64xbf16>
    %237 = vector.shape_cast %236 : vector<1x32x64xbf16> to vector<32x64xbf16>
    %cst_185 = arith.constant dense<0.000000e+00> : vector<8x64xf32>
    %238 = tpu.matmul %235, %237, %cst_185 {dimension_numbers = #tpu.dot_dimension_numbers<[1], [0], [0], [1], [0, 0, 1, 1], [], []>} : vector<8x32xbf16>, vector<32x64xbf16>, vector<8x64xf32> -> vector<8x64xf32>
    %239 = arith.addf %231, %238 : vector<8x64xf32>
    %c7_186 = arith.constant 7 : index
    %c0_187 = arith.constant 0 : index
    %c0_188 = arith.constant 0 : index
    %240 = vector.load %arg5[%c7_186, %c0_187, %c0_188] : memref<16x8x32xbf16, #tpu.memory_space<vmem>>, vector<1x8x32xbf16>
    %241 = vector.shape_cast %240 : vector<1x8x32xbf16> to vector<8x32xbf16>
    %cst_189 = arith.constant dense<0.000000e+00> : vector<8x32xf32>
    %242 = tpu.matmul %241, %184, %cst_189 {dimension_numbers = #tpu.dot_dimension_numbers<[1], [0], [0], [1], [0, 0, 1, 1], [], []>} : vector<8x32xbf16>, vector<32x32xbf16>, vector<8x32xf32> -> vector<8x32xf32>
    %243 = arith.truncf %242 : vector<8x32xf32> to vector<8x32xbf16>
    %c7_190 = arith.constant 7 : index
    %c0_191 = arith.constant 0 : index
    %c0_192 = arith.constant 0 : index
    %244 = vector.load %arg6[%c7_190, %c0_191, %c0_192] : memref<16x32x64xbf16, #tpu.memory_space<vmem>>, vector<1x32x64xbf16>
    %245 = vector.shape_cast %244 : vector<1x32x64xbf16> to vector<32x64xbf16>
    %cst_193 = arith.constant dense<0.000000e+00> : vector<8x64xf32>
    %246 = tpu.matmul %243, %245, %cst_193 {dimension_numbers = #tpu.dot_dimension_numbers<[1], [0], [0], [1], [0, 0, 1, 1], [], []>} : vector<8x32xbf16>, vector<32x64xbf16>, vector<8x64xf32> -> vector<8x64xf32>
    %247 = arith.addf %239, %246 : vector<8x64xf32>
    %c8_194 = arith.constant 8 : index
    %c0_195 = arith.constant 0 : index
    %c0_196 = arith.constant 0 : index
    %248 = vector.load %arg5[%c8_194, %c0_195, %c0_196] : memref<16x8x32xbf16, #tpu.memory_space<vmem>>, vector<1x8x32xbf16>
    %249 = vector.shape_cast %248 : vector<1x8x32xbf16> to vector<8x32xbf16>
    %cst_197 = arith.constant dense<0.000000e+00> : vector<8x32xf32>
    %250 = tpu.matmul %249, %184, %cst_197 {dimension_numbers = #tpu.dot_dimension_numbers<[1], [0], [0], [1], [0, 0, 1, 1], [], []>} : vector<8x32xbf16>, vector<32x32xbf16>, vector<8x32xf32> -> vector<8x32xf32>
    %251 = arith.truncf %250 : vector<8x32xf32> to vector<8x32xbf16>
    %c8_198 = arith.constant 8 : index
    %c0_199 = arith.constant 0 : index
    %c0_200 = arith.constant 0 : index
    %252 = vector.load %arg6[%c8_198, %c0_199, %c0_200] : memref<16x32x64xbf16, #tpu.memory_space<vmem>>, vector<1x32x64xbf16>
    %253 = vector.shape_cast %252 : vector<1x32x64xbf16> to vector<32x64xbf16>
    %cst_201 = arith.constant dense<0.000000e+00> : vector<8x64xf32>
    %254 = tpu.matmul %251, %253, %cst_201 {dimension_numbers = #tpu.dot_dimension_numbers<[1], [0], [0], [1], [0, 0, 1, 1], [], []>} : vector<8x32xbf16>, vector<32x64xbf16>, vector<8x64xf32> -> vector<8x64xf32>
    %255 = arith.addf %247, %254 : vector<8x64xf32>
    %c9_202 = arith.constant 9 : index
    %c0_203 = arith.constant 0 : index
    %c0_204 = arith.constant 0 : index
    %256 = vector.load %arg5[%c9_202, %c0_203, %c0_204] : memref<16x8x32xbf16, #tpu.memory_space<vmem>>, vector<1x8x32xbf16>
    %257 = vector.shape_cast %256 : vector<1x8x32xbf16> to vector<8x32xbf16>
    %cst_205 = arith.constant dense<0.000000e+00> : vector<8x32xf32>
    %258 = tpu.matmul %257, %184, %cst_205 {dimension_numbers = #tpu.dot_dimension_numbers<[1], [0], [0], [1], [0, 0, 1, 1], [], []>} : vector<8x32xbf16>, vector<32x32xbf16>, vector<8x32xf32> -> vector<8x32xf32>
    %259 = arith.truncf %258 : vector<8x32xf32> to vector<8x32xbf16>
    %c9_206 = arith.constant 9 : index
    %c0_207 = arith.constant 0 : index
    %c0_208 = arith.constant 0 : index
    %260 = vector.load %arg6[%c9_206, %c0_207, %c0_208] : memref<16x32x64xbf16, #tpu.memory_space<vmem>>, vector<1x32x64xbf16>
    %261 = vector.shape_cast %260 : vector<1x32x64xbf16> to vector<32x64xbf16>
    %cst_209 = arith.constant dense<0.000000e+00> : vector<8x64xf32>
    %262 = tpu.matmul %259, %261, %cst_209 {dimension_numbers = #tpu.dot_dimension_numbers<[1], [0], [0], [1], [0, 0, 1, 1], [], []>} : vector<8x32xbf16>, vector<32x64xbf16>, vector<8x64xf32> -> vector<8x64xf32>
    %263 = arith.addf %255, %262 : vector<8x64xf32>
    %c10_210 = arith.constant 10 : index
    %c0_211 = arith.constant 0 : index
    %c0_212 = arith.constant 0 : index
    %264 = vector.load %arg5[%c10_210, %c0_211, %c0_212] : memref<16x8x32xbf16, #tpu.memory_space<vmem>>, vector<1x8x32xbf16>
    %265 = vector.shape_cast %264 : vector<1x8x32xbf16> to vector<8x32xbf16>
    %cst_213 = arith.constant dense<0.000000e+00> : vector<8x32xf32>
    %266 = tpu.matmul %265, %184, %cst_213 {dimension_numbers = #tpu.dot_dimension_numbers<[1], [0], [0], [1], [0, 0, 1, 1], [], []>} : vector<8x32xbf16>, vector<32x32xbf16>, vector<8x32xf32> -> vector<8x32xf32>
    %267 = arith.truncf %266 : vector<8x32xf32> to vector<8x32xbf16>
    %c10_214 = arith.constant 10 : index
    %c0_215 = arith.constant 0 : index
    %c0_216 = arith.constant 0 : index
    %268 = vector.load %arg6[%c10_214, %c0_215, %c0_216] : memref<16x32x64xbf16, #tpu.memory_space<vmem>>, vector<1x32x64xbf16>
    %269 = vector.shape_cast %268 : vector<1x32x64xbf16> to vector<32x64xbf16>
    %cst_217 = arith.constant dense<0.000000e+00> : vector<8x64xf32>
    %270 = tpu.matmul %267, %269, %cst_217 {dimension_numbers = #tpu.dot_dimension_numbers<[1], [0], [0], [1], [0, 0, 1, 1], [], []>} : vector<8x32xbf16>, vector<32x64xbf16>, vector<8x64xf32> -> vector<8x64xf32>
    %271 = arith.addf %263, %270 : vector<8x64xf32>
    %c11_218 = arith.constant 11 : index
    %c0_219 = arith.constant 0 : index
    %c0_220 = arith.constant 0 : index
    %272 = vector.load %arg5[%c11_218, %c0_219, %c0_220] : memref<16x8x32xbf16, #tpu.memory_space<vmem>>, vector<1x8x32xbf16>
    %273 = vector.shape_cast %272 : vector<1x8x32xbf16> to vector<8x32xbf16>
    %cst_221 = arith.constant dense<0.000000e+00> : vector<8x32xf32>
    %274 = tpu.matmul %273, %184, %cst_221 {dimension_numbers = #tpu.dot_dimension_numbers<[1], [0], [0], [1], [0, 0, 1, 1], [], []>} : vector<8x32xbf16>, vector<32x32xbf16>, vector<8x32xf32> -> vector<8x32xf32>
    %275 = arith.truncf %274 : vector<8x32xf32> to vector<8x32xbf16>
    %c11_222 = arith.constant 11 : index
    %c0_223 = arith.constant 0 : index
    %c0_224 = arith.constant 0 : index
    %276 = vector.load %arg6[%c11_222, %c0_223, %c0_224] : memref<16x32x64xbf16, #tpu.memory_space<vmem>>, vector<1x32x64xbf16>
    %277 = vector.shape_cast %276 : vector<1x32x64xbf16> to vector<32x64xbf16>
    %cst_225 = arith.constant dense<0.000000e+00> : vector<8x64xf32>
    %278 = tpu.matmul %275, %277, %cst_225 {dimension_numbers = #tpu.dot_dimension_numbers<[1], [0], [0], [1], [0, 0, 1, 1], [], []>} : vector<8x32xbf16>, vector<32x64xbf16>, vector<8x64xf32> -> vector<8x64xf32>
    %279 = arith.addf %271, %278 : vector<8x64xf32>
    %c12_226 = arith.constant 12 : index
    %c0_227 = arith.constant 0 : index
    %c0_228 = arith.constant 0 : index
    %280 = vector.load %arg5[%c12_226, %c0_227, %c0_228] : memref<16x8x32xbf16, #tpu.memory_space<vmem>>, vector<1x8x32xbf16>
    %281 = vector.shape_cast %280 : vector<1x8x32xbf16> to vector<8x32xbf16>
    %cst_229 = arith.constant dense<0.000000e+00> : vector<8x32xf32>
    %282 = tpu.matmul %281, %184, %cst_229 {dimension_numbers = #tpu.dot_dimension_numbers<[1], [0], [0], [1], [0, 0, 1, 1], [], []>} : vector<8x32xbf16>, vector<32x32xbf16>, vector<8x32xf32> -> vector<8x32xf32>
    %283 = arith.truncf %282 : vector<8x32xf32> to vector<8x32xbf16>
    %c12_230 = arith.constant 12 : index
    %c0_231 = arith.constant 0 : index
    %c0_232 = arith.constant 0 : index
    %284 = vector.load %arg6[%c12_230, %c0_231, %c0_232] : memref<16x32x64xbf16, #tpu.memory_space<vmem>>, vector<1x32x64xbf16>
    %285 = vector.shape_cast %284 : vector<1x32x64xbf16> to vector<32x64xbf16>
    %cst_233 = arith.constant dense<0.000000e+00> : vector<8x64xf32>
    %286 = tpu.matmul %283, %285, %cst_233 {dimension_numbers = #tpu.dot_dimension_numbers<[1], [0], [0], [1], [0, 0, 1, 1], [], []>} : vector<8x32xbf16>, vector<32x64xbf16>, vector<8x64xf32> -> vector<8x64xf32>
    %287 = arith.addf %279, %286 : vector<8x64xf32>
    %c13_234 = arith.constant 13 : index
    %c0_235 = arith.constant 0 : index
    %c0_236 = arith.constant 0 : index
    %288 = vector.load %arg5[%c13_234, %c0_235, %c0_236] : memref<16x8x32xbf16, #tpu.memory_space<vmem>>, vector<1x8x32xbf16>
    %289 = vector.shape_cast %288 : vector<1x8x32xbf16> to vector<8x32xbf16>
    %cst_237 = arith.constant dense<0.000000e+00> : vector<8x32xf32>
    %290 = tpu.matmul %289, %184, %cst_237 {dimension_numbers = #tpu.dot_dimension_numbers<[1], [0], [0], [1], [0, 0, 1, 1], [], []>} : vector<8x32xbf16>, vector<32x32xbf16>, vector<8x32xf32> -> vector<8x32xf32>
    %291 = arith.truncf %290 : vector<8x32xf32> to vector<8x32xbf16>
    %c13_238 = arith.constant 13 : index
    %c0_239 = arith.constant 0 : index
    %c0_240 = arith.constant 0 : index
    %292 = vector.load %arg6[%c13_238, %c0_239, %c0_240] : memref<16x32x64xbf16, #tpu.memory_space<vmem>>, vector<1x32x64xbf16>
    %293 = vector.shape_cast %292 : vector<1x32x64xbf16> to vector<32x64xbf16>
    %cst_241 = arith.constant dense<0.000000e+00> : vector<8x64xf32>
    %294 = tpu.matmul %291, %293, %cst_241 {dimension_numbers = #tpu.dot_dimension_numbers<[1], [0], [0], [1], [0, 0, 1, 1], [], []>} : vector<8x32xbf16>, vector<32x64xbf16>, vector<8x64xf32> -> vector<8x64xf32>
    %295 = arith.addf %287, %294 : vector<8x64xf32>
    %c14_242 = arith.constant 14 : index
    %c0_243 = arith.constant 0 : index
    %c0_244 = arith.constant 0 : index
    %296 = vector.load %arg5[%c14_242, %c0_243, %c0_244] : memref<16x8x32xbf16, #tpu.memory_space<vmem>>, vector<1x8x32xbf16>
    %297 = vector.shape_cast %296 : vector<1x8x32xbf16> to vector<8x32xbf16>
    %cst_245 = arith.constant dense<0.000000e+00> : vector<8x32xf32>
    %298 = tpu.matmul %297, %184, %cst_245 {dimension_numbers = #tpu.dot_dimension_numbers<[1], [0], [0], [1], [0, 0, 1, 1], [], []>} : vector<8x32xbf16>, vector<32x32xbf16>, vector<8x32xf32> -> vector<8x32xf32>
    %299 = arith.truncf %298 : vector<8x32xf32> to vector<8x32xbf16>
    %c14_246 = arith.constant 14 : index
    %c0_247 = arith.constant 0 : index
    %c0_248 = arith.constant 0 : index
    %300 = vector.load %arg6[%c14_246, %c0_247, %c0_248] : memref<16x32x64xbf16, #tpu.memory_space<vmem>>, vector<1x32x64xbf16>
    %301 = vector.shape_cast %300 : vector<1x32x64xbf16> to vector<32x64xbf16>
    %cst_249 = arith.constant dense<0.000000e+00> : vector<8x64xf32>
    %302 = tpu.matmul %299, %301, %cst_249 {dimension_numbers = #tpu.dot_dimension_numbers<[1], [0], [0], [1], [0, 0, 1, 1], [], []>} : vector<8x32xbf16>, vector<32x64xbf16>, vector<8x64xf32> -> vector<8x64xf32>
    %303 = arith.addf %295, %302 : vector<8x64xf32>
    %c15_250 = arith.constant 15 : index
    %c0_251 = arith.constant 0 : index
    %c0_252 = arith.constant 0 : index
    %304 = vector.load %arg5[%c15_250, %c0_251, %c0_252] : memref<16x8x32xbf16, #tpu.memory_space<vmem>>, vector<1x8x32xbf16>
    %305 = vector.shape_cast %304 : vector<1x8x32xbf16> to vector<8x32xbf16>
    %cst_253 = arith.constant dense<0.000000e+00> : vector<8x32xf32>
    %306 = tpu.matmul %305, %184, %cst_253 {dimension_numbers = #tpu.dot_dimension_numbers<[1], [0], [0], [1], [0, 0, 1, 1], [], []>} : vector<8x32xbf16>, vector<32x32xbf16>, vector<8x32xf32> -> vector<8x32xf32>
    %307 = arith.truncf %306 : vector<8x32xf32> to vector<8x32xbf16>
    %c15_254 = arith.constant 15 : index
    %c0_255 = arith.constant 0 : index
    %c0_256 = arith.constant 0 : index
    %308 = vector.load %arg6[%c15_254, %c0_255, %c0_256] : memref<16x32x64xbf16, #tpu.memory_space<vmem>>, vector<1x32x64xbf16>
    %309 = vector.shape_cast %308 : vector<1x32x64xbf16> to vector<32x64xbf16>
    %cst_257 = arith.constant dense<0.000000e+00> : vector<8x64xf32>
    %310 = tpu.matmul %307, %309, %cst_257 {dimension_numbers = #tpu.dot_dimension_numbers<[1], [0], [0], [1], [0, 0, 1, 1], [], []>} : vector<8x32xbf16>, vector<32x64xbf16>, vector<8x64xf32> -> vector<8x64xf32>
    %311 = arith.addf %303, %310 : vector<8x64xf32>
    %312 = vector.extract_strided_slice %0 {offsets = [4, 0], sizes = [1, 64], strides = [1, 1]} : vector<9x128xf32> to vector<1x64xf32>
    %313 = vector.extract_strided_slice %0 {offsets = [5, 0], sizes = [1, 64], strides = [1, 1]} : vector<9x128xf32> to vector<1x64xf32>
    %cst_258 = arith.constant dense<0.000000e+00> : vector<64xf32>
    %314 = vector.multi_reduction <add>, %311, %cst_258 [0] : vector<8x64xf32> to vector<64xf32>
    %315 = vector.shape_cast %314 : vector<64xf32> to vector<1x64xf32>
    %cst_259 = arith.constant 8.000000e+00 : f32
    %316 = vector.broadcast %cst_259 : f32 to vector<1x64xf32>
    %317 = arith.divf %315, %316 : vector<1x64xf32>
    %318 = vector.broadcast %317 : vector<1x64xf32> to vector<8x64xf32>
    %319 = arith.subf %311, %318 : vector<8x64xf32>
    %320 = arith.mulf %319, %319 : vector<8x64xf32>
    %cst_260 = arith.constant dense<0.000000e+00> : vector<64xf32>
    %321 = vector.multi_reduction <add>, %320, %cst_260 [0] : vector<8x64xf32> to vector<64xf32>
    %322 = vector.shape_cast %321 : vector<64xf32> to vector<1x64xf32>
    %cst_261 = arith.constant 8.000000e+00 : f32
    %323 = vector.broadcast %cst_261 : f32 to vector<1x64xf32>
    %324 = arith.divf %322, %323 : vector<1x64xf32>
    %cst_262 = arith.constant 9.99999974E-6 : f32
    %325 = vector.broadcast %cst_262 : f32 to vector<1x64xf32>
    %326 = arith.addf %324, %325 : vector<1x64xf32>
    %327 = math.rsqrt %326 : vector<1x64xf32>
    %328 = arith.mulf %312, %327 : vector<1x64xf32>
    %329 = arith.mulf %317, %328 : vector<1x64xf32>
    %330 = arith.subf %313, %329 : vector<1x64xf32>
    %331 = vector.broadcast %328 : vector<1x64xf32> to vector<8x64xf32>
    %332 = arith.mulf %311, %331 : vector<8x64xf32>
    %333 = vector.broadcast %330 : vector<1x64xf32> to vector<8x64xf32>
    %334 = arith.addf %332, %333 : vector<8x64xf32>
    %cst_263 = arith.constant 2.000000e-01 : f32
    %335 = vector.broadcast %cst_263 : f32 to vector<8x64xf32>
    %336 = arith.mulf %335, %334 : vector<8x64xf32>
    %337 = arith.maximumf %334, %336 : vector<8x64xf32>
    %338 = arith.truncf %337 : vector<8x64xf32> to vector<8x64xbf16>
    %c0_264 = arith.constant 0 : index
    %c0_265 = arith.constant 0 : index
    %c0_266 = arith.constant 0 : index
    %339 = vector.load %arg7[%c0_264, %c0_265, %c0_266] : memref<16x2x8xbf16, #tpu.memory_space<vmem>>, vector<1x2x8xbf16>
    %340 = vector.shape_cast %339 : vector<1x2x8xbf16> to vector<2x8xbf16>
    %cst_267 = arith.constant dense<0.000000e+00> : vector<2x64xf32>
    %341 = tpu.matmul %340, %338, %cst_267 {dimension_numbers = #tpu.dot_dimension_numbers<[1], [0], [0], [1], [0, 0, 1, 1], [], []>} : vector<2x8xbf16>, vector<8x64xbf16>, vector<2x64xf32> -> vector<2x64xf32>
    %342 = arith.truncf %341 : vector<2x64xf32> to vector<2x64xbf16>
    %c0_268 = arith.constant 0 : index
    %c0_269 = arith.constant 0 : index
    %c0_270 = arith.constant 0 : index
    %343 = vector.load %arg8[%c0_268, %c0_269, %c0_270] : memref<16x64x128xbf16, #tpu.memory_space<vmem>>, vector<1x64x128xbf16>
    %344 = vector.shape_cast %343 : vector<1x64x128xbf16> to vector<64x128xbf16>
    %cst_271 = arith.constant dense<0.000000e+00> : vector<2x128xf32>
    %345 = tpu.matmul %342, %344, %cst_271 {dimension_numbers = #tpu.dot_dimension_numbers<[1], [0], [0], [1], [0, 0, 1, 1], [], []>} : vector<2x64xbf16>, vector<64x128xbf16>, vector<2x128xf32> -> vector<2x128xf32>
    %c1_272 = arith.constant 1 : index
    %c0_273 = arith.constant 0 : index
    %c0_274 = arith.constant 0 : index
    %346 = vector.load %arg7[%c1_272, %c0_273, %c0_274] : memref<16x2x8xbf16, #tpu.memory_space<vmem>>, vector<1x2x8xbf16>
    %347 = vector.shape_cast %346 : vector<1x2x8xbf16> to vector<2x8xbf16>
    %cst_275 = arith.constant dense<0.000000e+00> : vector<2x64xf32>
    %348 = tpu.matmul %347, %338, %cst_275 {dimension_numbers = #tpu.dot_dimension_numbers<[1], [0], [0], [1], [0, 0, 1, 1], [], []>} : vector<2x8xbf16>, vector<8x64xbf16>, vector<2x64xf32> -> vector<2x64xf32>
    %349 = arith.truncf %348 : vector<2x64xf32> to vector<2x64xbf16>
    %c1_276 = arith.constant 1 : index
    %c0_277 = arith.constant 0 : index
    %c0_278 = arith.constant 0 : index
    %350 = vector.load %arg8[%c1_276, %c0_277, %c0_278] : memref<16x64x128xbf16, #tpu.memory_space<vmem>>, vector<1x64x128xbf16>
    %351 = vector.shape_cast %350 : vector<1x64x128xbf16> to vector<64x128xbf16>
    %cst_279 = arith.constant dense<0.000000e+00> : vector<2x128xf32>
    %352 = tpu.matmul %349, %351, %cst_279 {dimension_numbers = #tpu.dot_dimension_numbers<[1], [0], [0], [1], [0, 0, 1, 1], [], []>} : vector<2x64xbf16>, vector<64x128xbf16>, vector<2x128xf32> -> vector<2x128xf32>
    %353 = arith.addf %345, %352 : vector<2x128xf32>
    %c2_280 = arith.constant 2 : index
    %c0_281 = arith.constant 0 : index
    %c0_282 = arith.constant 0 : index
    %354 = vector.load %arg7[%c2_280, %c0_281, %c0_282] : memref<16x2x8xbf16, #tpu.memory_space<vmem>>, vector<1x2x8xbf16>
    %355 = vector.shape_cast %354 : vector<1x2x8xbf16> to vector<2x8xbf16>
    %cst_283 = arith.constant dense<0.000000e+00> : vector<2x64xf32>
    %356 = tpu.matmul %355, %338, %cst_283 {dimension_numbers = #tpu.dot_dimension_numbers<[1], [0], [0], [1], [0, 0, 1, 1], [], []>} : vector<2x8xbf16>, vector<8x64xbf16>, vector<2x64xf32> -> vector<2x64xf32>
    %357 = arith.truncf %356 : vector<2x64xf32> to vector<2x64xbf16>
    %c2_284 = arith.constant 2 : index
    %c0_285 = arith.constant 0 : index
    %c0_286 = arith.constant 0 : index
    %358 = vector.load %arg8[%c2_284, %c0_285, %c0_286] : memref<16x64x128xbf16, #tpu.memory_space<vmem>>, vector<1x64x128xbf16>
    %359 = vector.shape_cast %358 : vector<1x64x128xbf16> to vector<64x128xbf16>
    %cst_287 = arith.constant dense<0.000000e+00> : vector<2x128xf32>
    %360 = tpu.matmul %357, %359, %cst_287 {dimension_numbers = #tpu.dot_dimension_numbers<[1], [0], [0], [1], [0, 0, 1, 1], [], []>} : vector<2x64xbf16>, vector<64x128xbf16>, vector<2x128xf32> -> vector<2x128xf32>
    %361 = arith.addf %353, %360 : vector<2x128xf32>
    %c3_288 = arith.constant 3 : index
    %c0_289 = arith.constant 0 : index
    %c0_290 = arith.constant 0 : index
    %362 = vector.load %arg7[%c3_288, %c0_289, %c0_290] : memref<16x2x8xbf16, #tpu.memory_space<vmem>>, vector<1x2x8xbf16>
    %363 = vector.shape_cast %362 : vector<1x2x8xbf16> to vector<2x8xbf16>
    %cst_291 = arith.constant dense<0.000000e+00> : vector<2x64xf32>
    %364 = tpu.matmul %363, %338, %cst_291 {dimension_numbers = #tpu.dot_dimension_numbers<[1], [0], [0], [1], [0, 0, 1, 1], [], []>} : vector<2x8xbf16>, vector<8x64xbf16>, vector<2x64xf32> -> vector<2x64xf32>
    %365 = arith.truncf %364 : vector<2x64xf32> to vector<2x64xbf16>
    %c3_292 = arith.constant 3 : index
    %c0_293 = arith.constant 0 : index
    %c0_294 = arith.constant 0 : index
    %366 = vector.load %arg8[%c3_292, %c0_293, %c0_294] : memref<16x64x128xbf16, #tpu.memory_space<vmem>>, vector<1x64x128xbf16>
    %367 = vector.shape_cast %366 : vector<1x64x128xbf16> to vector<64x128xbf16>
    %cst_295 = arith.constant dense<0.000000e+00> : vector<2x128xf32>
    %368 = tpu.matmul %365, %367, %cst_295 {dimension_numbers = #tpu.dot_dimension_numbers<[1], [0], [0], [1], [0, 0, 1, 1], [], []>} : vector<2x64xbf16>, vector<64x128xbf16>, vector<2x128xf32> -> vector<2x128xf32>
    %369 = arith.addf %361, %368 : vector<2x128xf32>
    %c4_296 = arith.constant 4 : index
    %c0_297 = arith.constant 0 : index
    %c0_298 = arith.constant 0 : index
    %370 = vector.load %arg7[%c4_296, %c0_297, %c0_298] : memref<16x2x8xbf16, #tpu.memory_space<vmem>>, vector<1x2x8xbf16>
    %371 = vector.shape_cast %370 : vector<1x2x8xbf16> to vector<2x8xbf16>
    %cst_299 = arith.constant dense<0.000000e+00> : vector<2x64xf32>
    %372 = tpu.matmul %371, %338, %cst_299 {dimension_numbers = #tpu.dot_dimension_numbers<[1], [0], [0], [1], [0, 0, 1, 1], [], []>} : vector<2x8xbf16>, vector<8x64xbf16>, vector<2x64xf32> -> vector<2x64xf32>
    %373 = arith.truncf %372 : vector<2x64xf32> to vector<2x64xbf16>
    %c4_300 = arith.constant 4 : index
    %c0_301 = arith.constant 0 : index
    %c0_302 = arith.constant 0 : index
    %374 = vector.load %arg8[%c4_300, %c0_301, %c0_302] : memref<16x64x128xbf16, #tpu.memory_space<vmem>>, vector<1x64x128xbf16>
    %375 = vector.shape_cast %374 : vector<1x64x128xbf16> to vector<64x128xbf16>
    %cst_303 = arith.constant dense<0.000000e+00> : vector<2x128xf32>
    %376 = tpu.matmul %373, %375, %cst_303 {dimension_numbers = #tpu.dot_dimension_numbers<[1], [0], [0], [1], [0, 0, 1, 1], [], []>} : vector<2x64xbf16>, vector<64x128xbf16>, vector<2x128xf32> -> vector<2x128xf32>
    %377 = arith.addf %369, %376 : vector<2x128xf32>
    %c5_304 = arith.constant 5 : index
    %c0_305 = arith.constant 0 : index
    %c0_306 = arith.constant 0 : index
    %378 = vector.load %arg7[%c5_304, %c0_305, %c0_306] : memref<16x2x8xbf16, #tpu.memory_space<vmem>>, vector<1x2x8xbf16>
    %379 = vector.shape_cast %378 : vector<1x2x8xbf16> to vector<2x8xbf16>
    %cst_307 = arith.constant dense<0.000000e+00> : vector<2x64xf32>
    %380 = tpu.matmul %379, %338, %cst_307 {dimension_numbers = #tpu.dot_dimension_numbers<[1], [0], [0], [1], [0, 0, 1, 1], [], []>} : vector<2x8xbf16>, vector<8x64xbf16>, vector<2x64xf32> -> vector<2x64xf32>
    %381 = arith.truncf %380 : vector<2x64xf32> to vector<2x64xbf16>
    %c5_308 = arith.constant 5 : index
    %c0_309 = arith.constant 0 : index
    %c0_310 = arith.constant 0 : index
    %382 = vector.load %arg8[%c5_308, %c0_309, %c0_310] : memref<16x64x128xbf16, #tpu.memory_space<vmem>>, vector<1x64x128xbf16>
    %383 = vector.shape_cast %382 : vector<1x64x128xbf16> to vector<64x128xbf16>
    %cst_311 = arith.constant dense<0.000000e+00> : vector<2x128xf32>
    %384 = tpu.matmul %381, %383, %cst_311 {dimension_numbers = #tpu.dot_dimension_numbers<[1], [0], [0], [1], [0, 0, 1, 1], [], []>} : vector<2x64xbf16>, vector<64x128xbf16>, vector<2x128xf32> -> vector<2x128xf32>
    %385 = arith.addf %377, %384 : vector<2x128xf32>
    %c6_312 = arith.constant 6 : index
    %c0_313 = arith.constant 0 : index
    %c0_314 = arith.constant 0 : index
    %386 = vector.load %arg7[%c6_312, %c0_313, %c0_314] : memref<16x2x8xbf16, #tpu.memory_space<vmem>>, vector<1x2x8xbf16>
    %387 = vector.shape_cast %386 : vector<1x2x8xbf16> to vector<2x8xbf16>
    %cst_315 = arith.constant dense<0.000000e+00> : vector<2x64xf32>
    %388 = tpu.matmul %387, %338, %cst_315 {dimension_numbers = #tpu.dot_dimension_numbers<[1], [0], [0], [1], [0, 0, 1, 1], [], []>} : vector<2x8xbf16>, vector<8x64xbf16>, vector<2x64xf32> -> vector<2x64xf32>
    %389 = arith.truncf %388 : vector<2x64xf32> to vector<2x64xbf16>
    %c6_316 = arith.constant 6 : index
    %c0_317 = arith.constant 0 : index
    %c0_318 = arith.constant 0 : index
    %390 = vector.load %arg8[%c6_316, %c0_317, %c0_318] : memref<16x64x128xbf16, #tpu.memory_space<vmem>>, vector<1x64x128xbf16>
    %391 = vector.shape_cast %390 : vector<1x64x128xbf16> to vector<64x128xbf16>
    %cst_319 = arith.constant dense<0.000000e+00> : vector<2x128xf32>
    %392 = tpu.matmul %389, %391, %cst_319 {dimension_numbers = #tpu.dot_dimension_numbers<[1], [0], [0], [1], [0, 0, 1, 1], [], []>} : vector<2x64xbf16>, vector<64x128xbf16>, vector<2x128xf32> -> vector<2x128xf32>
    %393 = arith.addf %385, %392 : vector<2x128xf32>
    %c7_320 = arith.constant 7 : index
    %c0_321 = arith.constant 0 : index
    %c0_322 = arith.constant 0 : index
    %394 = vector.load %arg7[%c7_320, %c0_321, %c0_322] : memref<16x2x8xbf16, #tpu.memory_space<vmem>>, vector<1x2x8xbf16>
    %395 = vector.shape_cast %394 : vector<1x2x8xbf16> to vector<2x8xbf16>
    %cst_323 = arith.constant dense<0.000000e+00> : vector<2x64xf32>
    %396 = tpu.matmul %395, %338, %cst_323 {dimension_numbers = #tpu.dot_dimension_numbers<[1], [0], [0], [1], [0, 0, 1, 1], [], []>} : vector<2x8xbf16>, vector<8x64xbf16>, vector<2x64xf32> -> vector<2x64xf32>
    %397 = arith.truncf %396 : vector<2x64xf32> to vector<2x64xbf16>
    %c7_324 = arith.constant 7 : index
    %c0_325 = arith.constant 0 : index
    %c0_326 = arith.constant 0 : index
    %398 = vector.load %arg8[%c7_324, %c0_325, %c0_326] : memref<16x64x128xbf16, #tpu.memory_space<vmem>>, vector<1x64x128xbf16>
    %399 = vector.shape_cast %398 : vector<1x64x128xbf16> to vector<64x128xbf16>
    %cst_327 = arith.constant dense<0.000000e+00> : vector<2x128xf32>
    %400 = tpu.matmul %397, %399, %cst_327 {dimension_numbers = #tpu.dot_dimension_numbers<[1], [0], [0], [1], [0, 0, 1, 1], [], []>} : vector<2x64xbf16>, vector<64x128xbf16>, vector<2x128xf32> -> vector<2x128xf32>
    %401 = arith.addf %393, %400 : vector<2x128xf32>
    %c8_328 = arith.constant 8 : index
    %c0_329 = arith.constant 0 : index
    %c0_330 = arith.constant 0 : index
    %402 = vector.load %arg7[%c8_328, %c0_329, %c0_330] : memref<16x2x8xbf16, #tpu.memory_space<vmem>>, vector<1x2x8xbf16>
    %403 = vector.shape_cast %402 : vector<1x2x8xbf16> to vector<2x8xbf16>
    %cst_331 = arith.constant dense<0.000000e+00> : vector<2x64xf32>
    %404 = tpu.matmul %403, %338, %cst_331 {dimension_numbers = #tpu.dot_dimension_numbers<[1], [0], [0], [1], [0, 0, 1, 1], [], []>} : vector<2x8xbf16>, vector<8x64xbf16>, vector<2x64xf32> -> vector<2x64xf32>
    %405 = arith.truncf %404 : vector<2x64xf32> to vector<2x64xbf16>
    %c8_332 = arith.constant 8 : index
    %c0_333 = arith.constant 0 : index
    %c0_334 = arith.constant 0 : index
    %406 = vector.load %arg8[%c8_332, %c0_333, %c0_334] : memref<16x64x128xbf16, #tpu.memory_space<vmem>>, vector<1x64x128xbf16>
    %407 = vector.shape_cast %406 : vector<1x64x128xbf16> to vector<64x128xbf16>
    %cst_335 = arith.constant dense<0.000000e+00> : vector<2x128xf32>
    %408 = tpu.matmul %405, %407, %cst_335 {dimension_numbers = #tpu.dot_dimension_numbers<[1], [0], [0], [1], [0, 0, 1, 1], [], []>} : vector<2x64xbf16>, vector<64x128xbf16>, vector<2x128xf32> -> vector<2x128xf32>
    %409 = arith.addf %401, %408 : vector<2x128xf32>
    %c9_336 = arith.constant 9 : index
    %c0_337 = arith.constant 0 : index
    %c0_338 = arith.constant 0 : index
    %410 = vector.load %arg7[%c9_336, %c0_337, %c0_338] : memref<16x2x8xbf16, #tpu.memory_space<vmem>>, vector<1x2x8xbf16>
    %411 = vector.shape_cast %410 : vector<1x2x8xbf16> to vector<2x8xbf16>
    %cst_339 = arith.constant dense<0.000000e+00> : vector<2x64xf32>
    %412 = tpu.matmul %411, %338, %cst_339 {dimension_numbers = #tpu.dot_dimension_numbers<[1], [0], [0], [1], [0, 0, 1, 1], [], []>} : vector<2x8xbf16>, vector<8x64xbf16>, vector<2x64xf32> -> vector<2x64xf32>
    %413 = arith.truncf %412 : vector<2x64xf32> to vector<2x64xbf16>
    %c9_340 = arith.constant 9 : index
    %c0_341 = arith.constant 0 : index
    %c0_342 = arith.constant 0 : index
    %414 = vector.load %arg8[%c9_340, %c0_341, %c0_342] : memref<16x64x128xbf16, #tpu.memory_space<vmem>>, vector<1x64x128xbf16>
    %415 = vector.shape_cast %414 : vector<1x64x128xbf16> to vector<64x128xbf16>
    %cst_343 = arith.constant dense<0.000000e+00> : vector<2x128xf32>
    %416 = tpu.matmul %413, %415, %cst_343 {dimension_numbers = #tpu.dot_dimension_numbers<[1], [0], [0], [1], [0, 0, 1, 1], [], []>} : vector<2x64xbf16>, vector<64x128xbf16>, vector<2x128xf32> -> vector<2x128xf32>
    %417 = arith.addf %409, %416 : vector<2x128xf32>
    %c10_344 = arith.constant 10 : index
    %c0_345 = arith.constant 0 : index
    %c0_346 = arith.constant 0 : index
    %418 = vector.load %arg7[%c10_344, %c0_345, %c0_346] : memref<16x2x8xbf16, #tpu.memory_space<vmem>>, vector<1x2x8xbf16>
    %419 = vector.shape_cast %418 : vector<1x2x8xbf16> to vector<2x8xbf16>
    %cst_347 = arith.constant dense<0.000000e+00> : vector<2x64xf32>
    %420 = tpu.matmul %419, %338, %cst_347 {dimension_numbers = #tpu.dot_dimension_numbers<[1], [0], [0], [1], [0, 0, 1, 1], [], []>} : vector<2x8xbf16>, vector<8x64xbf16>, vector<2x64xf32> -> vector<2x64xf32>
    %421 = arith.truncf %420 : vector<2x64xf32> to vector<2x64xbf16>
    %c10_348 = arith.constant 10 : index
    %c0_349 = arith.constant 0 : index
    %c0_350 = arith.constant 0 : index
    %422 = vector.load %arg8[%c10_348, %c0_349, %c0_350] : memref<16x64x128xbf16, #tpu.memory_space<vmem>>, vector<1x64x128xbf16>
    %423 = vector.shape_cast %422 : vector<1x64x128xbf16> to vector<64x128xbf16>
    %cst_351 = arith.constant dense<0.000000e+00> : vector<2x128xf32>
    %424 = tpu.matmul %421, %423, %cst_351 {dimension_numbers = #tpu.dot_dimension_numbers<[1], [0], [0], [1], [0, 0, 1, 1], [], []>} : vector<2x64xbf16>, vector<64x128xbf16>, vector<2x128xf32> -> vector<2x128xf32>
    %425 = arith.addf %417, %424 : vector<2x128xf32>
    %c11_352 = arith.constant 11 : index
    %c0_353 = arith.constant 0 : index
    %c0_354 = arith.constant 0 : index
    %426 = vector.load %arg7[%c11_352, %c0_353, %c0_354] : memref<16x2x8xbf16, #tpu.memory_space<vmem>>, vector<1x2x8xbf16>
    %427 = vector.shape_cast %426 : vector<1x2x8xbf16> to vector<2x8xbf16>
    %cst_355 = arith.constant dense<0.000000e+00> : vector<2x64xf32>
    %428 = tpu.matmul %427, %338, %cst_355 {dimension_numbers = #tpu.dot_dimension_numbers<[1], [0], [0], [1], [0, 0, 1, 1], [], []>} : vector<2x8xbf16>, vector<8x64xbf16>, vector<2x64xf32> -> vector<2x64xf32>
    %429 = arith.truncf %428 : vector<2x64xf32> to vector<2x64xbf16>
    %c11_356 = arith.constant 11 : index
    %c0_357 = arith.constant 0 : index
    %c0_358 = arith.constant 0 : index
    %430 = vector.load %arg8[%c11_356, %c0_357, %c0_358] : memref<16x64x128xbf16, #tpu.memory_space<vmem>>, vector<1x64x128xbf16>
    %431 = vector.shape_cast %430 : vector<1x64x128xbf16> to vector<64x128xbf16>
    %cst_359 = arith.constant dense<0.000000e+00> : vector<2x128xf32>
    %432 = tpu.matmul %429, %431, %cst_359 {dimension_numbers = #tpu.dot_dimension_numbers<[1], [0], [0], [1], [0, 0, 1, 1], [], []>} : vector<2x64xbf16>, vector<64x128xbf16>, vector<2x128xf32> -> vector<2x128xf32>
    %433 = arith.addf %425, %432 : vector<2x128xf32>
    %c12_360 = arith.constant 12 : index
    %c0_361 = arith.constant 0 : index
    %c0_362 = arith.constant 0 : index
    %434 = vector.load %arg7[%c12_360, %c0_361, %c0_362] : memref<16x2x8xbf16, #tpu.memory_space<vmem>>, vector<1x2x8xbf16>
    %435 = vector.shape_cast %434 : vector<1x2x8xbf16> to vector<2x8xbf16>
    %cst_363 = arith.constant dense<0.000000e+00> : vector<2x64xf32>
    %436 = tpu.matmul %435, %338, %cst_363 {dimension_numbers = #tpu.dot_dimension_numbers<[1], [0], [0], [1], [0, 0, 1, 1], [], []>} : vector<2x8xbf16>, vector<8x64xbf16>, vector<2x64xf32> -> vector<2x64xf32>
    %437 = arith.truncf %436 : vector<2x64xf32> to vector<2x64xbf16>
    %c12_364 = arith.constant 12 : index
    %c0_365 = arith.constant 0 : index
    %c0_366 = arith.constant 0 : index
    %438 = vector.load %arg8[%c12_364, %c0_365, %c0_366] : memref<16x64x128xbf16, #tpu.memory_space<vmem>>, vector<1x64x128xbf16>
    %439 = vector.shape_cast %438 : vector<1x64x128xbf16> to vector<64x128xbf16>
    %cst_367 = arith.constant dense<0.000000e+00> : vector<2x128xf32>
    %440 = tpu.matmul %437, %439, %cst_367 {dimension_numbers = #tpu.dot_dimension_numbers<[1], [0], [0], [1], [0, 0, 1, 1], [], []>} : vector<2x64xbf16>, vector<64x128xbf16>, vector<2x128xf32> -> vector<2x128xf32>
    %441 = arith.addf %433, %440 : vector<2x128xf32>
    %c13_368 = arith.constant 13 : index
    %c0_369 = arith.constant 0 : index
    %c0_370 = arith.constant 0 : index
    %442 = vector.load %arg7[%c13_368, %c0_369, %c0_370] : memref<16x2x8xbf16, #tpu.memory_space<vmem>>, vector<1x2x8xbf16>
    %443 = vector.shape_cast %442 : vector<1x2x8xbf16> to vector<2x8xbf16>
    %cst_371 = arith.constant dense<0.000000e+00> : vector<2x64xf32>
    %444 = tpu.matmul %443, %338, %cst_371 {dimension_numbers = #tpu.dot_dimension_numbers<[1], [0], [0], [1], [0, 0, 1, 1], [], []>} : vector<2x8xbf16>, vector<8x64xbf16>, vector<2x64xf32> -> vector<2x64xf32>
    %445 = arith.truncf %444 : vector<2x64xf32> to vector<2x64xbf16>
    %c13_372 = arith.constant 13 : index
    %c0_373 = arith.constant 0 : index
    %c0_374 = arith.constant 0 : index
    %446 = vector.load %arg8[%c13_372, %c0_373, %c0_374] : memref<16x64x128xbf16, #tpu.memory_space<vmem>>, vector<1x64x128xbf16>
    %447 = vector.shape_cast %446 : vector<1x64x128xbf16> to vector<64x128xbf16>
    %cst_375 = arith.constant dense<0.000000e+00> : vector<2x128xf32>
    %448 = tpu.matmul %445, %447, %cst_375 {dimension_numbers = #tpu.dot_dimension_numbers<[1], [0], [0], [1], [0, 0, 1, 1], [], []>} : vector<2x64xbf16>, vector<64x128xbf16>, vector<2x128xf32> -> vector<2x128xf32>
    %449 = arith.addf %441, %448 : vector<2x128xf32>
    %c14_376 = arith.constant 14 : index
    %c0_377 = arith.constant 0 : index
    %c0_378 = arith.constant 0 : index
    %450 = vector.load %arg7[%c14_376, %c0_377, %c0_378] : memref<16x2x8xbf16, #tpu.memory_space<vmem>>, vector<1x2x8xbf16>
    %451 = vector.shape_cast %450 : vector<1x2x8xbf16> to vector<2x8xbf16>
    %cst_379 = arith.constant dense<0.000000e+00> : vector<2x64xf32>
    %452 = tpu.matmul %451, %338, %cst_379 {dimension_numbers = #tpu.dot_dimension_numbers<[1], [0], [0], [1], [0, 0, 1, 1], [], []>} : vector<2x8xbf16>, vector<8x64xbf16>, vector<2x64xf32> -> vector<2x64xf32>
    %453 = arith.truncf %452 : vector<2x64xf32> to vector<2x64xbf16>
    %c14_380 = arith.constant 14 : index
    %c0_381 = arith.constant 0 : index
    %c0_382 = arith.constant 0 : index
    %454 = vector.load %arg8[%c14_380, %c0_381, %c0_382] : memref<16x64x128xbf16, #tpu.memory_space<vmem>>, vector<1x64x128xbf16>
    %455 = vector.shape_cast %454 : vector<1x64x128xbf16> to vector<64x128xbf16>
    %cst_383 = arith.constant dense<0.000000e+00> : vector<2x128xf32>
    %456 = tpu.matmul %453, %455, %cst_383 {dimension_numbers = #tpu.dot_dimension_numbers<[1], [0], [0], [1], [0, 0, 1, 1], [], []>} : vector<2x64xbf16>, vector<64x128xbf16>, vector<2x128xf32> -> vector<2x128xf32>
    %457 = arith.addf %449, %456 : vector<2x128xf32>
    %c15_384 = arith.constant 15 : index
    %c0_385 = arith.constant 0 : index
    %c0_386 = arith.constant 0 : index
    %458 = vector.load %arg7[%c15_384, %c0_385, %c0_386] : memref<16x2x8xbf16, #tpu.memory_space<vmem>>, vector<1x2x8xbf16>
    %459 = vector.shape_cast %458 : vector<1x2x8xbf16> to vector<2x8xbf16>
    %cst_387 = arith.constant dense<0.000000e+00> : vector<2x64xf32>
    %460 = tpu.matmul %459, %338, %cst_387 {dimension_numbers = #tpu.dot_dimension_numbers<[1], [0], [0], [1], [0, 0, 1, 1], [], []>} : vector<2x8xbf16>, vector<8x64xbf16>, vector<2x64xf32> -> vector<2x64xf32>
    %461 = arith.truncf %460 : vector<2x64xf32> to vector<2x64xbf16>
    %c15_388 = arith.constant 15 : index
    %c0_389 = arith.constant 0 : index
    %c0_390 = arith.constant 0 : index
    %462 = vector.load %arg8[%c15_388, %c0_389, %c0_390] : memref<16x64x128xbf16, #tpu.memory_space<vmem>>, vector<1x64x128xbf16>
    %463 = vector.shape_cast %462 : vector<1x64x128xbf16> to vector<64x128xbf16>
    %cst_391 = arith.constant dense<0.000000e+00> : vector<2x128xf32>
    %464 = tpu.matmul %461, %463, %cst_391 {dimension_numbers = #tpu.dot_dimension_numbers<[1], [0], [0], [1], [0, 0, 1, 1], [], []>} : vector<2x64xbf16>, vector<64x128xbf16>, vector<2x128xf32> -> vector<2x128xf32>
    %465 = arith.addf %457, %464 : vector<2x128xf32>
    %466 = vector.extract_strided_slice %0 {offsets = [6, 0], sizes = [1, 128], strides = [1, 1]} : vector<9x128xf32> to vector<1x128xf32>
    %467 = vector.extract_strided_slice %0 {offsets = [7, 0], sizes = [1, 128], strides = [1, 1]} : vector<9x128xf32> to vector<1x128xf32>
    %cst_392 = arith.constant dense<0.000000e+00> : vector<128xf32>
    %468 = vector.multi_reduction <add>, %465, %cst_392 [0] : vector<2x128xf32> to vector<128xf32>
    %469 = vector.shape_cast %468 : vector<128xf32> to vector<1x128xf32>
    %cst_393 = arith.constant 2.000000e+00 : f32
    %470 = vector.broadcast %cst_393 : f32 to vector<1x128xf32>
    %471 = arith.divf %469, %470 : vector<1x128xf32>
    %472 = vector.broadcast %471 : vector<1x128xf32> to vector<2x128xf32>
    %473 = arith.subf %465, %472 : vector<2x128xf32>
    %474 = arith.mulf %473, %473 : vector<2x128xf32>
    %cst_394 = arith.constant dense<0.000000e+00> : vector<128xf32>
    %475 = vector.multi_reduction <add>, %474, %cst_394 [0] : vector<2x128xf32> to vector<128xf32>
    %476 = vector.shape_cast %475 : vector<128xf32> to vector<1x128xf32>
    %cst_395 = arith.constant 2.000000e+00 : f32
    %477 = vector.broadcast %cst_395 : f32 to vector<1x128xf32>
    %478 = arith.divf %476, %477 : vector<1x128xf32>
    %cst_396 = arith.constant 9.99999974E-6 : f32
    %479 = vector.broadcast %cst_396 : f32 to vector<1x128xf32>
    %480 = arith.addf %478, %479 : vector<1x128xf32>
    %481 = math.rsqrt %480 : vector<1x128xf32>
    %482 = arith.mulf %466, %481 : vector<1x128xf32>
    %483 = arith.mulf %471, %482 : vector<1x128xf32>
    %484 = arith.subf %467, %483 : vector<1x128xf32>
    %485 = vector.broadcast %482 : vector<1x128xf32> to vector<2x128xf32>
    %486 = arith.mulf %465, %485 : vector<2x128xf32>
    %487 = vector.broadcast %484 : vector<1x128xf32> to vector<2x128xf32>
    %488 = arith.addf %486, %487 : vector<2x128xf32>
    %cst_397 = arith.constant 2.000000e-01 : f32
    %489 = vector.broadcast %cst_397 : f32 to vector<2x128xf32>
    %490 = arith.mulf %489, %488 : vector<2x128xf32>
    %491 = arith.maximumf %488, %490 : vector<2x128xf32>
    %c0_398 = arith.constant 0 : index
    %c0_399 = arith.constant 0 : index
    %492 = vector.load %arg11[%c0_398, %c0_399] : memref<2x2xf32, #tpu.memory_space<vmem>>, vector<2x2xf32>
    %cst_400 = arith.constant dense<0.000000e+00> : vector<2x128xf32>
    %493 = tpu.matmul %492, %491, %cst_400 {dimension_numbers = #tpu.dot_dimension_numbers<[1], [0], [0], [1], [0, 0, 1, 1], [], []>} : vector<2x2xf32>, vector<2x128xf32>, vector<2x128xf32> -> vector<2x128xf32>
    %c0_401 = arith.constant 0 : index
    %c0_402 = arith.constant 0 : index
    %494 = vector.load %arg1[%c0_401, %c0_402] : memref<2x295xbf16, #tpu.memory_space<vmem>>, vector<2x295xbf16>
    %c0_403 = arith.constant 0 : index
    %c0_404 = arith.constant 0 : index
    %495 = vector.load %arg9[%c0_403, %c0_404] : memref<295x128xbf16, #tpu.memory_space<vmem>>, vector<295x128xbf16>
    %cst_405 = arith.constant dense<0.000000e+00> : vector<2x128xf32>
    %496 = tpu.matmul %494, %495, %cst_405 {dimension_numbers = #tpu.dot_dimension_numbers<[1], [0], [0], [1], [0, 0, 1, 1], [], []>} : vector<2x295xbf16>, vector<295x128xbf16>, vector<2x128xf32> -> vector<2x128xf32>
    %497 = vector.extract_strided_slice %0 {offsets = [8, 0], sizes = [1, 128], strides = [1, 1]} : vector<9x128xf32> to vector<1x128xf32>
    %498 = vector.broadcast %497 : vector<1x128xf32> to vector<2x128xf32>
    %499 = arith.addf %496, %498 : vector<2x128xf32>
    %500 = arith.mulf %499, %493 : vector<2x128xf32>
    %cst_406 = arith.constant dense<0.000000e+00> : vector<2xf32>
    %501 = vector.multi_reduction <add>, %500, %cst_406 [1] : vector<2x128xf32> to vector<2xf32>
    %502 = vector.shape_cast %501 : vector<2xf32> to vector<2x1xf32>
    %c0_407 = arith.constant 0 : index
    %c0_408 = arith.constant 0 : index
    %503 = vector.load %arg12[%c0_407, %c0_408] : memref<2x1xf32, #tpu.memory_space<vmem>>, vector<2x1xf32>
    tpu.vector_store %arg12[%c0_407, %c0_408], %502 {strides = array<i32>} : memref<2x1xf32, #tpu.memory_space<vmem>>, vector<2x1xf32>,
    return
  }
}

</mosaic_0001>

<bundles_post_ra>
// kernel: linnet_d_forward.1
= control target key start
LH: loop header
LB: loop body
LE: loop exit
PB: predicated region body
PF: predicated region fallthrough
CT: control target
= control target key end

     0   :  { %17 = vsyncpa [#allocation3], 0  ;;  %s6479_s0 = inlined_call_operand.vmem [shape: bf16[128,16], index: 0, kind: input, shape index: {}]   ;;  %s6480_s1 = inlined_call_operand.vmem [shape: bf16[2,295], index: 1, kind: input, shape index: {}]   ;;  %s6481_s2 = inlined_call_operand.vmem [shape: bf16[16,16], index: 2, kind: input, shape index: {}]   ;;  %s6482_s3 = inlined_call_operand.vmem [shape: bf16[16,32,128], index: 3, kind: input, shape index: {}]   ;;  %s6483_s4 = inlined_call_operand.hbm [shape: bf16[16,16,32], index: 4, kind: input, shape index: {}]   ;;  %s6484_s5 = inlined_call_operand.hbm [shape: bf16[16,8,32], index: 5, kind: input, shape index: {}]   ;;  %s6485_s6 = inlined_call_operand.vmem [shape: bf16[16,32,64], index: 6, kind: input, shape index: {}]   ;;  %s6486_s7 = inlined_call_operand.vmem [shape: bf16[16,2,8], index: 7, kind: input, shape index: {}]   ;;  %s6487_s8 = inlined_call_operand.vmem [shape: bf16[16,64,128], index: 8, kind: input, shape index: {}]   ;;  %s6488_s9 = inlined_call_operand.hbm [shape: bf16[295,128], index: 9, kind: input, shape index: {}]   ;;  %s6489_s10 = inlined_call_operand.vmem [shape: f32[9,128], index: 10, kind: input, shape index: {}]   ;;  %s6490_s11 = inlined_call_operand.vmem [shape: f32[2,2], index: 11, kind: input, shape index: {}]   ;;  %s6491_s12 = inlined_call_operand.vmem [shape: f32[2,1], index: 12, kind: output, shape index: {}]  }
   0x1   :  { %18 = vsyncpa [#allocation5], 0  ;;  %s44_s23 = sshll.u32 %s6484_s5, 4  ;;  %s5337_s24 = smov [#allocation4]   ;;  %s45_s23 = int_to_ptr.hbm [resolvable:$true] %s44_s23 }
   0x2   :  { %s46_s25 = sshll.u32 %s5337_s24, 4  ;;  %s31_s28 = sshll.u32 %s6483_s4, 4  ;;  %s47_s25 = int_to_ptr.vmem [resolvable:$true] %s46_s25  ;;  %s32_s28 = int_to_ptr.hbm [resolvable:$true] %s31_s28 }
   0x3   :  { %s5338_s29 = smov 64   ;;  %s5339_s30 = smov 4  }
   0x4   :  { %52 = dma.hbm_to_vmem [thread:$0]  %s45_s23, 1024, %s47_s25, [#allocation5], %s5338_s29, %s5338_s29, %s5339_s30  }
   0x5   :  { %s5340_s13 = smov [#allocation2]   ;;  %s63_s17 = sshll.u32 %s6488_s9, 4  ;;  %s64_s17 = int_to_ptr.hbm [resolvable:$true] %s63_s17 }
   0x6   :  { %s33_s14 = sshll.u32 %s5340_s13, 4  ;;  %s5341_s5 = smov [#allocation6]   ;;  %s34_s14 = int_to_ptr.vmem [resolvable:$true] %s33_s14 }
   0x7   :  { %39 = dma.hbm_to_vmem [thread:$0]  %s32_s28, 2048, %s34_s14, [#allocation3], %s5338_s29, %s5338_s29, %s5339_s30  }
   0x8   :  { %s65_s18 = sshll.u32 %s5341_s5, 4  ;;  %s66_s18 = int_to_ptr.vmem [resolvable:$true] %s65_s18 }
   0x9   :  { %71 = dma.hbm_to_vmem [thread:$0]  %s64_s17, 2368, %s66_s18, [#allocation5], %s5338_s29, %s5338_s29, %s5339_s30  }
   0xa   :  { %5333 = dma.done.wait [#allocation3], 2048  }
   0xb   :  { %5334 = vsyncadd [#allocation3], 4294965248 }
   0xc   :  { %5335 = dma.done.wait [#allocation5], 3392  }
   0xd   :  { %5336 = vsyncadd [#allocation5], 4294963904  ;;  %v5069_v0 = vld [vmem:[%s6481_s2] sm:$0xff]  ;;  %vm155_vm0 = vcmask 130048   ;;  %v5062_v2 = vld [vmem:[%s6479_s0 + $0x8] sm:$0xff]  ;;  %v5342_v41 = vmov 128.0  }
   0xe   :  { %v5061_v1 = vld [vmem:[%s6479_s0] sm:$0xff]  ;;  %187 = vmatpush.bf16.msra.mxu0 %v5069_v0  ;;  %v5063_v3 = vld [vmem:[%s6479_s0 + $0x10] sm:$0xff]  ;;  %v5064_v4 = vld [vmem:[%s6479_s0 + $0x18] sm:$0xff]  ;;  %5243 = vrcp.f32 %v5342_v41  ;;  %vm1641_vm5 = vcmask 261120   ;;  %vm2566_vm10 = vcmask 523264   ;;  %vm2621_vm15 = vcmask 1043456  }
   0xf   :  { %v5065_v5 = vld [vmem:[%s6479_s0 + $0x20] sm:$0xff]  ;;  %v5066_v6 = vld [vmem:[%s6479_s0 + $0x28] sm:$0xff]  ;;  %v5067_v7 = vld [vmem:[%s6479_s0 + $0x30] sm:$0xff] }
  0x10   :  { %v5068_v8 = vld [vmem:[%s6479_s0 + $0x38] sm:$0xff] }
  0x11   :  { %4051 = vmatmul.msk.bf16.vlgmr.msra.gmra.mxu0 %vm155_vm0, %v5061_v1 }
  0x14   :  { %v5244_v48 = vpop.eup %5243 }
  0x15   :  { %v267_v53 = vmul.f32 128.0, %v5244_v48  ;;  %vm271_vm1 = vweird.f32 %v5244_v48 }
  0x17   :  { %v268_v58 = vsub.f32 1.0, %v267_v53 }
  0x19   :  { %v269_v61 = vmul.f32 %v5244_v48, %v268_v58 }
  0x1b   :  { %v270_v0 = vadd.f32 %v5244_v48, %v269_v61 }
  0x21   :  { %4052 = vmatmul.msk.bf16.gmra.mxu0 %vm155_vm0, %v5062_v2 }
  0x31   :  { %4053 = vmatmul.msk.bf16.gmra.mxu0 %vm155_vm0, %v5063_v3  ;;  %v5520_v3 = vsel %vm271_vm1, %v5244_v48, %v270_v0  ;;  %vm3721_vm1 = vcmask 1041408  }
  0x41   :  { %4054 = vmatmul.msk.bf16.gmra.mxu0 %vm155_vm0, %v5064_v4 }
  0x51   :  { %4055 = vmatmul.msk.bf16.gmra.mxu0 %vm155_vm0, %v5065_v5 }
  0x61   :  { %4056 = vmatmul.msk.bf16.gmra.mxu0 %vm155_vm0, %v5066_v6 }
  0x71   :  { %4057 = vmatmul.msk.bf16.gmra.mxu0 %vm155_vm0, %v5067_v7 }
  0x81   :  { %4058 = vmatmul.msk.bf16.gmra.mxu0 %vm155_vm0, %v5068_v8 }
  0x8e   :  { %v5456_v9 = vpop.f32.mrf.mxu0 }
  0x8f   :  { %v229_v22 = vsel %vm155_vm0, %v5456_v9, 0.0 }
  0x96   :  { %v5458_v10 = vpop.f32.mrf.mxu0 }
  0x97   :  { %v230_v21 = vsel %vm155_vm0, %v5458_v10, 0.0 }
  0x98   :  { %v231_v24 = vadd.f32 %v230_v21, %v229_v22 }
  0x9e   :  { %v5460_v11 = vpop.f32.mrf.mxu0 }
  0x9f   :  { %v232_v23 = vsel %vm155_vm0, %v5460_v11, 0.0 }
  0xa0   :  { %v233_v26 = vadd.f32 %v232_v23, %v231_v24 }
  0xa6   :  { %v5462_v12 = vpop.f32.mrf.mxu0 }
  0xa7   :  { %v234_v25 = vsel %vm155_vm0, %v5462_v12, 0.0 }
  0xa8   :  { %v235_v29 = vadd.f32 %v234_v25, %v233_v26 }
  0xae   :  { %v5464_v13 = vpop.f32.mrf.mxu0 }
  0xaf   :  { %v236_v28 = vsel %vm155_vm0, %v5464_v13, 0.0 }
  0xb0   :  { %v237_v31 = vadd.f32 %v236_v28, %v235_v29 }
  0xb6   :  { %v5466_v14 = vpop.f32.mrf.mxu0 }
  0xb7   :  { %v238_v30 = vsel %vm155_vm0, %v5466_v14, 0.0 }
  0xb8   :  { %v239_v33 = vadd.f32 %v238_v30, %v237_v31 }
  0xbe   :  { %v5468_v15 = vpop.f32.mrf.mxu0 }
  0xbf   :  { %v240_v32 = vsel %vm155_vm0, %v5468_v15, 0.0 }
  0xc0   :  { %v241_v35 = vadd.f32 %v240_v32, %v239_v33 }
  0xc6   :  { %v5470_v16 = vpop.f32.mrf.mxu0 }
  0xc7   :  { %v242_v34 = vsel %vm155_vm0, %v5470_v16, 0.0 }
  0xc8   :  { %v243_v38 = vadd.f32 %v242_v34, %v241_v35 }
  0xce   :  { %v5472_v17 = vpop.f32.mrf.mxu0 }
  0xcf   :  { %v244_v37 = vsel %vm155_vm0, %v5472_v17, 0.0 }
  0xd0   :  { %v245_v40 = vadd.f32 %v244_v37, %v243_v38 }
  0xd6   :  { %v5474_v18 = vpop.f32.mrf.mxu0 }
  0xd7   :  { %v246_v39 = vsel %vm155_vm0, %v5474_v18, 0.0 }
  0xd8   :  { %v247_v43 = vadd.f32 %v246_v39, %v245_v40 }
  0xde   :  { %v5476_v19 = vpop.f32.mrf.mxu0 }
  0xdf   :  { %v248_v42 = vsel %vm155_vm0, %v5476_v19, 0.0 }
  0xe0   :  { %v249_v45 = vadd.f32 %v248_v42, %v247_v43 }
  0xe6   :  { %v5478_v20 = vpop.f32.mrf.mxu0 }
  0xe7   :  { %v250_v44 = vsel %vm155_vm0, %v5478_v20, 0.0 }
  0xe8   :  { %v251_v49 = vadd.f32 %v250_v44, %v249_v45 }
  0xee   :  { %v5488_v27 = vpop.f32.mrf.mxu0 }
  0xef   :  { %v252_v47 = vsel %vm155_vm0, %v5488_v27, 0.0 }
  0xf0   :  { %v253_v51 = vadd.f32 %v252_v47, %v251_v49 }
  0xf6   :  { %v5498_v36 = vpop.f32.mrf.mxu0 }
  0xf7   :  { %v254_v50 = vsel %vm155_vm0, %v5498_v36, 0.0 }
  0xf8   :  { %v255_v54 = vadd.f32 %v254_v50, %v253_v51 }
  0xfe   :  { %v5508_v46 = vpop.f32.mrf.mxu0 }
  0xff   :  { %v256_v52 = vsel %vm155_vm0, %v5508_v46, 0.0 }
 0x100   :  { %v257_v55 = vadd.f32 %v256_v52, %v255_v54 }
 0x106   :  { %v5516_v56 = vpop.f32.mrf.mxu0 }
 0x107   :  { %v258_v57 = vsel %vm155_vm0, %v5516_v56, 0.0 }
 0x108   :  { %v259_v59 = vadd.f32 %v258_v57, %v257_v55 }
 0x10a   :  { %v260_v60 = vrot.slane %v259_v59, 4 }
 0x10c   :  { %v261_v62 = vadd.f32 %v260_v60, %v259_v59 }
 0x10e   :  { %v262_v63 = vrot.slane %v261_v62, 2 }
 0x110   :  { %v263_v1 = vadd.f32 %v262_v63, %v261_v62 }
 0x112   :  { %v264_v2 = vrot.slane %v263_v1, 1 }
 0x114   :  { %v265_v4 = vadd.f32 %v264_v2, %v263_v1 }
 0x116   :  { %v5523_v5 = vmul.f32 %v5520_v3, %v265_v4 }
 0x118   :  { %v274_v6 = vsub.f32 %v5456_v9, %v5523_v5  ;;  %v275_v7 = vsub.f32 %v5458_v10, %v5523_v5  ;;  %v276_v8 = vsub.f32 %v5460_v11, %v5523_v5  ;;  %v277_v21 = vsub.f32 %v5462_v12, %v5523_v5 }
 0x119   :  { %v278_v24 = vsub.f32 %v5464_v13, %v5523_v5  ;;  %v279_v26 = vsub.f32 %v5466_v14, %v5523_v5  ;;  %v280_v32 = vsub.f32 %v5468_v15, %v5523_v5  ;;  %v281_v37 = vsub.f32 %v5470_v16, %v5523_v5 }
 0x11a   :  { %v290_v22 = vmul.f32 %v274_v6, %v274_v6  ;;  %v291_v23 = vmul.f32 %v275_v7, %v275_v7  ;;  %v292_v25 = vmul.f32 %v276_v8, %v276_v8  ;;  %v293_v28 = vmul.f32 %v277_v21, %v277_v21 }
 0x11b   :  { %v294_v33 = vmul.f32 %v278_v24, %v278_v24  ;;  %v295_v38 = vmul.f32 %v279_v26, %v279_v26  ;;  %v282_v41 = vsub.f32 %v5472_v17, %v5523_v5  ;;  %v296_v42 = vmul.f32 %v280_v32, %v280_v32 }
 0x11c   :  { %v306_v29 = vsel %vm155_vm0, %v290_v22, 0.0  ;;  %v307_v30 = vsel %vm155_vm0, %v291_v23, 0.0  ;;  %v309_v34 = vsel %vm155_vm0, %v292_v25, 0.0  ;;  %v311_v39 = vsel %vm155_vm0, %v293_v28, 0.0 }
 0x11d   :  { %v308_v31 = vadd.f32 %v307_v30, %v306_v29  ;;  %v313_v43 = vsel %vm155_vm0, %v294_v33, 0.0  ;;  %v283_v45 = vsub.f32 %v5474_v18, %v5523_v5  ;;  %v297_v47 = vmul.f32 %v281_v37, %v281_v37 }
 0x11e   :  { %v315_v48 = vsel %vm155_vm0, %v295_v38, 0.0  ;;  %v284_v50 = vsub.f32 %v5476_v19, %v5523_v5  ;;  %v298_v51 = vmul.f32 %v282_v41, %v282_v41  ;;  %v317_v52 = vsel %vm155_vm0, %v296_v42, 0.0 }
 0x11f   :  { %v310_v35 = vadd.f32 %v309_v34, %v308_v31  ;;  %v285_v54 = vsub.f32 %v5478_v20, %v5523_v5  ;;  %v299_v55 = vmul.f32 %v283_v45, %v283_v45  ;;  %v319_v57 = vsel %vm155_vm0, %v297_v47, 0.0 }
 0x120   :  { %v286_v59 = vsub.f32 %v5488_v27, %v5523_v5  ;;  %v300_v60 = vmul.f32 %v284_v50, %v284_v50  ;;  %v321_v61 = vsel %vm155_vm0, %v298_v51, 0.0  ;;  %v287_v63 = vsub.f32 %v5498_v36, %v5523_v5  ;;  %v89_v51 = vld [vmem:[%s6489_s10] sm:$0xff] }
 0x121   :  { %v312_v40 = vadd.f32 %v311_v39, %v310_v35  ;;  %v301_v0 = vmul.f32 %v285_v54, %v285_v54  ;;  %v323_v1 = vsel %vm155_vm0, %v299_v55, 0.0  ;;  %v288_v4 = vsub.f32 %v5508_v46, %v5523_v5 }
 0x122   :  { %v302_v6 = vmul.f32 %v286_v59, %v286_v59  ;;  %v325_v7 = vsel %vm155_vm0, %v300_v60, 0.0  ;;  %v289_v21 = vsub.f32 %v5516_v56, %v5523_v5  ;;  %v303_v22 = vmul.f32 %v287_v63, %v287_v63 }
 0x123   :  { %v314_v44 = vadd.f32 %v313_v43, %v312_v40  ;;  %v327_v23 = vsel %vm155_vm0, %v301_v0, 0.0  ;;  %v304_v25 = vmul.f32 %v288_v4, %v288_v4 }
 0x124   :  { %v329_v26 = vsel %vm155_vm0, %v302_v6, 0.0  ;;  %v305_v29 = vmul.f32 %v289_v21, %v289_v21  ;;  %v331_v30 = vsel %vm155_vm0, %v303_v22, 0.0 }
 0x125   :  { %v316_v49 = vadd.f32 %v315_v48, %v314_v44  ;;  %v333_v32 = vsel %vm155_vm0, %v304_v25, 0.0 }
 0x126   :  { %v335_v34 = vsel %vm155_vm0, %v305_v29, 0.0 }
 0x127   :  { %v318_v53 = vadd.f32 %v317_v52, %v316_v49 }
 0x129   :  { %v320_v58 = vadd.f32 %v319_v57, %v318_v53 }
 0x12b   :  { %v322_v62 = vadd.f32 %v321_v61, %v320_v58 }
 0x12d   :  { %v324_v2 = vadd.f32 %v323_v1, %v322_v62 }
 0x12f   :  { %v326_v8 = vadd.f32 %v325_v7, %v324_v2 }
 0x131   :  { %v328_v24 = vadd.f32 %v327_v23, %v326_v8 }
 0x133   :  { %v330_v28 = vadd.f32 %v329_v26, %v328_v24 }
 0x135   :  { %v332_v31 = vadd.f32 %v331_v30, %v330_v28 }
 0x137   :  { %v334_v33 = vadd.f32 %v333_v32, %v332_v31 }
 0x139   :  { %v336_v35 = vadd.f32 %v335_v34, %v334_v33 }
 0x13b   :  { %v337_v37 = vrot.slane %v336_v35, 4 }
 0x13d   :  { %v338_v38 = vadd.f32 %v337_v37, %v336_v35 }
 0x13f   :  { %v339_v39 = vrot.slane %v338_v38, 2 }
 0x141   :  { %v340_v40 = vadd.f32 %v339_v39, %v338_v38 }
 0x143   :  { %v341_v41 = vrot.slane %v340_v40, 1 }
 0x145   :  { %v342_v42 = vadd.f32 %v341_v41, %v340_v40 }
 0x147   :  { %v343_v43 = vmul.f32 %v342_v42, %v5520_v3 }
 0x149   :  { %v344_v44 = vadd.f32 1e-05, %v343_v43 }
 0x14b   :  { %5245 = vrsqrt.f32 %v344_v44  ;;  %vm351_vm3 = vweird.f32 %v344_v44 }
 0x151   :  { %v5246_v45 = vpop.eup %5245 }
 0x152   :  { %v346_v47 = vmul.f32 %v5246_v45, %v344_v44  ;;  %vm352_vm2 = vweird.f32 %v5246_v45 }
 0x153   :  { %vm353_vm4 = vmor %vm351_vm3, %vm352_vm2  ;;  %vm3958_vm3 = vcmask 1042432  }
 0x154   :  { %v347_v48 = vmul.f32 %v5246_v45, %v346_v47 }
 0x156   :  { %v348_v49 = vmul.f32 0.5, %v347_v48 }
 0x158   :  { %v349_v50 = vsub.f32 1.5, %v348_v49 }
 0x15a   :  { %v350_v52 = vmul.f32 %v5246_v45, %v349_v50 }
 0x15c   :  { %v354_v53 = vsel %vm353_vm4, %v5246_v45, %v350_v52  ;;  %vm3955_vm4 = vcmask 318464  }
 0x15d   :  { %v355_v54 = vmul.f32 %v354_v53, %v89_v51 }
 0x15f   :  { %v356_v55 = vmul.f32 %v355_v54, %v5523_v5  ;;  %v5578_v3 = vperm.slane %v355_v54, 0 }
 0x161   :  { %v358_v57 = vrot.slane %v356_v55, 7  ;;  %v376_v59 = vmul.f32 %v5578_v3, %v5508_v46  ;;  %v377_v60 = vmul.f32 %v5578_v3, %v5516_v56  ;;  %v374_v62 = vmul.f32 %v5578_v3, %v5488_v27 }
 0x162   :  { %v375_v63 = vmul.f32 %v5578_v3, %v5498_v36  ;;  %v372_v5 = vmul.f32 %v5578_v3, %v5476_v19  ;;  %v373_v0 = vmul.f32 %v5578_v3, %v5478_v20  ;;  %v370_v19 = vmul.f32 %v5578_v3, %v5472_v17 }
 0x163   :  { %v360_v58 = vsub.f32 %v89_v51, %v358_v57  ;;  %v371_v20 = vmul.f32 %v5578_v3, %v5474_v18  ;;  %v368_v31 = vmul.f32 %v5578_v3, %v5468_v15  ;;  %v369_v17 = vmul.f32 %v5578_v3, %v5470_v16 }
 0x164   :  { %v366_v15 = vmul.f32 %v5578_v3, %v5464_v13  ;;  %v367_v16 = vmul.f32 %v5578_v3, %v5466_v14  ;;  %v364_v13 = vmul.f32 %v5578_v3, %v5460_v11  ;;  %v365_v14 = vmul.f32 %v5578_v3, %v5462_v12 }
 0x165   :  { %v5584_v61 = vperm.slane %v360_v58, 1  ;;  %v362_v54 = vmul.f32 %v5578_v3, %v5456_v9  ;;  %v363_v11 = vmul.f32 %v5578_v3, %v5458_v10 }
 0x167   :  { %v393_v1 = vadd.f32 %v5584_v61, %v376_v59  ;;  %v394_v46 = vadd.f32 %v5584_v61, %v377_v60  ;;  %v391_v56 = vadd.f32 %v5584_v61, %v374_v62  ;;  %v392_v2 = vadd.f32 %v5584_v61, %v375_v63 }
 0x168   :  { %v389_v4 = vadd.f32 %v5584_v61, %v372_v5  ;;  %v390_v36 = vadd.f32 %v5584_v61, %v373_v0  ;;  %v387_v24 = vadd.f32 %v5584_v61, %v370_v19  ;;  %v388_v25 = vadd.f32 %v5584_v61, %v371_v20  ;;  %v5076_v19 = vld [vmem:[%s6482_s3 + $0x20] sm:$0xff] }
 0x169   :  { %v409_v27 = vmul.f32 0.2, %v393_v1  ;;  %v410_v6 = vmul.f32 0.2, %v394_v46  ;;  %v407_v7 = vmul.f32 0.2, %v391_v56  ;;  %v385_v33 = vadd.f32 %v5584_v61, %v368_v31 }
 0x16a   :  { %v408_v8 = vmul.f32 0.2, %v392_v2  ;;  %v405_v23 = vmul.f32 0.2, %v389_v4  ;;  %v406_v30 = vmul.f32 0.2, %v390_v36  ;;  %v386_v34 = vadd.f32 %v5584_v61, %v369_v17 }
 0x16b   :  { %v425_v21 = vmax.f32 %v393_v1, %v409_v27  ;;  %v426_v22 = vmax.f32 %v394_v46, %v410_v6  ;;  %v423_v28 = vmax.f32 %v391_v56, %v407_v7  ;;  %v403_v18 = vmul.f32 0.2, %v387_v24  ;;  %v5078_v56 = vld [vmem:[#allocation2 + $0x10] sm:$0xff]  ;;  %v5088_v27 = vld [vmem:[%s6482_s3 + $0x60] sm:$0xff]  ;;  %v5071_v6 = vld [vmem:[%s6482_s3 + $0x8] sm:$0xff] }
 0x16c   :  { %v424_v29 = vmax.f32 %v392_v2, %v408_v8  ;;  %v404_v32 = vmul.f32 0.2, %v388_v25  ;;  %v421_v37 = vmax.f32 %v389_v4, %v405_v23  ;;  %v422_v38 = vmax.f32 %v390_v36, %v406_v30  ;;  %v5070_v2 = vld [vmem:[%s6482_s3] sm:$0xff]  ;;  %v5073_v4 = vld [vmem:[%s6482_s3 + $0x10] sm:$0xff]  ;;  %v5074_v7 = vld [vmem:[%s6482_s3 + $0x18] sm:$0xff] }
 0x16d   :  { %v5606_v26 = vpack.c.bf16 %v426_v22, %v425_v21  ;;  %v419_v39 = vmax.f32 %v387_v24, %v403_v18  ;;  %v401_v41 = vmul.f32 0.2, %v385_v33  ;;  %v402_v42 = vmul.f32 0.2, %v386_v34  ;;  %v5089_v36 = vld [vmem:[%s6482_s3 + $0x68] sm:$0xff]  ;;  %v5081_v8 = vld [vmem:[#allocation2 + $0x18] sm:$0xff] }
 0x16e   :  { %v5617_v35 = vpack.c.bf16 %v424_v29, %v423_v28  ;;  %v420_v40 = vmax.f32 %v388_v25, %v404_v32  ;;  %v5626_v43 = vpack.c.bf16 %v422_v38, %v421_v37  ;;  %v383_v44 = vadd.f32 %v5584_v61, %v366_v15  ;;  %v5094_v20 = vld [vmem:[%s6482_s3 + $0x80] sm:$0xff]  ;;  %v5077_v21 = vld [vmem:[%s6482_s3 + $0x28] sm:$0xff]  ;;  %v5075_v24 = vld [vmem:[#allocation2 + $0x8] sm:$0xff] }
 0x16f   :  { %451 = vmatpush.bf16.msra.mxu1 %v5606_v26  ;;  %491 = vmatpush.bf16.msra.mxu2 %v5606_v26  ;;  %v384_v45 = vadd.f32 %v5584_v61, %v367_v16  ;;  %v417_v48 = vmax.f32 %v385_v33, %v401_v41  ;;  %v418_v49 = vmax.f32 %v386_v34, %v402_v42  ;;  %v5095_v22 = vld [vmem:[%s6482_s3 + $0x88] sm:$0xff]  ;;  %v5100_v23 = vld [vmem:[%s6482_s3 + $0xa0] sm:$0xff] }
 0x170   :  { %898 = vmatpush.bf16.msrb.mxu0 %v5606_v26  ;;  %v5637_v47 = vpack.c.bf16 %v420_v40, %v419_v39  ;;  %v399_v50 = vmul.f32 0.2, %v383_v44  ;;  %v381_v52 = vadd.f32 %v5584_v61, %v364_v13  ;;  %v382_v53 = vadd.f32 %v5584_v61, %v365_v14  ;;  %534 = vmatpush.bf16.msra.mxu3 %v5075_v24  ;;  %v5072_v25 = vld [vmem:[#allocation2] sm:$0xff]  ;;  %v5079_v13 = vld [vmem:[%s6482_s3 + $0x30] sm:$0xff]  ;;  %v5092_v24 = vld [vmem:[%s6482_s3 + $0x78] sm:$0xff] }
 0x171   :  { %v400_v51 = vmul.f32 0.2, %v384_v45  ;;  %v5648_v12 = vpack.c.bf16 %v418_v49, %v417_v48  ;;  %v379_v55 = vadd.f32 %v5584_v61, %v362_v54  ;;  %v380_v57 = vadd.f32 %v5584_v61, %v363_v11  ;;  %v5083_v14 = vld [vmem:[%s6482_s3 + $0x48] sm:$0xff]  ;;  %v5080_v48 = vld [vmem:[%s6482_s3 + $0x38] sm:$0xff] }
 0x172   :  { %v415_v58 = vmax.f32 %v383_v44, %v399_v50  ;;  %v397_v60 = vmul.f32 0.2, %v381_v52  ;;  %v398_v62 = vmul.f32 0.2, %v382_v53 }
 0x173   :  { %452 = vmatpush.bf16.msra.mxu1 %v5617_v35  ;;  %492 = vmatpush.bf16.msra.mxu2 %v5617_v35  ;;  %v416_v59 = vmax.f32 %v384_v45, %v400_v51  ;;  %v395_v9 = vmul.f32 0.2, %v379_v55  ;;  %v396_v5 = vmul.f32 0.2, %v380_v57  ;;  %v5082_v45 = vld [vmem:[%s6482_s3 + $0x40] sm:$0xff] }
 0x174   :  { %899 = vmatpush.bf16.msrb.mxu0 %v5617_v35  ;;  %v413_v3 = vmax.f32 %v381_v52, %v397_v60  ;;  %v414_v63 = vmax.f32 %v382_v53, %v398_v62  ;;  %565 = vmatpush.bf16.msrb.mxu3 %v5072_v25  ;;  %v5101_v25 = vld [vmem:[%s6482_s3 + $0xa8] sm:$0xff] }
 0x175   :  { %v5655_v10 = vpack.c.bf16 %v416_v59, %v415_v58  ;;  %v411_v0 = vmax.f32 %v379_v55, %v395_v9  ;;  %v412_v1 = vmax.f32 %v380_v57, %v396_v5  ;;  %v5084_v57 = vld [vmem:[#allocation2 + $0x20] sm:$0xff] }
 0x176   :  { %v5660_v61 = vpack.c.bf16 %v414_v63, %v413_v3 }
 0x177   :  { %453 = vmatpush.bf16.msra.mxu1 %v5626_v43  ;;  %493 = vmatpush.bf16.msra.mxu2 %v5626_v43  ;;  %v5665_v46 = vpack.c.bf16 %v412_v1, %v411_v0 }
 0x178   :  { %900 = vmatpush.bf16.msrb.mxu0 %v5626_v43 }
 0x17b   :  { %454 = vmatpush.bf16.msra.mxu1 %v5637_v47  ;;  %494 = vmatpush.bf16.msra.mxu2 %v5637_v47 }
 0x17c   :  { %901 = vmatpush.bf16.msrb.mxu0 %v5637_v47 }
 0x17f   :  { %455 = vmatpush.bf16.msra.mxu1 %v5648_v12  ;;  %495 = vmatpush.bf16.msra.mxu2 %v5648_v12 }
 0x180   :  { %902 = vmatpush.bf16.msrb.mxu0 %v5648_v12 }
 0x183   :  { %456 = vmatpush.bf16.msra.mxu1 %v5655_v10  ;;  %496 = vmatpush.bf16.msra.mxu2 %v5655_v10 }
 0x184   :  { %903 = vmatpush.bf16.msrb.mxu0 %v5655_v10 }
 0x187   :  { %457 = vmatpush.bf16.msra.mxu1 %v5660_v61  ;;  %497 = vmatpush.bf16.msra.mxu2 %v5660_v61 }
 0x188   :  { %904 = vmatpush.bf16.msrb.mxu0 %v5660_v61 }
 0x18b   :  { %458 = vmatpush.bf16.msra.mxu1 %v5665_v46  ;;  %498 = vmatpush.bf16.msra.mxu2 %v5665_v46 }
 0x18c   :  { %905 = vmatpush.bf16.msrb.mxu0 %v5665_v46 }
 0x18e   :  { %459 = vmatmul.bf16.vlgmr.msra.gmra.mxu1 %v5070_v2  ;;  %499 = vmatmul.bf16.vlgmr.msra.gmra.mxu2 %v5073_v4 }
 0x18f   :  { %594 = vmatpush.bf16.msrb.mxu1 %v5606_v26  ;;  %637 = vmatpush.bf16.msrb.mxu2 %v5078_v56 }
 0x190   :  { %1050 = vmatpush.bf16.msra.mxu0 %v5606_v26 }
 0x191   :  { %906 = vmatmul.bf16.vlgmr.msrb.gmra.mxu0 %v5088_v27 }
 0x193   :  { %746 = vmatpush.bf16.msra.mxu2 %v5606_v26  ;;  %595 = vmatpush.bf16.msrb.mxu1 %v5617_v35 }
 0x194   :  { %1051 = vmatpush.bf16.msra.mxu0 %v5617_v35 }
 0x197   :  { %747 = vmatpush.bf16.msra.mxu2 %v5617_v35  ;;  %596 = vmatpush.bf16.msrb.mxu1 %v5626_v43 }
 0x198   :  { %1052 = vmatpush.bf16.msra.mxu0 %v5626_v43 }
 0x19b   :  { %748 = vmatpush.bf16.msra.mxu2 %v5626_v43  ;;  %597 = vmatpush.bf16.msrb.mxu1 %v5637_v47 }
 0x19c   :  { %1053 = vmatpush.bf16.msra.mxu0 %v5637_v47 }
 0x19e   :  { %464 = vmatmul.bf16.gmra.mxu1 %v5071_v6  ;;  %504 = vmatmul.bf16.gmra.mxu2 %v5074_v7 }
 0x19f   :  { %749 = vmatpush.bf16.msra.mxu2 %v5637_v47  ;;  %598 = vmatpush.bf16.msrb.mxu1 %v5648_v12 }
 0x1a0   :  { %1054 = vmatpush.bf16.msra.mxu0 %v5648_v12 }
 0x1a1   :  { %911 = vmatmul.bf16.gmra.mxu0 %v5089_v36 }
 0x1a3   :  { %750 = vmatpush.bf16.msra.mxu2 %v5648_v12  ;;  %599 = vmatpush.bf16.msrb.mxu1 %v5655_v10 }
 0x1a4   :  { %1055 = vmatpush.bf16.msra.mxu0 %v5655_v10 }
 0x1a7   :  { %751 = vmatpush.bf16.msra.mxu2 %v5655_v10  ;;  %600 = vmatpush.bf16.msrb.mxu1 %v5660_v61 }
 0x1a8   :  { %1056 = vmatpush.bf16.msra.mxu0 %v5660_v61 }
 0x1ab   :  { %752 = vmatpush.bf16.msra.mxu2 %v5660_v61  ;;  %601 = vmatpush.bf16.msrb.mxu1 %v5665_v46 }
 0x1ac   :  { %1057 = vmatpush.bf16.msra.mxu0 %v5665_v46 }
 0x1ae   :  { %602 = vmatmul.bf16.vlgmr.msrb.gmra.mxu1 %v5076_v19 }
 0x1af   :  { %713 = vmatpush.bf16.msra.mxu1 %v5081_v8  ;;  %753 = vmatpush.bf16.msra.mxu2 %v5665_v46 }
 0x1b0   :  { %1202 = vmatpush.bf16.msrb.mxu0 %v5606_v26 }
 0x1b1   :  { %1058 = vmatmul.bf16.vlgmr.msra.gmra.mxu0 %v5094_v20 }
 0x1b3   :  { %822 = vmatpush.bf16.msrb.mxu1 %v5606_v26 }
 0x1b4   :  { %1203 = vmatpush.bf16.msrb.mxu0 %v5617_v35 }
 0x1b7   :  { %823 = vmatpush.bf16.msrb.mxu1 %v5617_v35 }
 0x1b8   :  { %1204 = vmatpush.bf16.msrb.mxu0 %v5626_v43 }
 0x1bb   :  { %824 = vmatpush.bf16.msrb.mxu1 %v5626_v43 }
 0x1bc   :  { %1205 = vmatpush.bf16.msrb.mxu0 %v5637_v47 }
 0x1be   :  { %607 = vmatmul.bf16.gmra.mxu1 %v5077_v21  ;;  %v5085_v21 = vld [vmem:[%s6482_s3 + $0x50] sm:$0xff] }
 0x1bf   :  { %825 = vmatpush.bf16.msrb.mxu1 %v5637_v47 }
 0x1c0   :  { %1206 = vmatpush.bf16.msrb.mxu0 %v5648_v12 }
 0x1c1   :  { %1063 = vmatmul.bf16.gmra.mxu0 %v5095_v22  ;;  %v5086_v22 = vld [vmem:[%s6482_s3 + $0x58] sm:$0xff] }
 0x1c3   :  { %826 = vmatpush.bf16.msrb.mxu1 %v5648_v12 }
 0x1c4   :  { %1207 = vmatpush.bf16.msrb.mxu0 %v5655_v10 }
 0x1c7   :  { %827 = vmatpush.bf16.msrb.mxu1 %v5655_v10 }
 0x1c8   :  { %1208 = vmatpush.bf16.msrb.mxu0 %v5660_v61 }
 0x1cb   :  { %828 = vmatpush.bf16.msrb.mxu1 %v5660_v61 }
 0x1cc   :  { %1209 = vmatpush.bf16.msrb.mxu0 %v5665_v46 }
 0x1cf   :  { %829 = vmatpush.bf16.msrb.mxu1 %v5665_v46 }
 0x1d0   :  { %1354 = vmatpush.bf16.msra.mxu0 %v5606_v26 }
 0x1d1   :  { %1210 = vmatmul.bf16.vlgmr.msrb.gmra.mxu0 %v5100_v23  ;;  %v5091_v23 = vld [vmem:[%s6482_s3 + $0x70] sm:$0xff] }
 0x1d4   :  { %1355 = vmatpush.bf16.msra.mxu0 %v5617_v35 }
 0x1d8   :  { %1356 = vmatpush.bf16.msra.mxu0 %v5626_v43 }
 0x1dc   :  { %1357 = vmatpush.bf16.msra.mxu0 %v5637_v47 }
 0x1e0   :  { %1358 = vmatpush.bf16.msra.mxu0 %v5648_v12 }
 0x1e1   :  { %1215 = vmatmul.bf16.gmra.mxu0 %v5101_v25 }
 0x1e4   :  { %1359 = vmatpush.bf16.msra.mxu0 %v5655_v10 }
 0x1e8   :  { %1360 = vmatpush.bf16.msra.mxu0 %v5660_v61 }
 0x1ec   :  { %1361 = vmatpush.bf16.msra.mxu0 %v5665_v46 }
 0x1f0   :  { %1506 = vmatpush.bf16.msrb.mxu0 %v5606_v26 }
 0x1f4   :  { %1507 = vmatpush.bf16.msrb.mxu0 %v5617_v35 }
 0x1f8   :  { %1508 = vmatpush.bf16.msrb.mxu0 %v5626_v43 }
 0x1fc   :  { %1509 = vmatpush.bf16.msrb.mxu0 %v5637_v47 }
 0x200   :  { %1510 = vmatpush.bf16.msrb.mxu0 %v5648_v12 }
 0x204   :  { %1511 = vmatpush.bf16.msrb.mxu0 %v5655_v10 }
 0x208   :  { %1512 = vmatpush.bf16.msrb.mxu0 %v5660_v61 }
 0x20b   :  { %v460_v28 = vpop.f32.mrf.mxu1 }
 0x20c   :  { %1513 = vmatpush.bf16.msrb.mxu0 %v5665_v46 }
 0x211   :  { %v500_v29 = vpop.f32.mrf.mxu2 }
 0x213   :  { %v462_v30 = vpop.f32.mrf.mxu1 }
 0x214   :  { %v470_v39 = vpack.c.bf16 %v462_v30, %v460_v28  ;;  %v5097_v28 = vld [vmem:[%s6482_s3 + $0x90] sm:$0xff]  ;;  %v5098_v30 = vld [vmem:[%s6482_s3 + $0x98] sm:$0xff] }
 0x219   :  { %v502_v31 = vpop.f32.mrf.mxu2 }
 0x21a   :  { %v510_v17 = vpack.c.bf16 %v502_v31, %v500_v29  ;;  %v5106_v29 = vld [vmem:[%s6482_s3 + $0xc0] sm:$0xff]  ;;  %v5107_v31 = vld [vmem:[%s6482_s3 + $0xc8] sm:$0xff] }
 0x21b   :  { %v465_v18 = vpop.f32.mrf.mxu1  ;;  %1362 = vmatmul.bf16.vlgmr.msra.gmra.mxu0 %v5106_v29 }
 0x21c   :  { %4083 = vmatmul.msk.bf16.vlgmr.msra.gmra.mxu3 %vm155_vm0, %v510_v17  ;;  %v5103_v17 = vld [vmem:[%s6482_s3 + $0xb0] sm:$0xff] }
 0x21d   :  { %670 = vmatpush.bf16.msra.mxu3 %v5606_v26 }
 0x221   :  { %671 = vmatpush.bf16.msra.mxu3 %v5617_v35  ;;  %v505_v32 = vpop.f32.mrf.mxu2 }
 0x223   :  { %v467_v33 = vpop.f32.mrf.mxu1 }
 0x224   :  { %v471_v44 = vpack.c.bf16 %v467_v33, %v465_v18 }
 0x225   :  { %672 = vmatpush.bf16.msra.mxu3 %v5626_v43 }
 0x229   :  { %673 = vmatpush.bf16.msra.mxu3 %v5637_v47  ;;  %v507_v34 = vpop.f32.mrf.mxu2 }
 0x22a   :  { %v511_v37 = vpack.c.bf16 %v507_v34, %v505_v32  ;;  %v907_v34 = vpop.f32.mrf.mxu0 }
 0x22b   :  { %v603_v38 = vpop.f32.mrf.mxu1  ;;  %1367 = vmatmul.bf16.gmra.mxu0 %v5107_v31 }
 0x22c   :  { %4084 = vmatmul.msk.bf16.gmra.mxu3 %vm155_vm0, %v511_v37 }
 0x22d   :  { %674 = vmatpush.bf16.msra.mxu3 %v5648_v12 }
 0x231   :  { %675 = vmatpush.bf16.msra.mxu3 %v5655_v10 }
 0x233   :  { %v605_v15 = vpop.f32.mrf.mxu1 }
 0x234   :  { %v613_v16 = vpack.c.bf16 %v605_v15, %v603_v38  ;;  %v5087_v38 = vld [vmem:[#allocation2 + $0x28] sm:$0xff]  ;;  %v5112_v15 = vld [vmem:[%s6482_s3 + $0xe0] sm:$0xff] }
 0x235   :  { %676 = vmatpush.bf16.msra.mxu3 %v5660_v61 }
 0x236   :  { %4107 = vmatmul.msk.bf16.vlgmr.msrb.gmra.mxu2 %vm155_vm0, %v613_v16 }
 0x237   :  { %865 = vmatpush.bf16.msrb.mxu2 %v5087_v38 }
 0x239   :  { %677 = vmatpush.bf16.msra.mxu3 %v5665_v46 }
 0x23b   :  { %v608_v40 = vpop.f32.mrf.mxu1  ;;  %1514 = vmatmul.bf16.vlgmr.msrb.gmra.mxu0 %v5112_v15 }
 0x23c   :  { %4089 = vmatmul.msk.bf16.vlgmr.msrb.gmra.mxu3 %vm155_vm0, %v470_v39 }
 0x23d   :  { %789 = vmatpush.bf16.msrb.mxu3 %v5084_v57 }
 0x243   :  { %v610_v41 = vpop.f32.mrf.mxu1 }
 0x244   :  { %v614_v42 = vpack.c.bf16 %v610_v41, %v608_v40  ;;  %v909_v40 = vpop.f32.mrf.mxu0  ;;  %v5090_v41 = vld [vmem:[#allocation2 + $0x30] sm:$0xff] }
 0x246   :  { %4108 = vmatmul.msk.bf16.gmra.mxu2 %vm155_vm0, %v614_v42  ;;  %v917_v42 = vpack.c.bf16 %v909_v40, %v907_v34 }
 0x24c   :  { %4090 = vmatmul.msk.bf16.gmra.mxu3 %vm155_vm0, %v471_v44 }
 0x256   :  { %754 = vmatmul.bf16.vlgmr.msra.gmra.mxu2 %v5082_v45 }
 0x25c   :  { %678 = vmatmul.bf16.vlgmr.msra.gmra.mxu3 %v5079_v13  ;;  %v912_v13 = vpop.f32.mrf.mxu0 }
 0x25d   :  { %941 = vmatpush.bf16.msra.mxu3 %v5090_v41 }
 0x266   :  { %759 = vmatmul.bf16.gmra.mxu2 %v5083_v14 }
 0x26c   :  { %683 = vmatmul.bf16.gmra.mxu3 %v5080_v48 }
 0x29f   :  { %v536_v49 = vpop.f32.mrf.mxu3 }
 0x2a7   :  { %v5785_v50 = vpop.f32.mrf.mxu3 }
 0x2af   :  { %v541_v51 = vpop.f32.mrf.mxu3 }
 0x2b7   :  { %v5787_v52 = vpop.f32.mrf.mxu3 }
 0x2b9   :  { %v639_v53 = vpop.f32.mrf.mxu2 }
 0x2bf   :  { %v567_v54 = vpop.f32.mrf.mxu3 }
 0x2c0   :  { %v568_v11 = vadd.f32 %v567_v54, %v536_v49 }
 0x2c1   :  { %v5789_v55 = vpop.f32.mrf.mxu2 }
 0x2c2   :  { %v5791_v58 = vadd.f32 %v639_v53, %v568_v11 }
 0x2c7   :  { %v5793_v59 = vpop.f32.mrf.mxu3 }
 0x2c9   :  { %v644_v60 = vpop.f32.mrf.mxu2 }
 0x2cf   :  { %v572_v62 = vpop.f32.mrf.mxu3 }
 0x2d0   :  { %v573_v9 = vadd.f32 %v572_v62, %v541_v51  ;;  %v5109_v51 = vld [vmem:[%s6482_s3 + $0xd0] sm:$0xff] }
 0x2d1   :  { %v5795_v3 = vpop.f32.mrf.mxu2 }
 0x2d2   :  { %v5797_v63 = vadd.f32 %v644_v60, %v573_v9 }
 0x2d7   :  { %v5799_v5 = vpop.f32.mrf.mxu3 }
 0x2d9   :  { %v755_v0 = vpop.f32.mrf.mxu2 }
 0x2df   :  { %v679_v1 = vpop.f32.mrf.mxu3 }
 0x2e1   :  { %v757_v56 = vpop.f32.mrf.mxu2 }
 0x2e2   :  { %v765_v2 = vpack.c.bf16 %v757_v56, %v755_v0  ;;  %v5115_v56 = vld [vmem:[%s6482_s3 + $0xf0] sm:$0xff] }
 0x2e4   :  { %4143 = vmatmul.msk.bf16.vlgmr.msrb.gmra.mxu3 %vm155_vm0, %v765_v2 }
 0x2e7   :  { %v681_v4 = vpop.f32.mrf.mxu3 }
 0x2e8   :  { %v689_v27 = vpack.c.bf16 %v681_v4, %v679_v1  ;;  %v5099_v4 = vld [vmem:[#allocation2 + $0x48] sm:$0xff] }
 0x2e9   :  { %v760_v6 = vpop.f32.mrf.mxu2 }
 0x2ea   :  { %4125 = vmatmul.msk.bf16.vlgmr.msra.gmra.mxu1 %vm155_vm0, %v689_v27 }
 0x2eb   :  { %974 = vmatpush.bf16.msra.mxu1 %v5606_v26 }
 0x2ef   :  { %975 = vmatpush.bf16.msra.mxu1 %v5617_v35  ;;  %v684_v7 = vpop.f32.mrf.mxu3 }
 0x2f1   :  { %v762_v36 = vpop.f32.mrf.mxu2 }
 0x2f2   :  { %v766_v8 = vpack.c.bf16 %v762_v36, %v760_v6 }
 0x2f3   :  { %976 = vmatpush.bf16.msra.mxu1 %v5626_v43 }
 0x2f4   :  { %4144 = vmatmul.msk.bf16.gmra.mxu3 %vm155_vm0, %v766_v8  ;;  %v5102_v8 = vld [vmem:[#allocation2 + $0x50] sm:$0xff] }
 0x2f7   :  { %977 = vmatpush.bf16.msra.mxu1 %v5637_v47  ;;  %v686_v19 = vpop.f32.mrf.mxu3 }
 0x2f8   :  { %v690_v20 = vpack.c.bf16 %v686_v19, %v684_v7 }
 0x2fa   :  { %4126 = vmatmul.msk.bf16.gmra.mxu1 %vm155_vm0, %v690_v20  ;;  %v5116_v20 = vld [vmem:[%s6482_s3 + $0xf8] sm:$0xff] }
 0x2fb   :  { %978 = vmatpush.bf16.msra.mxu1 %v5648_v12 }
 0x2ff   :  { %979 = vmatpush.bf16.msra.mxu1 %v5655_v10 }
 0x303   :  { %980 = vmatpush.bf16.msra.mxu1 %v5660_v61 }
 0x304   :  { %4179 = vmatmul.msk.bf16.vlgmr.msra.gmra.mxu3 %vm155_vm0, %v917_v42 }
 0x307   :  { %981 = vmatpush.bf16.msra.mxu1 %v5665_v46 }
 0x30a   :  { %830 = vmatmul.bf16.vlgmr.msrb.gmra.mxu1 %v5085_v21 }
 0x30b   :  { %1126 = vmatpush.bf16.msrb.mxu1 %v5606_v26 }
 0x30f   :  { %1127 = vmatpush.bf16.msrb.mxu1 %v5617_v35 }
 0x313   :  { %1128 = vmatpush.bf16.msrb.mxu1 %v5626_v43 }
 0x317   :  { %1129 = vmatpush.bf16.msrb.mxu1 %v5637_v47 }
 0x31a   :  { %835 = vmatmul.bf16.gmra.mxu1 %v5086_v22 }
 0x31b   :  { %1130 = vmatpush.bf16.msrb.mxu1 %v5648_v12 }
 0x31f   :  { %1131 = vmatpush.bf16.msrb.mxu1 %v5655_v10 }
 0x323   :  { %1132 = vmatpush.bf16.msrb.mxu1 %v5660_v61 }
 0x327   :  { %1133 = vmatpush.bf16.msrb.mxu1 %v5665_v46 }
 0x32a   :  { %982 = vmatmul.bf16.vlgmr.msra.gmra.mxu1 %v5091_v23 }
 0x32b   :  { %1278 = vmatpush.bf16.msra.mxu1 %v5606_v26 }
 0x32f   :  { %1279 = vmatpush.bf16.msra.mxu1 %v5617_v35 }
 0x333   :  { %1280 = vmatpush.bf16.msra.mxu1 %v5626_v43 }
 0x337   :  { %1281 = vmatpush.bf16.msra.mxu1 %v5637_v47 }
 0x33a   :  { %987 = vmatmul.bf16.gmra.mxu1 %v5092_v24 }
 0x33b   :  { %1282 = vmatpush.bf16.msra.mxu1 %v5648_v12 }
 0x33f   :  { %1283 = vmatpush.bf16.msra.mxu1 %v5655_v10 }
 0x343   :  { %1284 = vmatpush.bf16.msra.mxu1 %v5660_v61 }
 0x347   :  { %1285 = vmatpush.bf16.msra.mxu1 %v5665_v46 }
 0x34a   :  { %1134 = vmatmul.bf16.vlgmr.msrb.gmra.mxu1 %v5097_v28 }
 0x34b   :  { %1430 = vmatpush.bf16.msrb.mxu1 %v5606_v26 }
 0x34f   :  { %1431 = vmatpush.bf16.msrb.mxu1 %v5617_v35 }
 0x353   :  { %1432 = vmatpush.bf16.msrb.mxu1 %v5626_v43 }
 0x357   :  { %1433 = vmatpush.bf16.msrb.mxu1 %v5637_v47 }
 0x35a   :  { %1139 = vmatmul.bf16.gmra.mxu1 %v5098_v30  ;;  %v5105_v30 = vld [vmem:[#allocation2 + $0x58] sm:$0xff] }
 0x35b   :  { %1434 = vmatpush.bf16.msrb.mxu1 %v5648_v12 }
 0x35f   :  { %1435 = vmatpush.bf16.msrb.mxu1 %v5655_v10 }
 0x363   :  { %1436 = vmatpush.bf16.msrb.mxu1 %v5660_v61 }
 0x367   :  { %1437 = vmatpush.bf16.msrb.mxu1 %v5665_v46  ;;  %v715_v18 = vpop.f32.mrf.mxu1  ;;  %v791_v32 = vpop.f32.mrf.mxu3 }
 0x368   :  { %v725_v33 = vadd.f32 %v715_v18, %v5791_v58  ;;  %v5096_v58 = vld [vmem:[#allocation2 + $0x40] sm:$0xff] }
 0x369   :  { %1093 = vmatpush.bf16.msrb.mxu3 %v5096_v58 }
 0x36a   :  { %v5868_v37 = vadd.f32 %v791_v32, %v725_v33  ;;  %1286 = vmatmul.bf16.vlgmr.msra.gmra.mxu1 %v5103_v17  ;;  %v5108_v32 = vld [vmem:[#allocation2 + $0x60] sm:$0xff] }
 0x36b   :  { %1582 = vmatpush.bf16.msra.mxu1 %v5606_v26  ;;  %v5104_v26 = vld [vmem:[%s6482_s3 + $0xb8] sm:$0xff] }
 0x36d   :  { %1245 = vmatpush.bf16.msra.mxu3 %v5102_v8 }
 0x36f   :  { %1583 = vmatpush.bf16.msra.mxu1 %v5617_v35  ;;  %v5875_v16 = vpop.f32.mrf.mxu1  ;;  %v5877_v39 = vpop.f32.mrf.mxu3 }
 0x373   :  { %1584 = vmatpush.bf16.msra.mxu1 %v5626_v43  ;;  %v5113_v43 = vld [vmem:[%s6482_s3 + $0xe8] sm:$0xff] }
 0x374   :  { %1519 = vmatmul.bf16.gmra.mxu0 %v5113_v43 }
 0x377   :  { %1585 = vmatpush.bf16.msra.mxu1 %v5637_v47  ;;  %v720_v44 = vpop.f32.mrf.mxu1  ;;  %v796_v35 = vpop.f32.mrf.mxu3 }
 0x378   :  { %v727_v45 = vadd.f32 %v720_v44, %v5797_v63  ;;  %v914_v47 = vpop.f32.mrf.mxu0 }
 0x379   :  { %v918_v49 = vpack.c.bf16 %v914_v47, %v912_v13  ;;  %v5114_v47 = vld [vmem:[#allocation2 + $0x70] sm:$0xff] }
 0x37a   :  { %v5886_v14 = vadd.f32 %v796_v35, %v727_v45  ;;  %1291 = vmatmul.bf16.gmra.mxu1 %v5104_v26  ;;  %v5111_v35 = vld [vmem:[#allocation2 + $0x68] sm:$0xff] }
 0x37b   :  { %1586 = vmatpush.bf16.msra.mxu1 %v5648_v12  ;;  %4180 = vmatmul.msk.bf16.gmra.mxu3 %vm155_vm0, %v918_v49  ;;  %v5093_v12 = vld [vmem:[#allocation2 + $0x38] sm:$0xff] }
 0x37c   :  { %1017 = vmatpush.bf16.msra.mxu2 %v5093_v12 }
 0x37f   :  { %1587 = vmatpush.bf16.msra.mxu1 %v5655_v10  ;;  %v5893_v48 = vpop.f32.mrf.mxu1  ;;  %v5924_v12 = vpop.f32.mrf.mxu3 }
 0x380   :  { %v1059_v54 = vpop.f32.mrf.mxu0 }
 0x383   :  { %1588 = vmatpush.bf16.msra.mxu1 %v5660_v61  ;;  %v5110_v61 = vld [vmem:[%s6482_s3 + $0xd8] sm:$0xff] }
 0x387   :  { %1589 = vmatpush.bf16.msra.mxu1 %v5665_v46  ;;  %v831_v53 = vpop.f32.mrf.mxu1 }
 0x388   :  { %v1061_v57 = vpop.f32.mrf.mxu0 }
 0x389   :  { %v1069_v60 = vpack.c.bf16 %v1061_v57, %v1059_v54 }
 0x38a   :  { %1438 = vmatmul.bf16.vlgmr.msrb.gmra.mxu1 %v5109_v51 }
 0x38b   :  { %4215 = vmatmul.msk.bf16.vlgmr.msrb.gmra.mxu3 %vm155_vm0, %v1069_v60  ;;  %v943_v60 = vpop.f32.mrf.mxu3 }
 0x38c   :  { %1397 = vmatpush.bf16.msrb.mxu3 %v5108_v32 }
 0x38f   :  { %v833_v10 = vpop.f32.mrf.mxu1 }
 0x390   :  { %v841_v11 = vpack.c.bf16 %v833_v10, %v831_v53  ;;  %v1064_v62 = vpop.f32.mrf.mxu0 }
 0x392   :  { %4161 = vmatmul.msk.bf16.vlgmr.msrb.gmra.mxu2 %vm155_vm0, %v841_v11 }
 0x393   :  { %1169 = vmatpush.bf16.msrb.mxu2 %v5099_v4 }
 0x397   :  { %v836_v46 = vpop.f32.mrf.mxu1 }
 0x398   :  { %v1066_v0 = vpop.f32.mrf.mxu0 }
 0x399   :  { %v1070_v1 = vpack.c.bf16 %v1066_v0, %v1064_v62 }
 0x39a   :  { %1443 = vmatmul.bf16.gmra.mxu1 %v5110_v61 }
 0x39b   :  { %4216 = vmatmul.msk.bf16.gmra.mxu3 %vm155_vm0, %v1070_v1 }
 0x39f   :  { %v838_v9 = vpop.f32.mrf.mxu1 }
 0x3a0   :  { %v842_v63 = vpack.c.bf16 %v838_v9, %v836_v46  ;;  %v1211_v27 = vpop.f32.mrf.mxu0  ;;  %v5117_v46 = vld [vmem:[#allocation2 + $0x78] sm:$0xff]  ;;  %v5928_v9 = vpop.f32.mrf.mxu3 }
 0x3a2   :  { %4162 = vmatmul.msk.bf16.gmra.mxu2 %vm155_vm0, %v842_v63 }
 0x3a7   :  { %v983_v2 = vpop.f32.mrf.mxu1 }
 0x3a8   :  { %v1213_v36 = vpop.f32.mrf.mxu0 }
 0x3a9   :  { %v1221_v19 = vpack.c.bf16 %v1213_v36, %v1211_v27 }
 0x3aa   :  { %1590 = vmatmul.bf16.vlgmr.msra.gmra.mxu1 %v5115_v56 }
 0x3ab   :  { %4251 = vmatmul.msk.bf16.vlgmr.msra.gmra.mxu3 %vm155_vm0, %v1221_v19 }
 0x3ac   :  { %1549 = vmatpush.bf16.msra.mxu3 %v5114_v47 }
 0x3af   :  { %v985_v6 = vpop.f32.mrf.mxu1 }
 0x3b0   :  { %v993_v7 = vpack.c.bf16 %v985_v6, %v983_v2  ;;  %v1216_v22 = vpop.f32.mrf.mxu0 }
 0x3b2   :  { %4197 = vmatmul.msk.bf16.vlgmr.msra.gmra.mxu2 %vm155_vm0, %v993_v7 }
 0x3b3   :  { %1321 = vmatpush.bf16.msra.mxu2 %v5105_v30 }
 0x3b7   :  { %v988_v21 = vpop.f32.mrf.mxu1 }
 0x3b8   :  { %v1218_v25 = vpop.f32.mrf.mxu0 }
 0x3b9   :  { %v1222_v28 = vpack.c.bf16 %v1218_v25, %v1216_v22 }
 0x3ba   :  { %1595 = vmatmul.bf16.gmra.mxu1 %v5116_v20 }
 0x3bb   :  { %4252 = vmatmul.msk.bf16.gmra.mxu3 %vm155_vm0, %v1222_v28 }
 0x3bf   :  { %v990_v23 = vpop.f32.mrf.mxu1 }
 0x3c0   :  { %v994_v24 = vpack.c.bf16 %v990_v23, %v988_v21  ;;  %v1363_v31 = vpop.f32.mrf.mxu0 }
 0x3c2   :  { %4198 = vmatmul.msk.bf16.gmra.mxu2 %vm155_vm0, %v994_v24 }
 0x3c7   :  { %v1135_v29 = vpop.f32.mrf.mxu1 }
 0x3c8   :  { %v1365_v33 = vpop.f32.mrf.mxu0 }
 0x3c9   :  { %v1373_v34 = vpack.c.bf16 %v1365_v33, %v1363_v31 }
 0x3cb   :  { %4287 = vmatmul.msk.bf16.vlgmr.msrb.gmra.mxu3 %vm155_vm0, %v1373_v34 }
 0x3cf   :  { %v1137_v17 = vpop.f32.mrf.mxu1 }
 0x3d0   :  { %v1145_v18 = vpack.c.bf16 %v1137_v17, %v1135_v29  ;;  %v1368_v15 = vpop.f32.mrf.mxu0 }
 0x3d2   :  { %4233 = vmatmul.msk.bf16.vlgmr.msrb.gmra.mxu2 %vm155_vm0, %v1145_v18 }
 0x3d3   :  { %1473 = vmatpush.bf16.msrb.mxu2 %v5111_v35 }
 0x3d7   :  { %v1140_v38 = vpop.f32.mrf.mxu1 }
 0x3d8   :  { %v1370_v42 = vpop.f32.mrf.mxu0 }
 0x3d9   :  { %v1374_v26 = vpack.c.bf16 %v1370_v42, %v1368_v15 }
 0x3db   :  { %4288 = vmatmul.msk.bf16.gmra.mxu3 %vm155_vm0, %v1374_v26 }
 0x3df   :  { %v1142_v40 = vpop.f32.mrf.mxu1 }
 0x3e0   :  { %v1146_v41 = vpack.c.bf16 %v1142_v40, %v1140_v38  ;;  %v1515_v45 = vpop.f32.mrf.mxu0 }
 0x3e2   :  { %4234 = vmatmul.msk.bf16.gmra.mxu2 %vm155_vm0, %v1146_v41 }
 0x3e7   :  { %v1287_v44 = vpop.f32.mrf.mxu1 }
 0x3e8   :  { %v1517_v49 = vpop.f32.mrf.mxu0 }
 0x3e9   :  { %v1525_v51 = vpack.c.bf16 %v1517_v49, %v1515_v45 }
 0x3eb   :  { %4323 = vmatmul.msk.bf16.vlgmr.msra.gmra.mxu3 %vm155_vm0, %v1525_v51 }
 0x3ef   :  { %v1289_v13 = vpop.f32.mrf.mxu1 }
 0x3f0   :  { %v1297_v43 = vpack.c.bf16 %v1289_v13, %v1287_v44 }
 0x3f1   :  { %v1520_v54 = vpop.f32.mrf.mxu0 }
 0x3f2   :  { %4269 = vmatmul.msk.bf16.vlgmr.msra.gmra.mxu2 %vm155_vm0, %v1297_v43 }
 0x3f3   :  { %1625 = vmatpush.bf16.msra.mxu2 %v5117_v46 }
 0x3f7   :  { %v1292_v53 = vpop.f32.mrf.mxu1 }
 0x3f9   :  { %v1522_v57 = vpop.f32.mrf.mxu0 }
 0x3fa   :  { %v1526_v58 = vpack.c.bf16 %v1522_v57, %v1520_v54 }
 0x3fc   :  { %4324 = vmatmul.msk.bf16.gmra.mxu3 %vm155_vm0, %v1526_v58 }
 0x3fe   :  { %v948_v4 = vpop.f32.mrf.mxu3 }
 0x3ff   :  { %v1294_v10 = vpop.f32.mrf.mxu1 }
 0x400   :  { %v1298_v11 = vpack.c.bf16 %v1294_v10, %v1292_v53 }
 0x402   :  { %4270 = vmatmul.msk.bf16.gmra.mxu2 %vm155_vm0, %v1298_v11 }
 0x406   :  { %v5933_v36 = vpop.f32.mrf.mxu3 }
 0x407   :  { %v1439_v61 = vpop.f32.mrf.mxu1 }
 0x40e   :  { %v1095_v23 = vpop.f32.mrf.mxu3 }
 0x40f   :  { %v1441_v62 = vpop.f32.mrf.mxu1 }
 0x410   :  { %v1449_v63 = vpack.c.bf16 %v1441_v62, %v1439_v61  ;;  %v570_v62 = vadd.f32 %v5793_v59, %v5785_v50 }
 0x412   :  { %4305 = vmatmul.msk.bf16.vlgmr.msrb.gmra.mxu2 %vm155_vm0, %v1449_v63 }
 0x415   :  { %v867_v0 = vpop.f32.mrf.mxu2 }
 0x416   :  { %v877_v1 = vadd.f32 %v867_v0, %v5868_v37  ;;  %v1097_v30 = vpop.f32.mrf.mxu3  ;;  %v650_v0 = vadd.f32 %v5789_v55, %v570_v62 }
 0x417   :  { %v1444_v56 = vpop.f32.mrf.mxu1 }
 0x418   :  { %v953_v2 = vadd.f32 %v943_v60, %v877_v1 }
 0x41d   :  { %v869_v27 = vpop.f32.mrf.mxu2 }
 0x41e   :  { %v1100_v33 = vpop.f32.mrf.mxu3 }
 0x41f   :  { %v1446_v6 = vpop.f32.mrf.mxu1 }
 0x420   :  { %v1450_v7 = vpack.c.bf16 %v1446_v6, %v1444_v56  ;;  %v726_v56 = vadd.f32 %v5875_v16, %v650_v0 }
 0x422   :  { %4306 = vmatmul.msk.bf16.gmra.mxu2 %vm155_vm0, %v1450_v7  ;;  %v802_v6 = vadd.f32 %v5877_v39, %v726_v56 }
 0x425   :  { %v872_v8 = vpop.f32.mrf.mxu2 }
 0x426   :  { %v879_v19 = vadd.f32 %v872_v8, %v5886_v14  ;;  %v1102_v15 = vpop.f32.mrf.mxu3  ;;  %v878_v8 = vadd.f32 %v869_v27, %v802_v6 }
 0x427   :  { %v1591_v20 = vpop.f32.mrf.mxu1 }
 0x428   :  { %v955_v21 = vadd.f32 %v948_v4, %v879_v19  ;;  %v954_v50 = vadd.f32 %v5928_v9, %v878_v8 }
 0x42d   :  { %v874_v22 = vpop.f32.mrf.mxu2 }
 0x42e   :  { %v1247_v42 = vpop.f32.mrf.mxu3 }
 0x42f   :  { %v1593_v24 = vpop.f32.mrf.mxu1 }
 0x430   :  { %v1601_v25 = vpack.c.bf16 %v1593_v24, %v1591_v20 }
 0x432   :  { %4341 = vmatmul.msk.bf16.vlgmr.msra.gmra.mxu2 %vm155_vm0, %v1601_v25 }
 0x435   :  { %v1019_v37 = vpop.f32.mrf.mxu2 }
 0x436   :  { %v1029_v28 = vadd.f32 %v1019_v37, %v953_v2  ;;  %v1249_v45 = vpop.f32.mrf.mxu3  ;;  %v575_v2 = vadd.f32 %v5799_v5, %v5787_v52 }
 0x437   :  { %v1596_v29 = vpop.f32.mrf.mxu1 }
 0x438   :  { %v1105_v31 = vadd.f32 %v1095_v23, %v1029_v28  ;;  %v652_v7 = vadd.f32 %v5795_v3, %v575_v2 }
 0x43a   :  { %v728_v19 = vadd.f32 %v5893_v48, %v652_v7 }
 0x43c   :  { %v804_v59 = vadd.f32 %v5924_v12, %v728_v19 }
 0x43d   :  { %v1021_v17 = vpop.f32.mrf.mxu2 }
 0x43e   :  { %v1252_v49 = vpop.f32.mrf.mxu3  ;;  %v880_v23 = vadd.f32 %v874_v22, %v804_v59 }
 0x43f   :  { %v1598_v18 = vpop.f32.mrf.mxu1 }
 0x440   :  { %v1602_v32 = vpack.c.bf16 %v1598_v18, %v1596_v29  ;;  %v956_v24 = vadd.f32 %v5933_v36, %v880_v23 }
 0x442   :  { %4342 = vmatmul.msk.bf16.gmra.mxu2 %vm155_vm0, %v1602_v32  ;;  %vm2617_vm0 = vcmask 64512  }
 0x445   :  { %v1024_v14 = vpop.f32.mrf.mxu2 }
 0x446   :  { %v1031_v34 = vadd.f32 %v1024_v14, %v955_v21  ;;  %v1254_v54 = vpop.f32.mrf.mxu3  ;;  %v1030_v21 = vadd.f32 %v1021_v17, %v954_v50  ;;  %v5343_v14 = vmov 32.0  }
 0x447   :  { %5247 = vrcp.f32 %v5343_v14 }
 0x448   :  { %v1107_v38 = vadd.f32 %v1100_v33, %v1031_v34  ;;  %v1106_v16 = vadd.f32 %v1097_v30, %v1030_v21 }
 0x44d   :  { %v1026_v40 = vpop.f32.mrf.mxu2 }
 0x44e   :  { %v1399_v11 = vpop.f32.mrf.mxu3  ;;  %v1032_v5 = vadd.f32 %v1026_v40, %v956_v24 }
 0x450   :  { %v1108_v3 = vadd.f32 %v1102_v15, %v1032_v5 }
 0x455   :  { %v1171_v41 = vpop.f32.mrf.mxu2 }
 0x456   :  { %v1181_v26 = vadd.f32 %v1171_v41, %v1105_v31  ;;  %v1401_v58 = vpop.f32.mrf.mxu3 }
 0x458   :  { %v1257_v44 = vadd.f32 %v1247_v42, %v1181_v26 }
 0x45d   :  { %v1173_v35 = vpop.f32.mrf.mxu2 }
 0x45e   :  { %v1404_v46 = vpop.f32.mrf.mxu3  ;;  %v1182_v52 = vadd.f32 %v1173_v35, %v1106_v16 }
 0x460   :  { %v1258_v37 = vadd.f32 %v1249_v45, %v1182_v52  ;;  %v5248_v45 = vpop.eup %5247 }
 0x461   :  { %vm1660_vm6 = vweird.f32 %v5248_v45 }
 0x465   :  { %v1176_v13 = vpop.f32.mrf.mxu2 }
 0x466   :  { %v1183_v43 = vadd.f32 %v1176_v13, %v1107_v38  ;;  %v1406_v1 = vpop.f32.mrf.mxu3 }
 0x468   :  { %v1259_v27 = vadd.f32 %v1252_v49, %v1183_v43 }
 0x46d   :  { %v1178_v47 = vpop.f32.mrf.mxu2 }
 0x46e   :  { %v1551_v20 = vpop.f32.mrf.mxu3  ;;  %v1184_v48 = vadd.f32 %v1178_v47, %v1108_v3 }
 0x470   :  { %v1260_v18 = vadd.f32 %v1254_v54, %v1184_v48 }
 0x475   :  { %v1323_v51 = vpop.f32.mrf.mxu2 }
 0x476   :  { %v1333_v53 = vadd.f32 %v1323_v51, %v1257_v44  ;;  %v1553_v25 = vpop.f32.mrf.mxu3 }
 0x478   :  { %v1409_v32 = vadd.f32 %v1399_v11, %v1333_v53  ;;  %v1656_v53 = vmul.f32 32.0, %v5248_v45 }
 0x47d   :  { %v1325_v10 = vpop.f32.mrf.mxu2 }
 0x47e   :  { %v1334_v28 = vadd.f32 %v1325_v10, %v1258_v37 }
 0x47f   :  { %v1556_v12 = vpop.f32.mrf.mxu3 }
 0x480   :  { %v1410_v9 = vadd.f32 %v1401_v58, %v1334_v28 }
 0x485   :  { %v1328_v57 = vpop.f32.mrf.mxu2 }
 0x486   :  { %v1335_v29 = vadd.f32 %v1328_v57, %v1259_v27 }
 0x487   :  { %v1558_v13 = vpop.f32.mrf.mxu3 }
 0x488   :  { %v1411_v17 = vadd.f32 %v1404_v46, %v1335_v29 }
 0x48d   :  { %v1330_v60 = vpop.f32.mrf.mxu2 }
 0x48e   :  { %v1336_v30 = vadd.f32 %v1330_v60, %v1260_v18  ;;  %v1657_v60 = vsub.f32 1.0, %v1656_v53 }
 0x490   :  { %v1412_v40 = vadd.f32 %v1406_v1, %v1336_v30  ;;  %v1658_v62 = vmul.f32 %v5248_v45, %v1657_v60 }
 0x492   :  { %v1659_v1 = vadd.f32 %v5248_v45, %v1658_v62 }
 0x495   :  { %v1475_v61 = vpop.f32.mrf.mxu2 }
 0x496   :  { %v1485_v33 = vadd.f32 %v1475_v61, %v1409_v32  ;;  %v5120_v32 = vld [vmem:[%s6485_s6 + $0x10] sm:$0xff] }
 0x498   :  { %v1561_v15 = vadd.f32 %v1551_v20, %v1485_v33 }
 0x49d   :  { %v1477_v63 = vpop.f32.mrf.mxu2 }
 0x49e   :  { %v1486_v22 = vadd.f32 %v1477_v63, %v1410_v9 }
 0x4a0   :  { %v1562_v34 = vadd.f32 %v1553_v25, %v1486_v22 }
 0x4a5   :  { %v1480_v4 = vpop.f32.mrf.mxu2 }
 0x4a6   :  { %v1487_v36 = vadd.f32 %v1480_v4, %v1411_v17  ;;  %v1661_v4 = vsel %vm1660_vm6, %v5248_v45, %v1659_v1 }
 0x4a8   :  { %v1563_v41 = vadd.f32 %v1556_v12, %v1487_v36  ;;  %v5121_v12 = vld [vmem:[%s6485_s6 + $0x18] sm:$0xff] }
 0x4a9   :  { %1789 = vmatpush.bf16.msra.mxu0 %v5121_v12  ;;  %v2514_v12 = vld [vmem:[#allocation4 + $0x3c] sm:$0xf] }
 0x4ad   :  { %v1482_v55 = vpop.f32.mrf.mxu2  ;;  %1790 = vmatpush.bf16.msra.mxu0 %v5120_v32  ;;  %v5124_v32 = vld [vmem:[%s6485_s6 + $0x30] sm:$0xff] }
 0x4ae   :  { %v1488_v26 = vadd.f32 %v1482_v55, %v1412_v40 }
 0x4b0   :  { %v1564_v47 = vadd.f32 %v1558_v13, %v1488_v26 }
 0x4b5   :  { %v1627_v39 = vpop.f32.mrf.mxu2 }
 0x4b6   :  { %v5952_v44 = vadd.f32 %v1627_v39, %v1561_v15 }
 0x4b8   :  { %v1642_v49 = vsel %vm1641_vm5, %v5952_v44, 0.0 }
 0x4bd   :  { %v1629_v31 = vpop.f32.mrf.mxu2 }
 0x4be   :  { %v5950_v42 = vadd.f32 %v1629_v31, %v1562_v34 }
 0x4c0   :  { %v1643_v43 = vsel %vm1641_vm5, %v5950_v42, 0.0 }
 0x4c1   :  { %v1644_v54 = vadd.f32 %v1643_v43, %v1642_v49 }
 0x4c5   :  { %v1632_v38 = vpop.f32.mrf.mxu2 }
 0x4c6   :  { %v5954_v35 = vadd.f32 %v1632_v38, %v1563_v41  ;;  %v5983_v38 = vld [vmem:[%s6489_s10] sm:$0xff] }
 0x4c8   :  { %v1645_v51 = vsel %vm1641_vm5, %v5954_v35, 0.0 }
 0x4c9   :  { %v1646_v57 = vadd.f32 %v1645_v51, %v1644_v54 }
 0x4cd   :  { %v1634_v10 = vpop.f32.mrf.mxu2 }
 0x4ce   :  { %v5962_v11 = vadd.f32 %v1634_v10, %v1564_v47 }
 0x4d0   :  { %v1647_v58 = vsel %vm1641_vm5, %v5962_v11, 0.0 }
 0x4d1   :  { %v1648_v61 = vadd.f32 %v1647_v58, %v1646_v57 }
 0x4d3   :  { %v1649_v46 = vrot.slane %v1648_v61, 4 }
 0x4d5   :  { %v1650_v63 = vadd.f32 %v1649_v46, %v1648_v61 }
 0x4d7   :  { %v1651_v0 = vrot.slane %v1650_v63, 2 }
 0x4d9   :  { %v1652_v56 = vadd.f32 %v1651_v0, %v1650_v63 }
 0x4db   :  { %v1653_v2 = vrot.slane %v1652_v56, 1 }
 0x4dd   :  { %v1654_v6 = vadd.f32 %v1653_v2, %v1652_v56  ;;  %v1825_v56 = vld [vmem:[#allocation4 + $0x8] sm:$0xf]  ;;  %v1931_v2 = vld [vmem:[#allocation4 + $0x10] sm:$0xf] }
 0x4df   :  { %v1662_v7 = vmul.f32 %v1661_v4, %v1654_v6  ;;  %v2143_v6 = vld [vmem:[#allocation4 + $0x20] sm:$0xf] }
 0x4e1   :  { %v1663_v8 = vsub.f32 %v5952_v44, %v1662_v7  ;;  %v1664_v19 = vsub.f32 %v5950_v42, %v1662_v7  ;;  %v1665_v20 = vsub.f32 %v5954_v35, %v1662_v7  ;;  %v1666_v50 = vsub.f32 %v5962_v11, %v1662_v7 }
 0x4e3   :  { %v1667_v59 = vmul.f32 %v1663_v8, %v1663_v8  ;;  %v1668_v55 = vmul.f32 %v1664_v19, %v1664_v19  ;;  %v1669_v21 = vmul.f32 %v1665_v20, %v1665_v20  ;;  %v1670_v23 = vmul.f32 %v1666_v50, %v1666_v50  ;;  %v5119_v8 = vld [vmem:[%s6485_s6 + $0x8] sm:$0xff]  ;;  %v5118_v19 = vld [vmem:[%s6485_s6] sm:$0xff] }
 0x4e4   :  { %v5123_v20 = vld [vmem:[%s6485_s6 + $0x28] sm:$0xff]  ;;  %v5122_v50 = vld [vmem:[%s6485_s6 + $0x20] sm:$0xff] }
 0x4e5   :  { %v1671_v16 = vsel %vm1641_vm5, %v1667_v59, 0.0  ;;  %v1672_v24 = vsel %vm1641_vm5, %v1668_v55, 0.0  ;;  %v1674_v5 = vsel %vm1641_vm5, %v1669_v21, 0.0  ;;  %v1676_v39 = vsel %vm1641_vm5, %v1670_v23, 0.0  ;;  %1869 = vmatpush.bf16.msrb.mxu2 %v5123_v20 }
 0x4e6   :  { %v1673_v52 = vadd.f32 %v1672_v24, %v1671_v16 }
 0x4e8   :  { %v1675_v25 = vadd.f32 %v1674_v5, %v1673_v52 }
 0x4e9   :  { %1870 = vmatpush.bf16.msrb.mxu2 %v5122_v50  ;;  %v5141_v50 = vld [vmem:[%s6485_s6 + $0xb8] sm:$0xff] }
 0x4ea   :  { %v1677_v37 = vadd.f32 %v1676_v39, %v1675_v25  ;;  %v1878_v25 = vld [vmem:[#allocation4 + $0xc] sm:$0xf] }
 0x4ec   :  { %v1678_v3 = vrot.slane %v1677_v37, 4 }
 0x4ee   :  { %v1679_v27 = vadd.f32 %v1678_v3, %v1677_v37  ;;  %v1984_v37 = vld [vmem:[#allocation4 + $0x14] sm:$0xf]  ;;  %v2090_v3 = vld [vmem:[#allocation4 + $0x1c] sm:$0xf] }
 0x4f0   :  { %v1680_v28 = vrot.slane %v1679_v27, 2 }
 0x4f2   :  { %v1681_v48 = vadd.f32 %v1680_v28, %v1679_v27  ;;  %v2355_v27 = vld [vmem:[#allocation4 + $0x30] sm:$0xf]  ;;  %v2196_v28 = vld [vmem:[#allocation4 + $0x24] sm:$0xf] }
 0x4f4   :  { %v1682_v29 = vrot.slane %v1681_v48, 1 }
 0x4f6   :  { %v1683_v31 = vadd.f32 %v1682_v29, %v1681_v48  ;;  %v2461_v48 = vld [vmem:[#allocation4 + $0x38] sm:$0xf]  ;;  %v2302_v29 = vld [vmem:[#allocation4 + $0x2c] sm:$0xf] }
 0x4f8   :  { %v1684_v9 = vmul.f32 %v1683_v31, %v1661_v4  ;;  %v2037_v4 = vld [vmem:[#allocation4 + $0x18] sm:$0xf]  ;;  %v2408_v31 = vld [vmem:[#allocation4 + $0x34] sm:$0xf] }
 0x4fa   :  { %v1685_v18 = vadd.f32 1e-05, %v1684_v9  ;;  %v5125_v9 = vld [vmem:[%s6485_s6 + $0x38] sm:$0xff] }
 0x4fc   :  { %5249 = vrsqrt.f32 %v1685_v18  ;;  %vm1692_vm8 = vweird.f32 %v1685_v18 }
 0x502   :  { %v5250_v17 = vpop.eup %5249 }
 0x503   :  { %v1687_v22 = vmul.f32 %v5250_v17, %v1685_v18  ;;  %vm1693_vm7 = vweird.f32 %v5250_v17  ;;  %v5127_v18 = vld [vmem:[%s6485_s6 + $0x48] sm:$0xff] }
 0x504   :  { %vm1694_vm9 = vmor %vm1692_vm8, %vm1693_vm7  ;;  %1975 = vmatpush.bf16.msra.mxu2 %v5127_v18  ;;  %v5149_v18 = vld [vmem:[%s6485_s6 + $0xf8] sm:$0xff]  ;;  %vm3771_vm8 = vcmask 15360  }
 0x505   :  { %v1688_v30 = vmul.f32 %v5250_v17, %v1687_v22  ;;  %v5126_v22 = vld [vmem:[%s6485_s6 + $0x40] sm:$0xff] }
 0x507   :  { %v1689_v33 = vmul.f32 0.5, %v1688_v30 }
 0x508   :  { %1976 = vmatpush.bf16.msra.mxu2 %v5126_v22 }
 0x509   :  { %v1690_v36 = vsub.f32 1.5, %v1689_v33  ;;  %v5129_v33 = vld [vmem:[%s6485_s6 + $0x58] sm:$0xff] }
 0x50b   :  { %v1691_v14 = vmul.f32 %v5250_v17, %v1690_v36  ;;  %v5131_v36 = vld [vmem:[%s6485_s6 + $0x68] sm:$0xff] }
 0x50d   :  { %v1695_v34 = vsel %vm1694_vm9, %v5250_v17, %v1691_v14  ;;  %vm4007_vm9 = vcmask 1024  }
 0x50e   :  { %v1696_v40 = vmul.f32 %v5983_v38, %v1695_v34 }
 0x510   :  { %v1697_v15 = vmul.f32 %v1696_v40, %v1662_v7  ;;  %v1702_v41 = vperm.slane %v1696_v40, 2  ;;  %v2249_v7 = vld [vmem:[#allocation4 + $0x28] sm:$0xf] }
 0x512   :  { %v1699_v26 = vrot.slane %v1697_v15, 7  ;;  %v1703_v13 = vmul.f32 %v1702_v41, %v5952_v44  ;;  %v1704_v43 = vmul.f32 %v1702_v41, %v5950_v42  ;;  %v1705_v47 = vmul.f32 %v1702_v41, %v5954_v35  ;;  %v1722_v35 = vld [vmem:[#allocation4] sm:$0xf] }
 0x513   :  { %v1706_v49 = vmul.f32 %v1702_v41, %v5962_v11  ;;  %v1745_v11 = vld [vmem:[#allocation4 + $0x4] sm:$0xf]  ;;  %v5128_v41 = vld [vmem:[%s6485_s6 + $0x50] sm:$0xff] }
 0x514   :  { %v1701_v45 = vsub.f32 %v5983_v38, %v1699_v26 }
 0x516   :  { %v1707_v51 = vperm.slane %v1701_v45, 3  ;;  %v5130_v45 = vld [vmem:[%s6485_s6 + $0x60] sm:$0xff] }
 0x518   :  { %v1708_v53 = vadd.f32 %v1707_v51, %v1703_v13  ;;  %v1709_v54 = vadd.f32 %v1707_v51, %v1704_v43  ;;  %v1710_v10 = vadd.f32 %v1707_v51, %v1705_v47  ;;  %v1711_v57 = vadd.f32 %v1707_v51, %v1706_v49  ;;  %v5135_v47 = vld [vmem:[%s6485_s6 + $0x88] sm:$0xff] }
 0x51a   :  { %v1714_v58 = vmul.f32 0.2, %v1710_v10  ;;  %v1712_v60 = vmul.f32 0.2, %v1708_v53  ;;  %v1713_v61 = vmul.f32 0.2, %v1709_v54 }
 0x51b   :  { %v1715_v46 = vmul.f32 0.2, %v1711_v57 }
 0x51c   :  { %v1718_v62 = vmax.f32 %v1710_v10, %v1714_v58  ;;  %v1716_v0 = vmax.f32 %v1708_v53, %v1712_v60  ;;  %v1717_v1 = vmax.f32 %v1709_v54, %v1713_v61  ;;  %v5133_v10 = vld [vmem:[%s6485_s6 + $0x78] sm:$0xff]  ;;  %v5134_v61 = vld [vmem:[%s6485_s6 + $0x80] sm:$0xff] }
 0x51d   :  { %v1719_v63 = vmax.f32 %v1711_v57, %v1715_v46 }
 0x51e   :  { %v5996_v42 = vpack.c.bf16 %v1717_v1, %v1716_v0  ;;  %v5139_v0 = vld [vmem:[%s6485_s6 + $0xa8] sm:$0xff] }
 0x51f   :  { %v5991_v44 = vpack.c.bf16 %v1719_v63, %v1718_v62  ;;  %v5132_v62 = vld [vmem:[%s6485_s6 + $0x70] sm:$0xff] }
 0x521   :  { %1732 = vmatpush.bf16.msrb.mxu1 %v5991_v44  ;;  %1755 = vmatpush.bf16.msrb.mxu3 %v5991_v44 }
 0x522   :  { %1888 = vmatpush.bf16.msrb.mxu0 %v5991_v44 }
 0x525   :  { %1733 = vmatpush.bf16.msrb.mxu1 %v5996_v42  ;;  %1756 = vmatpush.bf16.msrb.mxu3 %v5996_v42 }
 0x526   :  { %1889 = vmatpush.bf16.msrb.mxu0 %v5996_v42 }
 0x528   :  { %4343 = vmatmul.msk.bf16.vlgmr.msrb.gmra.mxu1 %vm1641_vm5, %v1722_v35  ;;  %4344 = vmatmul.msk.bf16.vlgmr.msrb.gmra.mxu3 %vm1641_vm5, %v1745_v11  ;;  %v5137_v35 = vld [vmem:[%s6485_s6 + $0x98] sm:$0xff] }
 0x529   :  { %1835 = vmatpush.bf16.msra.mxu1 %v5991_v44  ;;  %1817 = vmatpush.bf16.msra.mxu3 %v5119_v8  ;;  %v5143_v8 = vld [vmem:[%s6485_s6 + $0xc8] sm:$0xff] }
 0x52d   :  { %1836 = vmatpush.bf16.msra.mxu1 %v5996_v42  ;;  %1818 = vmatpush.bf16.msra.mxu3 %v5118_v19 }
 0x531   :  { %1941 = vmatpush.bf16.msrb.mxu1 %v5991_v44  ;;  %1922 = vmatpush.bf16.msrb.mxu3 %v5125_v9 }
 0x535   :  { %1942 = vmatpush.bf16.msrb.mxu1 %v5996_v42  ;;  %1923 = vmatpush.bf16.msrb.mxu3 %v5124_v32  ;;  %v5148_v32 = vld [vmem:[%s6485_s6 + $0xf0] sm:$0xff] }
 0x538   :  { %4367 = vmatmul.msk.bf16.vlgmr.msra.gmra.mxu1 %vm1641_vm5, %v1825_v56 }
 0x539   :  { %2047 = vmatpush.bf16.msra.mxu1 %v5991_v44 }
 0x53d   :  { %2048 = vmatpush.bf16.msra.mxu1 %v5996_v42 }
 0x548   :  { %4395 = vmatmul.msk.bf16.vlgmr.msrb.gmra.mxu1 %vm1641_vm5, %v1931_v2  ;;  %v5138_v2 = vld [vmem:[%s6485_s6 + $0xa0] sm:$0xff] }
 0x549   :  { %2153 = vmatpush.bf16.msrb.mxu1 %v5991_v44 }
 0x54d   :  { %2154 = vmatpush.bf16.msrb.mxu1 %v5996_v42 }
 0x558   :  { %4423 = vmatmul.msk.bf16.vlgmr.msra.gmra.mxu1 %vm1641_vm5, %v2037_v4 }
 0x559   :  { %2259 = vmatpush.bf16.msra.mxu1 %v5991_v44 }
 0x55d   :  { %2260 = vmatpush.bf16.msra.mxu1 %v5996_v42 }
 0x568   :  { %4451 = vmatmul.msk.bf16.vlgmr.msrb.gmra.mxu1 %vm1641_vm5, %v2143_v6  ;;  %v5136_v6 = vld [vmem:[%s6485_s6 + $0x90] sm:$0xff] }
 0x569   :  { %2365 = vmatpush.bf16.msrb.mxu1 %v5991_v44 }
 0x56d   :  { %2366 = vmatpush.bf16.msrb.mxu1 %v5996_v42 }
 0x578   :  { %4479 = vmatmul.msk.bf16.vlgmr.msra.gmra.mxu1 %vm1641_vm5, %v2249_v7 }
 0x579   :  { %2471 = vmatpush.bf16.msra.mxu1 %v5991_v44 }
 0x57d   :  { %2472 = vmatpush.bf16.msra.mxu1 %v5996_v42 }
 0x588   :  { %4507 = vmatmul.msk.bf16.vlgmr.msrb.gmra.mxu1 %vm1641_vm5, %v2355_v27 }
 0x598   :  { %4535 = vmatmul.msk.bf16.vlgmr.msra.gmra.mxu1 %vm1641_vm5, %v2461_v48  ;;  %v5144_v48 = vld [vmem:[%s6485_s6 + $0xd0] sm:$0xff] }
 0x5a5   :  { %v1735_v59 = vpop.f32.mrf.mxu1 }
 0x5a6   :  { %v1739_v55 = vpack.c.bf16 %v1735_v59, %v1735_v59 }
 0x5a8   :  { %4366 = vmatmul.msk.bf16.vlgmr.msra.gmra.mxu3 %vm1641_vm5, %v1739_v55  ;;  %v5142_v55 = vld [vmem:[%s6485_s6 + $0xc0] sm:$0xff] }
 0x5a9   :  { %2028 = vmatpush.bf16.msra.mxu3 %v5129_v33 }
 0x5ab   :  { %v1758_v21 = vpop.f32.mrf.mxu3 }
 0x5ac   :  { %v1762_v23 = vpack.c.bf16 %v1758_v21, %v1758_v21 }
 0x5ad   :  { %v1737_v16 = vpop.f32.mrf.mxu1  ;;  %2029 = vmatpush.bf16.msra.mxu3 %v5128_v41 }
 0x5ae   :  { %4357 = vmatmul.msk.bf16.vlgmr.msra.gmra.mxu0 %vm1641_vm5, %v1762_v23  ;;  %v5140_v16 = vld [vmem:[%s6485_s6 + $0xb0] sm:$0xff] }
 0x5af   :  { %1994 = vmatpush.bf16.msra.mxu0 %v5991_v44 }
 0x5b3   :  { %1995 = vmatpush.bf16.msra.mxu0 %v5996_v42  ;;  %v1760_v24 = vpop.f32.mrf.mxu3 }
 0x5b5   :  { %v1838_v52 = vpop.f32.mrf.mxu1 }
 0x5b6   :  { %v1842_v5 = vpack.c.bf16 %v1838_v52, %v1838_v52  ;;  %v5147_v52 = vld [vmem:[%s6485_s6 + $0xe8] sm:$0xff] }
 0x5b8   :  { %4380 = vmatmul.msk.bf16.vlgmr.msrb.gmra.mxu2 %vm1641_vm5, %v1842_v5 }
 0x5b9   :  { %2081 = vmatpush.bf16.msrb.mxu2 %v5131_v36 }
 0x5bd   :  { %v1840_v39 = vpop.f32.mrf.mxu1  ;;  %2082 = vmatpush.bf16.msrb.mxu2 %v5130_v45 }
 0x5be   :  { %4381 = vmatmul.msk.bf16.vlgmr.msrb.gmra.mxu0 %vm1641_vm5, %v1878_v25  ;;  %v5145_v39 = vld [vmem:[%s6485_s6 + $0xd8] sm:$0xff] }
 0x5bf   :  { %2100 = vmatpush.bf16.msrb.mxu0 %v5991_v44 }
 0x5c3   :  { %2101 = vmatpush.bf16.msrb.mxu0 %v5996_v42 }
 0x5c5   :  { %v1944_v17 = vpop.f32.mrf.mxu1 }
 0x5c6   :  { %v1948_v30 = vpack.c.bf16 %v1944_v17, %v1944_v17 }
 0x5c8   :  { %4408 = vmatmul.msk.bf16.vlgmr.msra.gmra.mxu2 %vm1641_vm5, %v1948_v30 }
 0x5c9   :  { %2187 = vmatpush.bf16.msra.mxu2 %v5135_v47 }
 0x5cd   :  { %v1946_v14 = vpop.f32.mrf.mxu1  ;;  %2188 = vmatpush.bf16.msra.mxu2 %v5134_v61 }
 0x5ce   :  { %4409 = vmatmul.msk.bf16.vlgmr.msra.gmra.mxu0 %vm1641_vm5, %v1984_v37 }
 0x5cf   :  { %2206 = vmatpush.bf16.msra.mxu0 %v5991_v44 }
 0x5d3   :  { %2207 = vmatpush.bf16.msra.mxu0 %v5996_v42 }
 0x5d5   :  { %v2050_v26 = vpop.f32.mrf.mxu1 }
 0x5d6   :  { %v2054_v13 = vpack.c.bf16 %v2050_v26, %v2050_v26 }
 0x5d8   :  { %4436 = vmatmul.msk.bf16.vlgmr.msrb.gmra.mxu2 %vm1641_vm5, %v2054_v13 }
 0x5d9   :  { %2293 = vmatpush.bf16.msrb.mxu2 %v5139_v0 }
 0x5dd   :  { %v2052_v51 = vpop.f32.mrf.mxu1  ;;  %2294 = vmatpush.bf16.msrb.mxu2 %v5138_v2 }
 0x5de   :  { %4437 = vmatmul.msk.bf16.vlgmr.msrb.gmra.mxu0 %vm1641_vm5, %v2090_v3  ;;  %v5146_v3 = vld [vmem:[%s6485_s6 + $0xe0] sm:$0xff] }
 0x5df   :  { %2312 = vmatpush.bf16.msrb.mxu0 %v5991_v44 }
 0x5e3   :  { %2313 = vmatpush.bf16.msrb.mxu0 %v5996_v42 }
 0x5e5   :  { %v2156_v60 = vpop.f32.mrf.mxu1 }
 0x5e6   :  { %v2160_v46 = vpack.c.bf16 %v2156_v60, %v2156_v60 }
 0x5e8   :  { %4464 = vmatmul.msk.bf16.vlgmr.msra.gmra.mxu2 %vm1641_vm5, %v2160_v46 }
 0x5e9   :  { %2399 = vmatpush.bf16.msra.mxu2 %v5143_v8  ;;  %v5344_v8 = vmov 8.0  }
 0x5ea   :  { %5251 = vrcp.f32 %v5344_v8  ;;  %v4824_v8 = vld [vmem:[%s6486_s7 + $0xa] sm:$0x1] }
 0x5ed   :  { %2400 = vmatpush.bf16.msra.mxu2 %v5142_v55 }
 0x5ee   :  { %4465 = vmatmul.msk.bf16.vlgmr.msra.gmra.mxu0 %vm1641_vm5, %v2196_v28 }
 0x5ef   :  { %2418 = vmatpush.bf16.msra.mxu0 %v5991_v44 }
 0x5f3   :  { %2419 = vmatpush.bf16.msra.mxu0 %v5996_v42 }
 0x5fe   :  { %4493 = vmatmul.msk.bf16.vlgmr.msrb.gmra.mxu0 %vm1641_vm5, %v2302_v29 }
 0x5ff   :  { %2524 = vmatpush.bf16.msrb.mxu0 %v5991_v44  ;;  %v2158_v44 = vpop.f32.mrf.mxu1 }
 0x603   :  { %2525 = vmatpush.bf16.msrb.mxu0 %v5996_v42 }
 0x607   :  { %v2262_v56 = vpop.f32.mrf.mxu1 }
 0x608   :  { %v2266_v4 = vpack.c.bf16 %v2262_v56, %v2262_v56 }
 0x60a   :  { %4492 = vmatmul.msk.bf16.vlgmr.msrb.gmra.mxu2 %vm1641_vm5, %v2266_v4 }
 0x60b   :  { %2505 = vmatpush.bf16.msrb.mxu2 %v5147_v52 }
 0x60e   :  { %4521 = vmatmul.msk.bf16.vlgmr.msra.gmra.mxu0 %vm1641_vm5, %v2408_v31 }
 0x60f   :  { %v2264_v19 = vpop.f32.mrf.mxu1  ;;  %2506 = vmatpush.bf16.msrb.mxu2 %v5146_v3 }
 0x617   :  { %v2368_v21 = vpop.f32.mrf.mxu1 }
 0x618   :  { %v2372_v23 = vpack.c.bf16 %v2368_v21, %v2368_v21 }
 0x61a   :  { %4520 = vmatmul.msk.bf16.vlgmr.msra.gmra.mxu2 %vm1641_vm5, %v2372_v23 }
 0x61e   :  { %4549 = vmatmul.msk.bf16.vlgmr.msrb.gmra.mxu0 %vm1641_vm5, %v2514_v12 }
 0x61f   :  { %v2370_v5 = vpop.f32.mrf.mxu1 }
 0x627   :  { %v2474_v27 = vpop.f32.mrf.mxu1 }
 0x628   :  { %v2478_v28 = vpack.c.bf16 %v2474_v27, %v2474_v27 }
 0x62a   :  { %4548 = vmatmul.msk.bf16.vlgmr.msrb.gmra.mxu2 %vm1641_vm5, %v2478_v28 }
 0x62b   :  { %v1792_v34 = vpop.f32.mrf.mxu0  ;;  %v1820_v40 = vpop.f32.mrf.mxu3 }
 0x62c   :  { %v1821_v15 = vadd.f32 %v1820_v40, %v1792_v34 }
 0x62f   :  { %v2476_v31 = vpop.f32.mrf.mxu1 }
 0x633   :  { %v1794_v43 = vpop.f32.mrf.mxu0  ;;  %v1822_v49 = vpop.f32.mrf.mxu3 }
 0x63b   :  { %v1872_v53 = vpop.f32.mrf.mxu2  ;;  %v1891_v54 = vpop.f32.mrf.mxu0 }
 0x63c   :  { %v6090_v57 = vadd.f32 %v1872_v53, %v1821_v15  ;;  %v1895_v58 = vpack.c.bf16 %v1891_v54, %v1891_v54 }
 0x63e   :  { %4394 = vmatmul.msk.bf16.vlgmr.msrb.gmra.mxu3 %vm1641_vm5, %v1895_v58 }
 0x63f   :  { %2134 = vmatpush.bf16.msrb.mxu3 %v5133_v10 }
 0x643   :  { %v1893_v63 = vpop.f32.mrf.mxu0  ;;  %2135 = vmatpush.bf16.msrb.mxu3 %v5132_v62  ;;  %v1874_v1 = vpop.f32.mrf.mxu2 }
 0x64b   :  { %v1997_v42 = vpop.f32.mrf.mxu0  ;;  %v1978_v40 = vpop.f32.mrf.mxu2 }
 0x64c   :  { %v2001_v11 = vpack.c.bf16 %v1997_v42, %v1997_v42 }
 0x64e   :  { %4422 = vmatmul.msk.bf16.vlgmr.msra.gmra.mxu3 %vm1641_vm5, %v2001_v11 }
 0x64f   :  { %2240 = vmatpush.bf16.msra.mxu3 %v5137_v35 }
 0x653   :  { %v1999_v7 = vpop.f32.mrf.mxu0  ;;  %2241 = vmatpush.bf16.msra.mxu3 %v5136_v6  ;;  %v1980_v15 = vpop.f32.mrf.mxu2 }
 0x65b   :  { %v2103_v20 = vpop.f32.mrf.mxu0  ;;  %v2084_v41 = vpop.f32.mrf.mxu2 }
 0x65c   :  { %v2107_v59 = vpack.c.bf16 %v2103_v20, %v2103_v20 }
 0x65e   :  { %4450 = vmatmul.msk.bf16.vlgmr.msrb.gmra.mxu3 %vm1641_vm5, %v2107_v59  ;;  %v5252_v59 = vpop.eup %5251 }
 0x65f   :  { %2346 = vmatpush.bf16.msrb.mxu3 %v5141_v50  ;;  %v2575_v21 = vmul.f32 8.0, %v5252_v59  ;;  %vm2579_vm11 = vweird.f32 %v5252_v59 }
 0x661   :  { %v2576_v52 = vsub.f32 1.0, %v2575_v21  ;;  %v5159_v21 = vld [vmem:[%s6487_s8 + $0x48] sm:$0xff] }
 0x663   :  { %v2105_v24 = vpop.f32.mrf.mxu0  ;;  %2347 = vmatpush.bf16.msrb.mxu3 %v5140_v16  ;;  %v2086_v26 = vpop.f32.mrf.mxu2 }
 0x664   :  { %v5156_v26 = vld [vmem:[%s6487_s8 + $0x30] sm:$0xff] }
 0x66b   :  { %v2209_v25 = vpop.f32.mrf.mxu0  ;;  %v2190_v47 = vpop.f32.mrf.mxu2 }
 0x66c   :  { %v2213_v37 = vpack.c.bf16 %v2209_v25, %v2209_v25 }
 0x66e   :  { %4478 = vmatmul.msk.bf16.vlgmr.msra.gmra.mxu3 %vm1641_vm5, %v2213_v37 }
 0x66f   :  { %2452 = vmatpush.bf16.msra.mxu3 %v5145_v39  ;;  %v2577_v39 = vmul.f32 %v5252_v59, %v2576_v52 }
 0x671   :  { %v2578_v28 = vadd.f32 %v5252_v59, %v2577_v39 }
 0x673   :  { %v2211_v29 = vpop.f32.mrf.mxu0  ;;  %2453 = vmatpush.bf16.msra.mxu3 %v5144_v48  ;;  %v2192_v51 = vpop.f32.mrf.mxu2  ;;  %v2580_v31 = vsel %vm2579_vm11, %v5252_v59, %v2578_v28  ;;  %v5150_v59 = vld [vmem:[%s6487_s8] sm:$0xff] }
 0x67b   :  { %v2315_v9 = vpop.f32.mrf.mxu0 }
 0x67c   :  { %v2319_v12 = vpack.c.bf16 %v2315_v9, %v2315_v9 }
 0x67e   :  { %4506 = vmatmul.msk.bf16.vlgmr.msrb.gmra.mxu3 %vm1641_vm5, %v2319_v12 }
 0x67f   :  { %2558 = vmatpush.bf16.msrb.mxu3 %v5149_v18 }
 0x683   :  { %v2317_v17 = vpop.f32.mrf.mxu0  ;;  %2559 = vmatpush.bf16.msrb.mxu3 %v5148_v32 }
 0x68b   :  { %v2421_v22 = vpop.f32.mrf.mxu0 }
 0x68c   :  { %v2425_v30 = vpack.c.bf16 %v2421_v22, %v2421_v22 }
 0x68d   :  { %v2296_v58 = vpop.f32.mrf.mxu2 }
 0x68e   :  { %4534 = vmatmul.msk.bf16.vlgmr.msra.gmra.mxu3 %vm1641_vm5, %v2425_v30 }
 0x693   :  { %v2423_v33 = vpop.f32.mrf.mxu0 }
 0x695   :  { %v2298_v61 = vpop.f32.mrf.mxu2 }
 0x69b   :  { %v2527_v36 = vpop.f32.mrf.mxu0 }
 0x69c   :  { %v2531_v14 = vpack.c.bf16 %v2527_v36, %v2527_v36 }
 0x69d   :  { %v2402_v0 = vpop.f32.mrf.mxu2 }
 0x69e   :  { %4562 = vmatmul.msk.bf16.vlgmr.msrb.gmra.mxu3 %vm1641_vm5, %v2531_v14 }
 0x6a3   :  { %v2529_v34 = vpop.f32.mrf.mxu0 }
 0x6a5   :  { %v2404_v44 = vpop.f32.mrf.mxu2 }
 0x6c1   :  { %v1925_v45 = vpop.f32.mrf.mxu3 }
 0x6c2   :  { %v1929_v13 = vadd.f32 %v1925_v45, %v6090_v57  ;;  %v2508_v57 = vpop.f32.mrf.mxu2  ;;  %v5155_v45 = vld [vmem:[%s6487_s8 + $0x28] sm:$0xff] }
 0x6c4   :  { %v1982_v43 = vadd.f32 %v1978_v40, %v1929_v13 }
 0x6c9   :  { %v1927_v49 = vpop.f32.mrf.mxu3 }
 0x6ca   :  { %v2510_v2 = vpop.f32.mrf.mxu2  ;;  %v5154_v49 = vld [vmem:[%s6487_s8 + $0x20] sm:$0xff] }
 0x6cb   :  { %v4662_v2 = vld [vmem:[%s6486_s7 + $0x4] sm:$0x1] }
 0x6d1   :  { %v2031_v53 = vpop.f32.mrf.mxu3 }
 0x6d2   :  { %v2035_v54 = vadd.f32 %v2031_v53, %v1982_v43 }
 0x6d4   :  { %v2088_v10 = vadd.f32 %v2084_v41, %v2035_v54  ;;  %v5157_v41 = vld [vmem:[%s6487_s8 + $0x38] sm:$0xff] }
 0x6d5   :  { %2706 = vmatpush.bf16.msra.mxu0 %v5157_v41  ;;  %v5166_v41 = vld [vmem:[%s6487_s8 + $0x80] sm:$0xff] }
 0x6d9   :  { %v2033_v60 = vpop.f32.mrf.mxu3  ;;  %2707 = vmatpush.bf16.msra.mxu0 %v5156_v26 }
 0x6dd   :  { %2708 = vmatpush.bf16.msra.mxu0 %v5155_v45  ;;  %v5173_v45 = vld [vmem:[%s6487_s8 + $0xb8] sm:$0xff] }
 0x6e1   :  { %v2137_v46 = vpop.f32.mrf.mxu3  ;;  %2709 = vmatpush.bf16.msra.mxu0 %v5154_v49 }
 0x6e2   :  { %v2141_v62 = vadd.f32 %v2137_v46, %v2088_v10 }
 0x6e4   :  { %v2194_v63 = vadd.f32 %v2190_v47, %v2141_v62 }
 0x6e9   :  { %v2139_v1 = vpop.f32.mrf.mxu3 }
 0x6f1   :  { %v2243_v42 = vpop.f32.mrf.mxu3 }
 0x6f2   :  { %v2247_v35 = vadd.f32 %v2243_v42, %v2194_v63 }
 0x6f4   :  { %v2300_v11 = vadd.f32 %v2296_v58, %v2247_v35 }
 0x6f9   :  { %v2245_v56 = vpop.f32.mrf.mxu3 }
 0x6fa   :  { %v4608_v56 = vld [vmem:[%s6486_s7 + $0x2] sm:$0x1] }
 0x701   :  { %v2349_v4 = vpop.f32.mrf.mxu3 }
 0x702   :  { %v2353_v19 = vadd.f32 %v2349_v4, %v2300_v11  ;;  %v4716_v4 = vld [vmem:[%s6486_s7 + $0x6] sm:$0x1] }
 0x704   :  { %v2406_v50 = vadd.f32 %v2402_v0, %v2353_v19  ;;  %v5152_v19 = vld [vmem:[%s6487_s8 + $0x10] sm:$0xff] }
 0x709   :  { %v2351_v6 = vpop.f32.mrf.mxu3 }
 0x70a   :  { %v5153_v6 = vld [vmem:[%s6487_s8 + $0x18] sm:$0xff] }
 0x70b   :  { %2746 = vmatpush.bf16.msra.mxu3 %v5153_v6  ;;  %v5182_v6 = vld [vmem:[%s6487_s8 + $0x100] sm:$0xff] }
 0x70f   :  { %2747 = vmatpush.bf16.msra.mxu3 %v5152_v19  ;;  %v5180_v19 = vld [vmem:[%s6487_s8 + $0xf0] sm:$0xff] }
 0x711   :  { %v2455_v7 = vpop.f32.mrf.mxu3 }
 0x712   :  { %v2459_v55 = vadd.f32 %v2455_v7, %v2406_v50  ;;  %v4770_v7 = vld [vmem:[%s6486_s7 + $0x8] sm:$0x1] }
 0x713   :  { %v5151_v50 = vld [vmem:[%s6487_s8 + $0x8] sm:$0xff] }
 0x714   :  { %v2512_v23 = vadd.f32 %v2508_v57, %v2459_v55  ;;  %v2616_v57 = vld [vmem:[%s6486_s7] sm:$0x1]  ;;  %2748 = vmatpush.bf16.msra.mxu3 %v5151_v50  ;;  %v5160_v55 = vld [vmem:[%s6487_s8 + $0x50] sm:$0xff]  ;;  %v5179_v50 = vld [vmem:[%s6487_s8 + $0xe8] sm:$0xff] }
 0x718   :  { %2749 = vmatpush.bf16.msra.mxu3 %v5150_v59  ;;  %v5192_v59 = vld [vmem:[%s6487_s8 + $0x150] sm:$0xff] }
 0x719   :  { %v2457_v20 = vpop.f32.mrf.mxu3 }
 0x71a   :  { %v5161_v20 = vld [vmem:[%s6487_s8 + $0x58] sm:$0xff] }
 0x721   :  { %v2561_v16 = vpop.f32.mrf.mxu3 }
 0x722   :  { %v2565_v24 = vadd.f32 %v2561_v16, %v2512_v23  ;;  %v5158_v23 = vld [vmem:[%s6487_s8 + $0x40] sm:$0xff] }
 0x724   :  { %v2567_v5 = vsel %vm2566_vm10, %v2565_v24, 0.0 }
 0x725   :  { %v2568_v25 = vrot.slane %v2567_v5, 4 }
 0x727   :  { %v2569_v37 = vadd.f32 %v2568_v25, %v2567_v5 }
 0x729   :  { %v2570_v3 = vrot.slane %v2569_v37, 2  ;;  %v2563_v27 = vpop.f32.mrf.mxu3 }
 0x72a   :  { %v4635_v27 = vld [vmem:[%s6486_s7 + $0x3] sm:$0x1] }
 0x72b   :  { %v2571_v48 = vadd.f32 %v2570_v3, %v2569_v37 }
 0x72d   :  { %v2572_v29 = vrot.slane %v2571_v48, 1 }
 0x72f   :  { %v2573_v9 = vadd.f32 %v2572_v29, %v2571_v48  ;;  %v4689_v48 = vld [vmem:[%s6486_s7 + $0x5] sm:$0x1]  ;;  %v4743_v29 = vld [vmem:[%s6486_s7 + $0x7] sm:$0x1] }
 0x731   :  { %v2581_v18 = vmul.f32 %v2580_v31, %v2573_v9  ;;  %v4797_v9 = vld [vmem:[%s6486_s7 + $0x9] sm:$0x1] }
 0x733   :  { %v2582_v12 = vsub.f32 %v2565_v24, %v2581_v18 }
 0x735   :  { %v2583_v32 = vmul.f32 %v2582_v12, %v2582_v12  ;;  %v4851_v12 = vld [vmem:[%s6486_s7 + $0xb] sm:$0x1] }
 0x737   :  { %v2584_v17 = vsel %vm2566_vm10, %v2583_v32, 0.0  ;;  %v4905_v32 = vld [vmem:[%s6486_s7 + $0xd] sm:$0x1] }
 0x738   :  { %v2585_v22 = vrot.slane %v2584_v17, 4 }
 0x73a   :  { %v2586_v30 = vadd.f32 %v2585_v22, %v2584_v17  ;;  %v5165_v17 = vld [vmem:[%s6487_s8 + $0x78] sm:$0xff] }
 0x73b   :  { %v5169_v22 = vld [vmem:[%s6487_s8 + $0x98] sm:$0xff]  ;;  %2883 = vmatpush.bf16.msrb.mxu3 %v5165_v17 }
 0x73c   :  { %v2587_v33 = vrot.slane %v2586_v30, 2 }
 0x73e   :  { %v2588_v36 = vadd.f32 %v2587_v33, %v2586_v30  ;;  %v5164_v30 = vld [vmem:[%s6487_s8 + $0x70] sm:$0xff] }
 0x73f   :  { %v5168_v33 = vld [vmem:[%s6487_s8 + $0x90] sm:$0xff]  ;;  %2884 = vmatpush.bf16.msrb.mxu3 %v5164_v30 }
 0x740   :  { %v2589_v14 = vrot.slane %v2588_v36, 1 }
 0x742   :  { %v2590_v34 = vadd.f32 %v2589_v14, %v2588_v36  ;;  %v5163_v36 = vld [vmem:[%s6487_s8 + $0x68] sm:$0xff] }
 0x743   :  { %v5167_v14 = vld [vmem:[%s6487_s8 + $0x88] sm:$0xff]  ;;  %2885 = vmatpush.bf16.msrb.mxu3 %v5163_v36  ;;  %v5209_v36 = vld [vmem:[%s6487_s8 + $0x1d8] sm:$0xff] }
 0x744   :  { %v2591_v40 = vmul.f32 %v2590_v34, %v2580_v31  ;;  %v4878_v31 = vld [vmem:[%s6486_s7 + $0xc] sm:$0x1]  ;;  %v4959_v34 = vld [vmem:[%s6486_s7 + $0xf] sm:$0x1] }
 0x746   :  { %v2592_v15 = vadd.f32 1e-05, %v2591_v40  ;;  %v5162_v40 = vld [vmem:[%s6487_s8 + $0x60] sm:$0xff] }
 0x747   :  { %2886 = vmatpush.bf16.msrb.mxu3 %v5162_v40  ;;  %v5195_v40 = vld [vmem:[%s6487_s8 + $0x168] sm:$0xff] }
 0x748   :  { %5253 = vrsqrt.f32 %v2592_v15  ;;  %vm2599_vm13 = vweird.f32 %v2592_v15 }
 0x74e   :  { %v5254_v13 = vpop.eup %5253 }
 0x74f   :  { %v2594_v43 = vmul.f32 %v5254_v13, %v2592_v15  ;;  %vm2600_vm12 = vweird.f32 %v5254_v13 }
 0x750   :  { %vm2601_vm14 = vmor %vm2599_vm13, %vm2600_vm12 }
 0x751   :  { %v2595_v47 = vmul.f32 %v5254_v13, %v2594_v43  ;;  %v5172_v43 = vld [vmem:[%s6487_s8 + $0xb0] sm:$0xff] }
 0x753   :  { %v2596_v51 = vmul.f32 0.5, %v2595_v47  ;;  %v5176_v47 = vld [vmem:[%s6487_s8 + $0xd0] sm:$0xff] }
 0x755   :  { %v2597_v53 = vsub.f32 1.5, %v2596_v51  ;;  %v5171_v51 = vld [vmem:[%s6487_s8 + $0xa8] sm:$0xff] }
 0x757   :  { %v2598_v54 = vmul.f32 %v5254_v13, %v2597_v53  ;;  %v5175_v53 = vld [vmem:[%s6487_s8 + $0xc8] sm:$0xff] }
 0x759   :  { %v2602_v10 = vsel %vm2601_vm14, %v5254_v13, %v2598_v54  ;;  %v5177_v13 = vld [vmem:[%s6487_s8 + $0xd8] sm:$0xff] }
 0x75a   :  { %v2603_v58 = vmul.f32 %v5983_v38, %v2602_v10 }
 0x75c   :  { %v2604_v60 = vmul.f32 %v2603_v58, %v2581_v18  ;;  %v2609_v46 = vperm.slane %v2603_v58, 4  ;;  %v4932_v18 = vld [vmem:[%s6486_s7 + $0xe] sm:$0x1] }
 0x75e   :  { %v2606_v61 = vrot.slane %v2604_v60, 7  ;;  %v2610_v63 = vmul.f32 %v2609_v46, %v2565_v24  ;;  %v5170_v60 = vld [vmem:[%s6487_s8 + $0xa0] sm:$0xff] }
 0x75f   :  { %v5174_v46 = vld [vmem:[%s6487_s8 + $0xc0] sm:$0xff] }
 0x760   :  { %v2608_v62 = vsub.f32 %v5983_v38, %v2606_v61  ;;  %v4564_v38 = vld [vmem:[%s6486_s7 + $0x1] sm:$0x1] }
 0x762   :  { %v2611_v0 = vperm.slane %v2608_v62, 5 }
 0x764   :  { %v2612_v1 = vadd.f32 %v2611_v0, %v2610_v63  ;;  %v5185_v63 = vld [vmem:[%s6487_s8 + $0x118] sm:$0xff] }
 0x766   :  { %v2613_v44 = vmul.f32 0.2, %v2612_v1 }
 0x768   :  { %v2614_v42 = vmax.f32 %v2612_v1, %v2613_v44  ;;  %v5184_v1 = vld [vmem:[%s6487_s8 + $0x110] sm:$0xff] }
 0x76a   :  { %v2615_v35 = vpack.c.bf16 %v2614_v42, %v2614_v42 }
 0x76c   :  { %v6169_v11 = vsel %vm2621_vm15, %v2615_v35, 0  ;;  %v5183_v35 = vld [vmem:[%s6487_s8 + $0x108] sm:$0xff] }
 0x76d   :  { %2632 = vmatpush.bf16.msrb.mxu1 %v6169_v11  ;;  %2659 = vmatpush.bf16.msra.mxu2 %v6169_v11 }
 0x76e   :  { %2836 = vmatpush.bf16.msrb.mxu0 %v6169_v11 }
 0x770   :  { %4563 = vmatmul.msk.bf16.vlgmr.msrb.gmra.mxu1 %vm2617_vm0, %v2616_v57  ;;  %4565 = vmatmul.msk.bf16.vlgmr.msra.gmra.mxu2 %vm2617_vm0, %v4564_v38  ;;  %v5181_v38 = vld [vmem:[%s6487_s8 + $0xf8] sm:$0xff] }
 0x771   :  { %2767 = vmatpush.bf16.msra.mxu1 %v6169_v11  ;;  %2814 = vmatpush.bf16.msrb.mxu2 %v5161_v20 }
 0x775   :  { %2905 = vmatpush.bf16.msrb.mxu1 %v6169_v11  ;;  %2815 = vmatpush.bf16.msrb.mxu2 %v5160_v55 }
 0x779   :  { %2816 = vmatpush.bf16.msrb.mxu2 %v5159_v21 }
 0x77d   :  { %2817 = vmatpush.bf16.msrb.mxu2 %v5158_v23  ;;  %v5191_v23 = vld [vmem:[%s6487_s8 + $0x148] sm:$0xff] }
 0x780   :  { %4609 = vmatmul.msk.bf16.vlgmr.msra.gmra.mxu1 %vm2617_vm0, %v4608_v56 }
 0x781   :  { %3043 = vmatpush.bf16.msra.mxu1 %v6169_v11  ;;  %2952 = vmatpush.bf16.msra.mxu2 %v5169_v22  ;;  %v5198_v22 = vld [vmem:[%s6487_s8 + $0x180] sm:$0xff] }
 0x785   :  { %2953 = vmatpush.bf16.msra.mxu2 %v5168_v33 }
 0x789   :  { %2954 = vmatpush.bf16.msra.mxu2 %v5167_v14  ;;  %v5196_v14 = vld [vmem:[%s6487_s8 + $0x170] sm:$0xff] }
 0x78d   :  { %2955 = vmatpush.bf16.msra.mxu2 %v5166_v41 }
 0x790   :  { %4663 = vmatmul.msk.bf16.vlgmr.msrb.gmra.mxu1 %vm2617_vm0, %v4662_v2 }
 0x791   :  { %3181 = vmatpush.bf16.msrb.mxu1 %v6169_v11 }
 0x7a0   :  { %4717 = vmatmul.msk.bf16.vlgmr.msra.gmra.mxu1 %vm2617_vm0, %v4716_v4 }
 0x7a1   :  { %3319 = vmatpush.bf16.msra.mxu1 %v6169_v11 }
 0x7b0   :  { %4771 = vmatmul.msk.bf16.vlgmr.msrb.gmra.mxu1 %vm2617_vm0, %v4770_v7 }
 0x7b1   :  { %3457 = vmatpush.bf16.msrb.mxu1 %v6169_v11 }
 0x7c0   :  { %4825 = vmatmul.msk.bf16.vlgmr.msra.gmra.mxu1 %vm2617_vm0, %v4824_v8  ;;  %v5193_v8 = vld [vmem:[%s6487_s8 + $0x158] sm:$0xff] }
 0x7c1   :  { %3595 = vmatpush.bf16.msra.mxu1 %v6169_v11 }
 0x7d0   :  { %4879 = vmatmul.msk.bf16.vlgmr.msrb.gmra.mxu1 %vm2617_vm0, %v4878_v31 }
 0x7e0   :  { %4933 = vmatmul.msk.bf16.vlgmr.msra.gmra.mxu1 %vm2617_vm0, %v4932_v18  ;;  %v5186_v18 = vld [vmem:[%s6487_s8 + $0x120] sm:$0xff] }
 0x7ed   :  { %v2634_v16 = vpop.f32.mrf.mxu1 }
 0x7ee   :  { %v2638_v24 = vpack.c.bf16 %v2634_v16, %v2634_v16  ;;  %v5178_v16 = vld [vmem:[%s6487_s8 + $0xe0] sm:$0xff] }
 0x7f0   :  { %4607 = vmatmul.msk.bf16.vlgmr.msra.gmra.mxu3 %vm2566_vm10, %v2638_v24 }
 0x7f1   :  { %3021 = vmatpush.bf16.msra.mxu3 %v5173_v45  ;;  %v5194_v45 = vld [vmem:[%s6487_s8 + $0x160] sm:$0xff] }
 0x7f3   :  { %v2661_v52 = vpop.f32.mrf.mxu2 }
 0x7f4   :  { %v2665_v5 = vpack.c.bf16 %v2661_v52, %v2661_v52  ;;  %v5189_v52 = vld [vmem:[%s6487_s8 + $0x138] sm:$0xff] }
 0x7f5   :  { %v2636_v25 = vpop.f32.mrf.mxu1  ;;  %3022 = vmatpush.bf16.msra.mxu3 %v5172_v43  ;;  %v5205_v43 = vld [vmem:[%s6487_s8 + $0x1b8] sm:$0xff] }
 0x7f6   :  { %4590 = vmatmul.msk.bf16.vlgmr.msra.gmra.mxu0 %vm2566_vm10, %v2665_v5 }
 0x7f7   :  { %2974 = vmatpush.bf16.msra.mxu0 %v6169_v11 }
 0x7f9   :  { %3023 = vmatpush.bf16.msra.mxu3 %v5171_v51 }
 0x7fb   :  { %v2663_v39 = vpop.f32.mrf.mxu2 }
 0x7fc   :  { %v5190_v39 = vld [vmem:[%s6487_s8 + $0x140] sm:$0xff] }
 0x7fd   :  { %v2769_v37 = vpop.f32.mrf.mxu1  ;;  %3024 = vmatpush.bf16.msra.mxu3 %v5170_v60 }
 0x7fe   :  { %v2773_v3 = vpack.c.bf16 %v2769_v37, %v2769_v37 }
 0x800   :  { %4634 = vmatmul.msk.bf16.vlgmr.msrb.gmra.mxu2 %vm2566_vm10, %v2773_v3  ;;  %v5201_v3 = vld [vmem:[%s6487_s8 + $0x198] sm:$0xff] }
 0x801   :  { %3090 = vmatpush.bf16.msrb.mxu2 %v5177_v13 }
 0x805   :  { %v2771_v28 = vpop.f32.mrf.mxu1  ;;  %3091 = vmatpush.bf16.msrb.mxu2 %v5176_v47 }
 0x806   :  { %4636 = vmatmul.msk.bf16.vlgmr.msrb.gmra.mxu0 %vm2617_vm0, %v4635_v27  ;;  %v5188_v27 = vld [vmem:[%s6487_s8 + $0x130] sm:$0xff] }
 0x807   :  { %3112 = vmatpush.bf16.msrb.mxu0 %v6169_v11 }
 0x809   :  { %3092 = vmatpush.bf16.msrb.mxu2 %v5175_v53 }
 0x80d   :  { %v2907_v15 = vpop.f32.mrf.mxu1  ;;  %3093 = vmatpush.bf16.msrb.mxu2 %v5174_v46 }
 0x80e   :  { %v2911_v26 = vpack.c.bf16 %v2907_v15, %v2907_v15  ;;  %v5208_v15 = vld [vmem:[%s6487_s8 + $0x1d0] sm:$0xff] }
 0x810   :  { %4688 = vmatmul.msk.bf16.vlgmr.msra.gmra.mxu2 %vm2566_vm10, %v2911_v26  ;;  %v5207_v26 = vld [vmem:[%s6487_s8 + $0x1c8] sm:$0xff] }
 0x811   :  { %3228 = vmatpush.bf16.msra.mxu2 %v5185_v63 }
 0x815   :  { %v2909_v49 = vpop.f32.mrf.mxu1  ;;  %3229 = vmatpush.bf16.msra.mxu2 %v5184_v1 }
 0x816   :  { %4690 = vmatmul.msk.bf16.vlgmr.msra.gmra.mxu0 %vm2617_vm0, %v4689_v48  ;;  %v5187_v48 = vld [vmem:[%s6487_s8 + $0x128] sm:$0xff]  ;;  %v5206_v49 = vld [vmem:[%s6487_s8 + $0x1c0] sm:$0xff] }
 0x817   :  { %3250 = vmatpush.bf16.msra.mxu0 %v6169_v11 }
 0x819   :  { %3230 = vmatpush.bf16.msra.mxu2 %v5183_v35 }
 0x81d   :  { %v3045_v61 = vpop.f32.mrf.mxu1  ;;  %3231 = vmatpush.bf16.msra.mxu2 %v5182_v6 }
 0x81e   :  { %v3049_v62 = vpack.c.bf16 %v3045_v61, %v3045_v61  ;;  %v5202_v61 = vld [vmem:[%s6487_s8 + $0x1a0] sm:$0xff] }
 0x820   :  { %4742 = vmatmul.msk.bf16.vlgmr.msrb.gmra.mxu2 %vm2566_vm10, %v3049_v62  ;;  %v5213_v62 = vld [vmem:[%s6487_s8 + $0x1f8] sm:$0xff] }
 0x821   :  { %3366 = vmatpush.bf16.msrb.mxu2 %v5193_v8 }
 0x825   :  { %v3047_v42 = vpop.f32.mrf.mxu1  ;;  %3367 = vmatpush.bf16.msrb.mxu2 %v5192_v59 }
 0x826   :  { %4744 = vmatmul.msk.bf16.vlgmr.msrb.gmra.mxu0 %vm2617_vm0, %v4743_v29  ;;  %v5200_v29 = vld [vmem:[%s6487_s8 + $0x190] sm:$0xff]  ;;  %v5210_v42 = vld [vmem:[%s6487_s8 + $0x1e0] sm:$0xff] }
 0x827   :  { %3388 = vmatpush.bf16.msrb.mxu0 %v6169_v11 }
 0x829   :  { %3368 = vmatpush.bf16.msrb.mxu2 %v5191_v23 }
 0x82d   :  { %v3183_v4 = vpop.f32.mrf.mxu1  ;;  %3369 = vmatpush.bf16.msrb.mxu2 %v5190_v39 }
 0x82e   :  { %v3187_v7 = vpack.c.bf16 %v3183_v4, %v3183_v4 }
 0x830   :  { %4796 = vmatmul.msk.bf16.vlgmr.msra.gmra.mxu2 %vm2566_vm10, %v3187_v7 }
 0x831   :  { %3504 = vmatpush.bf16.msra.mxu2 %v5201_v3 }
 0x835   :  { %v3185_v21 = vpop.f32.mrf.mxu1  ;;  %3505 = vmatpush.bf16.msra.mxu2 %v5200_v29 }
 0x836   :  { %4798 = vmatmul.msk.bf16.vlgmr.msra.gmra.mxu0 %vm2617_vm0, %v4797_v9  ;;  %v5199_v9 = vld [vmem:[%s6487_s8 + $0x188] sm:$0xff] }
 0x837   :  { %3526 = vmatpush.bf16.msra.mxu0 %v6169_v11 }
 0x839   :  { %3506 = vmatpush.bf16.msra.mxu2 %v5199_v9 }
 0x83d   :  { %v3321_v25 = vpop.f32.mrf.mxu1  ;;  %3507 = vmatpush.bf16.msra.mxu2 %v5198_v22 }
 0x83e   :  { %v3325_v37 = vpack.c.bf16 %v3321_v25, %v3321_v25 }
 0x840   :  { %4850 = vmatmul.msk.bf16.vlgmr.msrb.gmra.mxu2 %vm2566_vm10, %v3325_v37 }
 0x841   :  { %3642 = vmatpush.bf16.msrb.mxu2 %v5209_v36 }
 0x845   :  { %v3323_v31 = vpop.f32.mrf.mxu1  ;;  %3643 = vmatpush.bf16.msrb.mxu2 %v5208_v15 }
 0x846   :  { %4852 = vmatmul.msk.bf16.vlgmr.msrb.gmra.mxu0 %vm2617_vm0, %v4851_v12 }
 0x847   :  { %3664 = vmatpush.bf16.msrb.mxu0 %v6169_v11 }
 0x849   :  { %3644 = vmatpush.bf16.msrb.mxu2 %v5207_v26  ;;  %v5221_v26 = vld [vmem:[#allocation6 + $0x38] sm:$0xff] }
 0x84d   :  { %v3459_v30 = vpop.f32.mrf.mxu1  ;;  %3645 = vmatpush.bf16.msrb.mxu2 %v5206_v49  ;;  %v5220_v49 = vld [vmem:[#allocation6 + $0x30] sm:$0xff] }
 0x84e   :  { %v3463_v33 = vpack.c.bf16 %v3459_v30, %v3459_v30 }
 0x850   :  { %4904 = vmatmul.msk.bf16.vlgmr.msra.gmra.mxu2 %vm2566_vm10, %v3463_v33  ;;  %v5345_v33 = vmov 2.0  }
 0x851   :  { %5255 = vrcp.f32 %v5345_v33  ;;  %3964 = vmatpush.bf16.msra.mxu2 %v5221_v26 }
 0x855   :  { %v3461_v41 = vpop.f32.mrf.mxu1  ;;  %3965 = vmatpush.bf16.msra.mxu2 %v5220_v49 }
 0x856   :  { %4906 = vmatmul.msk.bf16.vlgmr.msra.gmra.mxu0 %vm2617_vm0, %v4905_v32  ;;  %v5197_v32 = vld [vmem:[%s6487_s8 + $0x178] sm:$0xff] }
 0x85d   :  { %v3597_v51 = vpop.f32.mrf.mxu1 }
 0x85e   :  { %v3601_v53 = vpack.c.bf16 %v3597_v51, %v3597_v51 }
 0x860   :  { %4958 = vmatmul.msk.bf16.vlgmr.msrb.gmra.mxu2 %vm2566_vm10, %v3601_v53 }
 0x865   :  { %v3599_v60 = vpop.f32.mrf.mxu1 }
 0x866   :  { %4960 = vmatmul.msk.bf16.vlgmr.msrb.gmra.mxu0 %vm2617_vm0, %v4959_v34  ;;  %v5229_v60 = vld [vmem:[#allocation6 + $0x78] sm:$0xff] }
 0x867   :  { %3977 = vmatpush.bf16.msra.mxu0 %v5229_v60  ;;  %v3770_v60 = vld [vmem:[%s6490_s11] sm:$0x3] }
 0x873   :  { %v2711_v54 = vpop.f32.mrf.mxu0  ;;  %v2751_v10 = vpop.f32.mrf.mxu3 }
 0x874   :  { %v2752_v58 = vadd.f32 %v2751_v10, %v2711_v54  ;;  %v5204_v54 = vld [vmem:[%s6487_s8 + $0x1b0] sm:$0xff] }
 0x87b   :  { %v2713_v0 = vpop.f32.mrf.mxu0  ;;  %v2753_v44 = vpop.f32.mrf.mxu3 }
 0x87c   :  { %v5212_v0 = vld [vmem:[%s6487_s8 + $0x1f0] sm:$0xff]  ;;  %v5211_v44 = vld [vmem:[%s6487_s8 + $0x1e8] sm:$0xff] }
 0x883   :  { %v2819_v11 = vpop.f32.mrf.mxu2  ;;  %v2838_v57 = vpop.f32.mrf.mxu0 }
 0x884   :  { %v6340_v56 = vadd.f32 %v2819_v11, %v2752_v58  ;;  %v2842_v2 = vpack.c.bf16 %v2838_v57, %v2838_v57  ;;  %v5203_v58 = vld [vmem:[%s6487_s8 + $0x1a8] sm:$0xff] }
 0x886   :  { %4661 = vmatmul.msk.bf16.vlgmr.msrb.gmra.mxu3 %vm2566_vm10, %v2842_v2 }
 0x887   :  { %3159 = vmatpush.bf16.msrb.mxu3 %v5181_v38 }
 0x88b   :  { %v2840_v20 = vpop.f32.mrf.mxu0  ;;  %3160 = vmatpush.bf16.msrb.mxu3 %v5180_v19  ;;  %v2821_v55 = vpop.f32.mrf.mxu2 }
 0x88f   :  { %3161 = vmatpush.bf16.msrb.mxu3 %v5179_v50 }
 0x893   :  { %v2976_v24 = vpop.f32.mrf.mxu0  ;;  %3162 = vmatpush.bf16.msrb.mxu3 %v5178_v16  ;;  %v2957_v6 = vpop.f32.mrf.mxu2 }
 0x894   :  { %v2980_v5 = vpack.c.bf16 %v2976_v24, %v2976_v24 }
 0x896   :  { %4715 = vmatmul.msk.bf16.vlgmr.msra.gmra.mxu3 %vm2566_vm10, %v2980_v5 }
 0x897   :  { %3297 = vmatpush.bf16.msra.mxu3 %v5189_v52 }
 0x89b   :  { %v2978_v28 = vpop.f32.mrf.mxu0  ;;  %3298 = vmatpush.bf16.msra.mxu3 %v5188_v27  ;;  %v2959_v7 = vpop.f32.mrf.mxu2 }
 0x89c   :  { %v5226_v7 = vld [vmem:[#allocation6 + $0x60] sm:$0xff] }
 0x89f   :  { %3299 = vmatpush.bf16.msra.mxu3 %v5187_v48 }
 0x8a3   :  { %v3114_v12 = vpop.f32.mrf.mxu0  ;;  %3300 = vmatpush.bf16.msra.mxu3 %v5186_v18  ;;  %v3095_v8 = vpop.f32.mrf.mxu2 }
 0x8a4   :  { %v3118_v17 = vpack.c.bf16 %v3114_v12, %v3114_v12 }
 0x8a6   :  { %4769 = vmatmul.msk.bf16.vlgmr.msrb.gmra.mxu3 %vm2566_vm10, %v3118_v17 }
 0x8a7   :  { %3435 = vmatpush.bf16.msrb.mxu3 %v5197_v32 }
 0x8ab   :  { %v3116_v34 = vpop.f32.mrf.mxu0  ;;  %3436 = vmatpush.bf16.msrb.mxu3 %v5196_v14  ;;  %v3097_v19 = vpop.f32.mrf.mxu2 }
 0x8af   :  { %3437 = vmatpush.bf16.msrb.mxu3 %v5195_v40  ;;  %v5256_v40 = vpop.eup %5255 }
 0x8b0   :  { %v3730_v41 = vmul.f32 2.0, %v5256_v40  ;;  %vm3734_vm2 = vweird.f32 %v5256_v40 }
 0x8b3   :  { %v3252_v13 = vpop.f32.mrf.mxu0  ;;  %3438 = vmatpush.bf16.msrb.mxu3 %v5194_v45  ;;  %v3233_v55 = vpop.f32.mrf.mxu2 }
 0x8b4   :  { %v3256_v47 = vpack.c.bf16 %v3252_v13, %v3252_v13 }
 0x8b6   :  { %4823 = vmatmul.msk.bf16.vlgmr.msra.gmra.mxu3 %vm2566_vm10, %v3256_v47  ;;  %v3731_v47 = vsub.f32 1.0, %v3730_v41  ;;  %v5260_v41 = vld [vmem:[%s6489_s10] sm:$0xff] }
 0x8b7   :  { %3573 = vmatpush.bf16.msra.mxu3 %v5205_v43 }
 0x8bb   :  { %v3254_v10 = vpop.f32.mrf.mxu0  ;;  %3574 = vmatpush.bf16.msra.mxu3 %v5204_v54  ;;  %v3235_v23 = vpop.f32.mrf.mxu2  ;;  %v3732_v54 = vmul.f32 %v5256_v40, %v3731_v47 }
 0x8bc   :  { %v5215_v23 = vld [vmem:[#allocation6 + $0x8] sm:$0xff] }
 0x8bf   :  { %3575 = vmatpush.bf16.msra.mxu3 %v5203_v58  ;;  %v5219_v58 = vld [vmem:[#allocation6 + $0x28] sm:$0xff] }
 0x8c0   :  { %3966 = vmatpush.bf16.msra.mxu2 %v5219_v58 }
 0x8c3   :  { %v3390_v46 = vpop.f32.mrf.mxu0  ;;  %3576 = vmatpush.bf16.msra.mxu3 %v5202_v61  ;;  %v3371_v5 = vpop.f32.mrf.mxu2 }
 0x8c4   :  { %v3394_v63 = vpack.c.bf16 %v3390_v46, %v3390_v46 }
 0x8c6   :  { %4877 = vmatmul.msk.bf16.vlgmr.msrb.gmra.mxu3 %vm2566_vm10, %v3394_v63 }
 0x8c7   :  { %3711 = vmatpush.bf16.msrb.mxu3 %v5213_v62  ;;  %v3733_v62 = vadd.f32 %v5256_v40, %v3732_v54 }
 0x8cb   :  { %v3392_v1 = vpop.f32.mrf.mxu0  ;;  %3712 = vmatpush.bf16.msrb.mxu3 %v5212_v0  ;;  %v3373_v39 = vpop.f32.mrf.mxu2  ;;  %v5218_v0 = vld [vmem:[#allocation6 + $0x20] sm:$0xff] }
 0x8cc   :  { %v5228_v1 = vld [vmem:[#allocation6 + $0x70] sm:$0xff]  ;;  %3967 = vmatpush.bf16.msra.mxu2 %v5218_v0  ;;  %v5214_v39 = vld [vmem:[#allocation6] sm:$0xff] }
 0x8cd   :  { %3978 = vmatpush.bf16.msra.mxu0 %v5228_v1 }
 0x8cf   :  { %3713 = vmatpush.bf16.msrb.mxu3 %v5211_v44 }
 0x8d3   :  { %v3528_v35 = vpop.f32.mrf.mxu0  ;;  %3714 = vmatpush.bf16.msrb.mxu3 %v5210_v42  ;;  %v3509_v28 = vpop.f32.mrf.mxu2  ;;  %v3735_v42 = vsel %vm3734_vm2, %v5256_v40, %v3733_v62 }
 0x8d4   :  { %v3532_v11 = vpack.c.bf16 %v3528_v35, %v3528_v35 }
 0x8d6   :  { %4931 = vmatmul.msk.bf16.vlgmr.msra.gmra.mxu3 %vm2566_vm10, %v3532_v11  ;;  %v5217_v11 = vld [vmem:[#allocation6 + $0x18] sm:$0xff] }
 0x8d7   :  { %3968 = vmatpush.bf16.msra.mxu2 %v5217_v11 }
 0x8db   :  { %v3530_v57 = vpop.f32.mrf.mxu0  ;;  %v3511_v29 = vpop.f32.mrf.mxu2 }
 0x8dc   :  { %v5227_v57 = vld [vmem:[#allocation6 + $0x68] sm:$0xff] }
 0x8dd   :  { %3979 = vmatpush.bf16.msra.mxu0 %v5227_v57  ;;  %v5223_v29 = vld [vmem:[#allocation6 + $0x48] sm:$0xff] }
 0x8e1   :  { %3980 = vmatpush.bf16.msra.mxu0 %v5226_v7 }
 0x8e3   :  { %v3666_v38 = vpop.f32.mrf.mxu0 }
 0x8e4   :  { %v3670_v2 = vpack.c.bf16 %v3666_v38, %v3666_v38 }
 0x8e6   :  { %4985 = vmatmul.msk.bf16.vlgmr.msrb.gmra.mxu3 %vm2566_vm10, %v3670_v2  ;;  %v3835_v2 = vld [vmem:[#allocation6 + $0x90] sm:$0xf] }
 0x8eb   :  { %v3668_v4 = vpop.f32.mrf.mxu0 }
 0x909   :  { %v2888_v20 = vpop.f32.mrf.mxu3 }
 0x90a   :  { %v2892_v50 = vadd.f32 %v2888_v20, %v6340_v56  ;;  %v3647_v56 = vpop.f32.mrf.mxu2 }
 0x90c   :  { %v2961_v59 = vadd.f32 %v2957_v6, %v2892_v50  ;;  %v5216_v6 = vld [vmem:[#allocation6 + $0x10] sm:$0xff]  ;;  %v5346_v50 = vmov 65535  }
 0x90d   :  { %3969 = vmatpush.bf16.msra.mxu2 %v5216_v6 }
 0x911   :  { %v2890_v21 = vpop.f32.mrf.mxu3  ;;  %3970 = vmatpush.bf16.msra.mxu2 %v5215_v23 }
 0x912   :  { %v3649_v32 = vpop.f32.mrf.mxu2 }
 0x915   :  { %3971 = vmatpush.bf16.msra.mxu2 %v5214_v39 }
 0x919   :  { %v3026_v16 = vpop.f32.mrf.mxu3 }
 0x91a   :  { %v3030_v24 = vadd.f32 %v3026_v16, %v2961_v59  ;;  %v3959_v59 = vsel %vm3958_vm3, 4294967295, %v5346_v50  ;;  %v5225_v16 = vld [vmem:[#allocation6 + $0x58] sm:$0xff] }
 0x91b   :  { %3981 = vmatpush.bf16.msra.mxu0 %v5225_v16 }
 0x91c   :  { %v3099_v52 = vadd.f32 %v3095_v8, %v3030_v24  ;;  %v3917_v8 = vunpack.c.l.b16 %v3835_v2 }
 0x91e   :  { %v3936_v20 = vpack.c.b16 %v3917_v8, %v3917_v8 }
 0x921   :  { %v3028_v25 = vpop.f32.mrf.mxu3 }
 0x929   :  { %v3164_v37 = vpop.f32.mrf.mxu3 }
 0x92a   :  { %v3168_v3 = vadd.f32 %v3164_v37, %v3099_v52  ;;  %v3798_v52 = vld [vmem:[%s6480_s1] sm:$0x7]  ;;  %v5224_v37 = vld [vmem:[#allocation6 + $0x50] sm:$0xff] }
 0x92b   :  { %3838 = vst [vmem:[#allocation1] ss:$9 sm:$0xff] %v3798_v52  ;;  %3982 = vmatpush.bf16.msra.mxu0 %v5224_v37 }
 0x92c   :  { %v3237_v27 = vadd.f32 %v3233_v55, %v3168_v3  ;;  %v3960_v55 = vsel %vm2621_vm15, %v3959_v59, 0  ;;  %v5231_v3 = vld [vmem:[#allocation6 + $0x88] sm:$0xff] }
 0x92d   :  { %v3962_v24 = vand.u32 %v3960_v55, %v3936_v20 }
 0x92f   :  { %3995 = vmatpush.bf16.msra.mxu3 %v3962_v24  ;;  %3983 = vmatpush.bf16.msra.mxu0 %v5223_v29 }
 0x931   :  { %v3166_v48 = vpop.f32.mrf.mxu3 }
 0x932   :  { %v3839_v48 = vld [vmem:[#allocation1] sm:$0xff] }
 0x933   :  { %3996 = vmatpush.bf16.msra.mxu3 %v5231_v3  ;;  %3972 = vmatmul.bf16.vlgmr.msra.gmra.mxu2 %v3839_v48 }
 0x939   :  { %v3302_v31 = vpop.f32.mrf.mxu3 }
 0x93a   :  { %v3306_v9 = vadd.f32 %v3302_v31, %v3237_v27  ;;  %v5230_v31 = vld [vmem:[#allocation6 + $0x80] sm:$0xff] }
 0x93b   :  { %3997 = vmatpush.bf16.msra.mxu3 %v5230_v31 }
 0x93c   :  { %v3375_v18 = vadd.f32 %v3371_v5, %v3306_v9 }
 0x941   :  { %v3304_v12 = vpop.f32.mrf.mxu3 }
 0x942   :  { %v5222_v12 = vld [vmem:[#allocation6 + $0x40] sm:$0xff] }
 0x943   :  { %3984 = vmatpush.bf16.msra.mxu0 %v5222_v12 }
 0x949   :  { %v3440_v17 = vpop.f32.mrf.mxu3 }
 0x94a   :  { %v3444_v36 = vadd.f32 %v3440_v17, %v3375_v18 }
 0x94c   :  { %v3513_v34 = vadd.f32 %v3509_v28, %v3444_v36 }
 0x951   :  { %v3442_v22 = vpop.f32.mrf.mxu3 }
 0x952   :  { %v3840_v22 = vld [vmem:[#allocation1 + $0x9] sm:$0xff] }
 0x953   :  { %3985 = vmatmul.bf16.vlgmr.msra.gmra.mxu0 %v3840_v22 }
 0x959   :  { %v3578_v30 = vpop.f32.mrf.mxu3 }
 0x95a   :  { %v3582_v15 = vadd.f32 %v3578_v30, %v3513_v34 }
 0x95c   :  { %v3651_v45 = vadd.f32 %v3647_v56, %v3582_v15  ;;  %v3841_v56 = vld [vmem:[#allocation1 + $0x12] sm:$0xff] }
 0x95d   :  { %5060 = vmatmul.msk.bf16.vlgmr.msra.gmra.mxu3 %vm3955_vm4, %v3841_v56 }
 0x961   :  { %v3580_v14 = vpop.f32.mrf.mxu3 }
 0x969   :  { %v3716_v13 = vpop.f32.mrf.mxu3 }
 0x96a   :  { %v6450_v43 = vadd.f32 %v3716_v13, %v3651_v45 }
 0x96c   :  { %v3722_v51 = vsel %vm3721_vm1, %v6450_v43, 0.0 }
 0x96d   :  { %v3723_v53 = vrot.slane %v3722_v51, 4 }
 0x96f   :  { %v3724_v10 = vadd.f32 %v3723_v53, %v3722_v51 }
 0x971   :  { %v3725_v61 = vrot.slane %v3724_v10, 2  ;;  %v3718_v46 = vpop.f32.mrf.mxu3 }
 0x973   :  { %v3726_v63 = vadd.f32 %v3725_v61, %v3724_v10 }
 0x975   :  { %v3727_v44 = vrot.slane %v3726_v63, 1 }
 0x977   :  { %v3728_v35 = vadd.f32 %v3727_v44, %v3726_v63 }
 0x979   :  { %v6454_v38 = vmul.f32 %v3735_v42, %v3728_v35 }
 0x97b   :  { %v3737_v4 = vsub.f32 %v6450_v43, %v6454_v38 }
 0x97d   :  { %v3738_v19 = vmul.f32 %v3737_v4, %v3737_v4 }
 0x97f   :  { %v3739_v21 = vsel %vm3721_vm1, %v3738_v19, 0.0 }
 0x980   :  { %v3740_v5 = vrot.slane %v3739_v21, 4 }
 0x982   :  { %v3741_v25 = vadd.f32 %v3740_v5, %v3739_v21 }
 0x984   :  { %v3742_v27 = vrot.slane %v3741_v25, 2 }
 0x986   :  { %v3743_v28 = vadd.f32 %v3742_v27, %v3741_v25 }
 0x988   :  { %v3744_v9 = vrot.slane %v3743_v28, 1 }
 0x98a   :  { %v3745_v18 = vadd.f32 %v3744_v9, %v3743_v28 }
 0x98c   :  { %v3746_v32 = vmul.f32 %v3745_v18, %v3735_v42 }
 0x98e   :  { %v3747_v17 = vadd.f32 1e-05, %v3746_v32 }
 0x990   :  { %5257 = vrsqrt.f32 %v3747_v17  ;;  %vm3754_vm6 = vweird.f32 %v3747_v17 }
 0x996   :  { %v5258_v30 = vpop.eup %5257 }
 0x997   :  { %v3749_v33 = vmul.f32 %v5258_v30, %v3747_v17  ;;  %vm3755_vm5 = vweird.f32 %v5258_v30 }
 0x998   :  { %vm3756_vm7 = vmor %vm3754_vm6, %vm3755_vm5 }
 0x999   :  { %v3750_v36 = vmul.f32 %v5258_v30, %v3749_v33 }
 0x99b   :  { %v3751_v14 = vmul.f32 0.5, %v3750_v36 }
 0x99d   :  { %v3752_v34 = vsub.f32 1.5, %v3751_v14 }
 0x99f   :  { %v3753_v40 = vmul.f32 %v5258_v30, %v3752_v34 }
 0x9a1   :  { %v3757_v15 = vsel %vm3756_vm7, %v5258_v30, %v3753_v40 }
 0x9a2   :  { %v3758_v26 = vmul.f32 %v5260_v41, %v3757_v15 }
 0x9a4   :  { %v3759_v45 = vmul.f32 %v3758_v26, %v6454_v38  ;;  %v3764_v47 = vperm.slane %v3758_v26, 6 }
 0x9a6   :  { %v3761_v13 = vrot.slane %v3759_v45, 7  ;;  %v3765_v51 = vmul.f32 %v3764_v47, %v6450_v43  ;;  %v5242_v43 = vld [vmem:[%s6489_s10 + $0x8] ss:$0 sm:$0xff] }
 0x9a8   :  { %v3763_v49 = vsub.f32 %v5260_v41, %v3761_v13 }
 0x9aa   :  { %v3766_v53 = vperm.slane %v3763_v49, 7 }
 0x9ac   :  { %v3767_v54 = vadd.f32 %v3766_v53, %v3765_v51 }
 0x9ae   :  { %v3768_v10 = vmul.f32 0.2, %v3767_v54 }
 0x9b0   :  { %v3769_v58 = vmax.f32 %v3767_v54, %v3768_v10 }
 0x9b2   :  { %4986 = vmatpush.msk.msrb.mxu1 %vm3721_vm1, %v3769_v58 }
 0x9b3   :  { %4987 = vmatmul.msk.f32.vlgmr.msrb.gmra.mxu1 %vm3771_vm8, %v3770_v60 }
 0x9b6   :  { %v3973_v61 = vpop.f32.mrf.mxu2 }
 0x9b7   :  { %v3974_v44 = vadd.f32 %v5242_v43, %v3973_v61 }
 0x9be   :  { %v3975_v63 = vpop.f32.mrf.mxu2 }
 0x9d0   :  { %v3986_v46 = vpop.f32.mrf.mxu0 }
 0x9d1   :  { %v3987_v42 = vadd.f32 %v3986_v46, %v3974_v44 }
 0x9d8   :  { %v3988_v0 = vpop.f32.mrf.mxu0 }
 0x9e0   :  { %v3999_v62 = vpop.f32.mrf.mxu3 }
 0x9e1   :  { %v4000_v35 = vadd.f32 %v3999_v62, %v3987_v42 }
 0x9e8   :  { %v4001_v1 = vpop.f32.mrf.mxu3 }
 0xa30   :  { %v3795_v11 = vpop.f32.mrf.mxu1 }
 0xa31   :  { %v4003_v57 = vmul.f32 %v4000_v35, %v3795_v11 }
 0xa33   :  { %v4004_v38 = vsel %vm3721_vm1, %v4003_v57, 0.0 }
 0xa34   :  { %4005 = vadd.xlane.f32.xlu0 %v4004_v38 }
 0xaa7   :  { %v4006_v2 = vpop.xlane.xlu0 %4005 }
 0xaa8   :  { %4008 = vst.msk [vmem:[%s6491_s12] sm:$0x3] %vm4007_vm9, %v4006_v2 }
 0xaa9   :  { %4013 = vsyncpa [#allocation3], 1 }
 0xaaa   :  { %4014 = vsyncpa [#allocation5], 1 }

</bundles_post_ra>
